<compile_context>
chip_gen: v6e
topology: v6e:2x2x1
jax: 0.10.0
libtpu: 0.0.40
codegen_flags: <defaults>
</compile_context>

<pallas_src>
import jax
import jax.numpy as jnp
from jax.experimental import pallas as pl
from jax.experimental.pallas import tpu as pltpu

# ---- module configuration (matches InverseAtlasnet(num_primitives, code_size, 'square')) ----
NUM_PRIMITIVES = 4
CODE_SIZE = 32
HIDDEN = 128          # MappingManifold default hidden_size
NUM_LAYERS = 2        # MappingManifold default num_layers
PRIMITIVE_TYPE = "square"
OUT_DIM = 2 if PRIMITIVE_TYPE == "square" else 3
OUT_TOT = OUT_DIM + 1
HEAD_W = NUM_PRIMITIVES * OUT_DIM + NUM_PRIMITIVES       # [uv | logits] = 12
OUT_W = HEAD_W + NUM_PRIMITIVES                          # [uv | logits | weights] = 16
TM_MAX = 1024


def _wide_mxu_bf16_valu():
    """True on v6e/v7x-class chips (2x256x256 MXU tiles + bf16 VALU); False on <=v5."""
    try:
        kind = jax.devices()[0].device_kind.lower()
    except Exception:
        return True
    return not any(tag in kind for tag in ("v2", "v3", "v4", "v5"))


def _choose_tm(n_batch, n_points):
    """Largest tile (<=TM_MAX, multiple of 256) keeping >=2 total grid steps (v7x megacore)."""
    tm = min(TM_MAX, -(-n_points // 256) * 256)
    while tm > 256 and n_batch * (-(-n_points // tm)) < 2:
        tm //= 2
    return tm


def _make_kernel(num_groups, group_width, epi_dtype):
    """Build the kernel for a given primitive-group packing (1 or 2 primitives per group)."""
    P, CS, H = NUM_PRIMITIVES, CODE_SIZE, HIDDEN

    def kernel(pts_ref, lat_ref, w1_ref, b1_ref, w2g_ref, b2g_ref,
               wlg_ref, blg_ref, wbd_ref, bbd_ref, out_ref, x0_scr, h_scr):
        pts = pts_ref[0]                               # (TM, 3) f32
        lat = lat_ref[0]                               # (1, P*CS) f32 (this batch row)

        # ---- fused first linear across primitives, f32 on the VPU (K=3 -> 3 broadcast FMAs) ----
        h0 = (pts[:, 0:1] * w1_ref[0:1, :]
              + pts[:, 1:2] * w1_ref[1:2, :]
              + pts[:, 2:3] * w1_ref[2:3, :])          # (TM, P*CS)
        x0 = jnp.maximum(h0 + b1_ref[...] + lat, 0.0)  # relu(linear1(x) + latent)
        x0_scr[...] = x0.astype(jnp.bfloat16)          # bf16 MXU operand, bounds vreg pressure

        # ---- grouped MLP trunk: block-diagonal bf16 matmuls, f32 accumulation ----
        for g in range(num_groups):
            x = jnp.dot(x0_scr[...], w2g_ref[g], preferred_element_type=jnp.float32)
            x = jnp.maximum(x.astype(epi_dtype) + b2g_ref[g][None, :], 0.0)
            for l in range(NUM_LAYERS):
                x = jnp.dot(x.astype(jnp.bfloat16), wlg_ref[g, l],
                            preferred_element_type=jnp.float32)
                x = jnp.maximum(x.astype(epi_dtype) + blg_ref[g, l][None, :], 0.0)
            # lane-aligned wide store into the packed (primitive-major) hidden layout
            h_scr[:, g * group_width:(g + 1) * group_width] = x.astype(jnp.bfloat16)

        # ---- block-diagonal last linear: one matmul -> all uv columns + logits, packed ----
        o = jnp.dot(h_scr[...], wbd_ref[...], preferred_element_type=jnp.float32) + bbd_ref[...]
        uv = o[:, :P * OUT_DIM]
        if OUT_DIM == 2:
            uv = jnp.tanh(uv)                          # torch.tanh branch ('square')
        else:
            # F.normalize branch ('sphere' etc.): per-primitive L2 normalize over 3 lanes.
            pieces = []
            for p in range(P):
                u = o[:, p * OUT_DIM:(p + 1) * OUT_DIM]
                nrm = jnp.sqrt(jnp.sum(u * u, axis=-1, keepdims=True))
                pieces.append(u / jnp.maximum(nrm, 1e-12))
            uv = jnp.concatenate(pieces, axis=-1)

        logits = o[:, P * OUT_DIM:]                    # (TM, P)
        m = jnp.max(logits, axis=-1, keepdims=True)
        e = jnp.exp(logits - m)
        # approx reciprocal (EUP): weights sum to 1 only to ~1e-3 relative error.
        wts = e * pl.reciprocal(jnp.sum(e, axis=-1, keepdims=True), approx=True)

        # single packed store: [uv (P*OUT_DIM) | logits (P) | weights (P)]
        out_ref[0] = jnp.concatenate([uv, logits, wts], axis=-1)

    return kernel


def _pack_params(params, group, epi_dtype):
    """Pack per-primitive weights into MXU-width-matched block-diagonal group weights."""
    w1, b1, w2, b2, wl, bl, wlast, blast = params
    P, CS, H = NUM_PRIMITIVES, CODE_SIZE, HIDDEN
    G = group * H
    NG = P // group

    # fused first layer: (3, P*CS) f32 (computed on the VPU) + bias (1, P*CS)
    w1_cat = jnp.concatenate([w1[p] for p in range(P)], axis=1).astype(jnp.float32)
    b1_cat = jnp.concatenate([b1[p] for p in range(P)], axis=0).reshape(1, P * CS)
    b1_cat = b1_cat.astype(jnp.float32)

    # grouped second linear (folded into the block-diagonal structure) + hidden layers
    w2g = jnp.zeros((NG, P * CS, G), jnp.bfloat16)
    b2g = jnp.zeros((NG, G), epi_dtype)
    wlg = jnp.zeros((NG, NUM_LAYERS, G, G), jnp.bfloat16)
    blg = jnp.zeros((NG, NUM_LAYERS, G), epi_dtype)
    for g in range(NG):
        for j in range(group):
            p = g * group + j
            w2g = w2g.at[g, p * CS:(p + 1) * CS, j * H:(j + 1) * H].set(
                w2[p].astype(jnp.bfloat16))
            b2g = b2g.at[g, j * H:(j + 1) * H].set(b2[p].astype(epi_dtype))
            for l in range(NUM_LAYERS):
                wlg = wlg.at[g, l, j * H:(j + 1) * H, j * H:(j + 1) * H].set(
                    wl[p, l].astype(jnp.bfloat16))
                blg = blg.at[g, l, j * H:(j + 1) * H].set(bl[p, l].astype(epi_dtype))

    # block-diagonal last linear; output columns = [uv (p-major, d-minor) | logit per p]
    w_bd = jnp.zeros((P * H, HEAD_W), jnp.bfloat16)
    b_bd = jnp.zeros((1, HEAD_W), jnp.float32)
    for p in range(P):
        w_bd = w_bd.at[p * H:(p + 1) * H, p * OUT_DIM:(p + 1) * OUT_DIM].set(
            wlast[p, :, :OUT_DIM].astype(jnp.bfloat16))
        w_bd = w_bd.at[p * H:(p + 1) * H, P * OUT_DIM + p].set(
            wlast[p, :, OUT_DIM].astype(jnp.bfloat16))
        b_bd = b_bd.at[0, p * OUT_DIM:(p + 1) * OUT_DIM].set(
            blast[p, :OUT_DIM].astype(jnp.float32))
        b_bd = b_bd.at[0, P * OUT_DIM + p].set(blast[p, OUT_DIM].astype(jnp.float32))

    return w1_cat, b1_cat, w2g, b2g, wlg, blg, w_bd, b_bd


def init_params(key):
    """Deterministic synthetic parameters (weights stored as (P, in_dim, out_dim))."""
    ks = jax.random.split(key, 8)

    def nrm(k, shape, scale, dtype=jnp.float32):
        return (scale * jax.random.normal(k, shape, dtype=jnp.float32)).astype(dtype)

    w1 = nrm(ks[0], (NUM_PRIMITIVES, 3, CODE_SIZE), 0.5)
    b1 = nrm(ks[1], (NUM_PRIMITIVES, CODE_SIZE), 0.1)
    w2 = nrm(ks[2], (NUM_PRIMITIVES, CODE_SIZE, HIDDEN), 0.2, jnp.bfloat16)
    b2 = nrm(ks[3], (NUM_PRIMITIVES, HIDDEN), 0.1)
    wl = nrm(ks[4], (NUM_PRIMITIVES, NUM_LAYERS, HIDDEN, HIDDEN), 0.1, jnp.bfloat16)
    bl = nrm(ks[5], (NUM_PRIMITIVES, NUM_LAYERS, HIDDEN), 0.1)
    wlast = nrm(ks[6], (NUM_PRIMITIVES, HIDDEN, OUT_TOT), 0.1, jnp.bfloat16)
    blast = nrm(ks[7], (NUM_PRIMITIVES, OUT_TOT), 0.1)
    return (w1, b1, w2, b2, wl, bl, wlast, blast)


def inverse_atlasnet_forward(latent, points, params):
    """latent: (N, code_size); points: (N, *, 3). Returns (uv, weights, weights_logits)."""
    P, CS, H = NUM_PRIMITIVES, CODE_SIZE, HIDDEN
    input_shape = points.shape
    N = input_shape[0]
    pts = points.reshape(N, -1, 3).astype(jnp.float32)
    M = pts.shape[1]

    # chip-generation gating: 256-wide pair packing + bf16 epilogue on v6e/v7x, 128-wide f32 on v5e
    wide = _wide_mxu_bf16_valu()
    group = 2 if wide else 1
    epi_dtype = jnp.bfloat16 if wide else jnp.float32
    G = group * H
    NG = P // group

    w1_cat, b1_cat, w2g, b2g, wlg, blg, w_bd, b_bd = _pack_params(params, group, epi_dtype)
    # latent pre-tiled across primitives: (N, 1, P*CS); pipeline delivers one batch row per step
    lat_tiled = jnp.tile(latent.astype(jnp.float32), (1, P)).reshape(N, 1, P * CS)

    # ---- tile the point axis ----
    tm = _choose_tm(N, M)
    M_pad = ((M + tm - 1) // tm) * tm
    if M_pad != M:
        pts = jnp.pad(pts, ((0, 0), (0, M_pad - M), (0, 0)))
    grid = (N, M_pad // tm)

    kernel = _make_kernel(NG, G, epi_dtype)

    def _full(a):
        nd = a.ndim
        return pl.BlockSpec(a.shape, lambda n, m, nd=nd: (0,) * nd)

    out = pl.pallas_call(
        kernel,
        out_shape=jax.ShapeDtypeStruct((N, M_pad, OUT_W), jnp.float32),
        grid=grid,
        in_specs=[
            pl.BlockSpec((1, tm, 3), lambda n, m: (n, m, 0)),       # points
            pl.BlockSpec((1, 1, P * CS), lambda n, m: (n, 0, 0)),   # latent (per-batch row)
            _full(w1_cat), _full(b1_cat),
            _full(w2g), _full(b2g),
            _full(wlg), _full(blg),
            _full(w_bd), _full(b_bd),
        ],
        out_specs=pl.BlockSpec((1, tm, OUT_W), lambda n, m: (n, m, 0)),
        scratch_shapes=[
            pltpu.VMEM((tm, P * CS), jnp.bfloat16),   # bf16 fused first-layer activation
            pltpu.VMEM((tm, P * H), jnp.bfloat16),    # packed hidden features (block-diag head)
        ],
        compiler_params=pltpu.CompilerParams(
            dimension_semantics=("parallel", "parallel")),
    )(pts, lat_tiled, w1_cat, b1_cat, w2g, b2g, wlg, blg, w_bd, b_bd)

    out = out[:, :M, :]                               # drop padded tail rows
    base = input_shape[:-1]
    uv = out[..., :P * OUT_DIM].reshape(base + (P, OUT_DIM))
    logits = out[..., P * OUT_DIM:P * OUT_DIM + P].reshape(base + (P,))
    wts = out[..., P * OUT_DIM + P:].reshape(base + (P,))
    return uv, wts, logits


def reference_forward(latent, points, params):
    """Plain-JAX f32 reference mirroring the PyTorch module semantics."""
    w1, b1, w2, b2, wl, bl, wlast, blast = params
    f32 = jnp.float32
    hp = jax.lax.Precision.HIGHEST
    input_shape = points.shape
    N = input_shape[0]
    pts = points.reshape(N, -1, 3).astype(f32)
    lat = latent.astype(f32)
    outs = []
    for p in range(NUM_PRIMITIVES):
        x = jnp.einsum("nmi,io->nmo", pts, w1[p].astype(f32), precision=hp)
        x = x + b1[p].astype(f32) + lat[:, None, :]
        x = jax.nn.relu(x)
        x = jax.nn.relu(
            jnp.einsum("nmi,io->nmo", x, w2[p].astype(f32), precision=hp) + b2[p].astype(f32))
        for l in range(NUM_LAYERS):
            x = jax.nn.relu(
                jnp.einsum("nmi,io->nmo", x, wl[p, l].astype(f32), precision=hp)
                + bl[p, l].astype(f32))
        outs.append(
            jnp.einsum("nmi,io->nmo", x, wlast[p].astype(f32), precision=hp)
            + blast[p].astype(f32))
    out = jnp.stack(outs, axis=-2)                           # (N, M, P, OUT_TOT)
    out = out.reshape(input_shape[:-1] + out.shape[-2:])
    if OUT_DIM == 2:
        uv = jnp.tanh(out[..., :-1])
    else:
        nrm = jnp.linalg.norm(out[..., :-1], axis=-1, keepdims=True)
        uv = out[..., :-1] / jnp.maximum(nrm, 1e-12)
    logits = out[..., -1]
    wts = jax.nn.softmax(logits, axis=-1)
    return uv, wts, logits


if __name__ == "__main__":
    key = jax.random.PRNGKey(0)
    k_param, k_lat, k_pts = jax.random.split(key, 3)

    params = init_params(k_param)
    latent = jax.random.normal(k_lat, (2, CODE_SIZE), dtype=jnp.float32)
    points = jax.random.normal(k_pts, (2, 16, 16, 3), dtype=jnp.float32)

    fwd = jax.jit(inverse_atlasnet_forward)
    uv, wts, logits = fwd(latent, points, params)
    jax.block_until_ready((uv, wts, logits))

    uv_r, wts_r, logits_r = reference_forward(latent, points, params)
    assert uv.shape == (2, 16, 16, NUM_PRIMITIVES, OUT_DIM)
    assert wts.shape == (2, 16, 16, NUM_PRIMITIVES)
    assert logits.shape == (2, 16, 16, NUM_PRIMITIVES)
    # bf16 MXU operands (+ bf16 epilogue on v6e/v7x) with f32 accumulation vs pure-f32 reference
    assert jnp.allclose(uv, uv_r, atol=4e-2, rtol=4e-2)
    assert jnp.allclose(wts, wts_r, atol=4e-2, rtol=4e-2)
    assert jnp.allclose(logits, logits_r, atol=4e-2, rtol=4e-2)

    print("KERNEL_OK")
</pallas_src>

<mosaic_0001>
module attributes {stable_mosaic.version = 11 : i64} {
  func.func @kernel(%arg0: i32, %arg1: i32, %arg2: memref<1x256x3xf32, #tpu.memory_space<vmem>>, %arg3: memref<1x1x128xf32, #tpu.memory_space<vmem>>, %arg4: memref<3x128xf32, #tpu.memory_space<vmem>>, %arg5: memref<1x128xf32, #tpu.memory_space<vmem>>, %arg6: memref<2x128x256xbf16, #tpu.memory_space<vmem>>, %arg7: memref<2x256xbf16, #tpu.memory_space<vmem>>, %arg8: memref<2x2x256x256xbf16, #tpu.memory_space<vmem>>, %arg9: memref<2x2x256xbf16, #tpu.memory_space<vmem>>, %arg10: memref<512x12xbf16, #tpu.memory_space<vmem>>, %arg11: memref<1x12xf32, #tpu.memory_space<vmem>>, %arg12: memref<1x256x16xf32, #tpu.memory_space<vmem>>, %arg13: memref<256x128xbf16, #tpu.memory_space<vmem>>, %arg14: memref<256x512xbf16, #tpu.memory_space<vmem>>) attributes {dimension_semantics = [#tpu.dimension_semantics<parallel>, #tpu.dimension_semantics<parallel>], iteration_bounds = array<i64: 2, 1>, scalar_prefetch = 0 : i64, scratch_operands = 2 : i64, tpu.core_type = #tpu.core_type<tc>, window_params = [{transform_indices = @transform_0, window_bounds = array<i64: 1, 256, 3>}, {transform_indices = @transform_1, window_bounds = array<i64: 1, 1, 128>}, {pipeline_mode = #tpu.pipeline_mode<synchronous>, transform_indices = @transform_2, window_bounds = array<i64: 3, 128>}, {pipeline_mode = #tpu.pipeline_mode<synchronous>, transform_indices = @transform_3, window_bounds = array<i64: 1, 128>}, {pipeline_mode = #tpu.pipeline_mode<synchronous>, transform_indices = @transform_4, window_bounds = array<i64: 2, 128, 256>}, {pipeline_mode = #tpu.pipeline_mode<synchronous>, transform_indices = @transform_5, window_bounds = array<i64: 2, 256>}, {pipeline_mode = #tpu.pipeline_mode<synchronous>, transform_indices = @transform_6, window_bounds = array<i64: 2, 2, 256, 256>}, {pipeline_mode = #tpu.pipeline_mode<synchronous>, transform_indices = @transform_7, window_bounds = array<i64: 2, 2, 256>}, {pipeline_mode = #tpu.pipeline_mode<synchronous>, transform_indices = @transform_8, window_bounds = array<i64: 512, 12>}, {pipeline_mode = #tpu.pipeline_mode<synchronous>, transform_indices = @transform_9, window_bounds = array<i64: 1, 12>}, {transform_indices = @transform_10, window_bounds = array<i64: 1, 256, 16>}]} {
    %c0 = arith.constant 0 : index
    %c0_0 = arith.constant 0 : index
    %c0_1 = arith.constant 0 : index
    %0 = vector.load %arg2[%c0, %c0_0, %c0_1] : memref<1x256x3xf32, #tpu.memory_space<vmem>>, vector<1x256x3xf32>
    %1 = vector.shape_cast %0 : vector<1x256x3xf32> to vector<256x3xf32>
    %c0_2 = arith.constant 0 : index
    %c0_3 = arith.constant 0 : index
    %c0_4 = arith.constant 0 : index
    %2 = vector.load %arg3[%c0_2, %c0_3, %c0_4] : memref<1x1x128xf32, #tpu.memory_space<vmem>>, vector<1x1x128xf32>
    %3 = vector.shape_cast %2 : vector<1x1x128xf32> to vector<1x128xf32>
    %4 = vector.extract_strided_slice %1 {offsets = [0, 0], sizes = [256, 1], strides = [1, 1]} : vector<256x3xf32> to vector<256x1xf32>
    %c0_5 = arith.constant 0 : index
    %c0_6 = arith.constant 0 : index
    %5 = vector.load %arg4[%c0_5, %c0_6] : memref<3x128xf32, #tpu.memory_space<vmem>>, vector<1x128xf32>
    %6 = vector.broadcast %4 : vector<256x1xf32> to vector<256x128xf32>
    %7 = vector.broadcast %5 : vector<1x128xf32> to vector<256x128xf32>
    %8 = arith.mulf %6, %7 : vector<256x128xf32>
    %9 = vector.extract_strided_slice %1 {offsets = [0, 1], sizes = [256, 1], strides = [1, 1]} : vector<256x3xf32> to vector<256x1xf32>
    %c1 = arith.constant 1 : index
    %c0_7 = arith.constant 0 : index
    %10 = vector.load %arg4[%c1, %c0_7] : memref<3x128xf32, #tpu.memory_space<vmem>>, vector<1x128xf32>
    %11 = vector.broadcast %9 : vector<256x1xf32> to vector<256x128xf32>
    %12 = vector.broadcast %10 : vector<1x128xf32> to vector<256x128xf32>
    %13 = arith.mulf %11, %12 : vector<256x128xf32>
    %14 = arith.addf %8, %13 : vector<256x128xf32>
    %15 = vector.extract_strided_slice %1 {offsets = [0, 2], sizes = [256, 1], strides = [1, 1]} : vector<256x3xf32> to vector<256x1xf32>
    %c2 = arith.constant 2 : index
    %c0_8 = arith.constant 0 : index
    %16 = vector.load %arg4[%c2, %c0_8] : memref<3x128xf32, #tpu.memory_space<vmem>>, vector<1x128xf32>
    %17 = vector.broadcast %15 : vector<256x1xf32> to vector<256x128xf32>
    %18 = vector.broadcast %16 : vector<1x128xf32> to vector<256x128xf32>
    %19 = arith.mulf %17, %18 : vector<256x128xf32>
    %20 = arith.addf %14, %19 : vector<256x128xf32>
    %c0_9 = arith.constant 0 : index
    %c0_10 = arith.constant 0 : index
    %21 = vector.load %arg5[%c0_9, %c0_10] : memref<1x128xf32, #tpu.memory_space<vmem>>, vector<1x128xf32>
    %22 = vector.broadcast %21 : vector<1x128xf32> to vector<256x128xf32>
    %23 = arith.addf %20, %22 : vector<256x128xf32>
    %24 = vector.broadcast %3 : vector<1x128xf32> to vector<256x128xf32>
    %25 = arith.addf %23, %24 : vector<256x128xf32>
    %cst = arith.constant 0.000000e+00 : f32
    %26 = vector.broadcast %cst : f32 to vector<256x128xf32>
    %27 = arith.maximumf %25, %26 : vector<256x128xf32>
    %28 = arith.truncf %27 : vector<256x128xf32> to vector<256x128xbf16>
    %c0_11 = arith.constant 0 : index
    %c0_12 = arith.constant 0 : index
    %29 = vector.load %arg13[%c0_11, %c0_12] : memref<256x128xbf16, #tpu.memory_space<vmem>>, vector<256x128xbf16>
    tpu.vector_store %arg13[%c0_11, %c0_12], %28 {strides = array<i32>} : memref<256x128xbf16, #tpu.memory_space<vmem>>, vector<256x128xbf16>,
    %c0_13 = arith.constant 0 : index
    %c0_14 = arith.constant 0 : index
    %30 = vector.load %arg13[%c0_13, %c0_14] : memref<256x128xbf16, #tpu.memory_space<vmem>>, vector<256x128xbf16>
    %c0_15 = arith.constant 0 : index
    %c0_16 = arith.constant 0 : index
    %c0_17 = arith.constant 0 : index
    %31 = vector.load %arg6[%c0_15, %c0_16, %c0_17] : memref<2x128x256xbf16, #tpu.memory_space<vmem>>, vector<1x128x256xbf16>
    %32 = vector.shape_cast %31 : vector<1x128x256xbf16> to vector<128x256xbf16>
    %cst_18 = arith.constant dense<0.000000e+00> : vector<256x256xf32>
    %33 = tpu.matmul %30, %32, %cst_18 {dimension_numbers = #tpu.dot_dimension_numbers<[1], [0], [0], [1], [0, 0, 1, 1], [], []>} : vector<256x128xbf16>, vector<128x256xbf16>, vector<256x256xf32> -> vector<256x256xf32>
    %34 = arith.truncf %33 : vector<256x256xf32> to vector<256x256xbf16>
    %c0_19 = arith.constant 0 : index
    %c0_20 = arith.constant 0 : index
    %35 = vector.load %arg7[%c0_19, %c0_20] : memref<2x256xbf16, #tpu.memory_space<vmem>>, vector<1x256xbf16>
    %36 = vector.shape_cast %35 : vector<1x256xbf16> to vector<256xbf16>
    %37 = vector.shape_cast %36 : vector<256xbf16> to vector<1x256xbf16>
    %38 = vector.broadcast %37 : vector<1x256xbf16> to vector<256x256xbf16>
    %39 = arith.addf %34, %38 : vector<256x256xbf16>
    %cst_21 = arith.constant 0.000000e+00 : bf16
    %40 = vector.broadcast %cst_21 : bf16 to vector<256x256xbf16>
    %41 = arith.maximumf %39, %40 : vector<256x256xbf16>
    %c0_22 = arith.constant 0 : index
    %c0_23 = arith.constant 0 : index
    %c0_24 = arith.constant 0 : index
    %c0_25 = arith.constant 0 : index
    %42 = vector.load %arg8[%c0_22, %c0_23, %c0_24, %c0_25] : memref<2x2x256x256xbf16, #tpu.memory_space<vmem>>, vector<1x1x256x256xbf16>
    %43 = vector.shape_cast %42 : vector<1x1x256x256xbf16> to vector<256x256xbf16>
    %cst_26 = arith.constant dense<0.000000e+00> : vector<256x256xf32>
    %44 = tpu.matmul %41, %43, %cst_26 {dimension_numbers = #tpu.dot_dimension_numbers<[1], [0], [0], [1], [0, 0, 1, 1], [], []>} : vector<256x256xbf16>, vector<256x256xbf16>, vector<256x256xf32> -> vector<256x256xf32>
    %45 = arith.truncf %44 : vector<256x256xf32> to vector<256x256xbf16>
    %c0_27 = arith.constant 0 : index
    %c0_28 = arith.constant 0 : index
    %c0_29 = arith.constant 0 : index
    %46 = vector.load %arg9[%c0_27, %c0_28, %c0_29] : memref<2x2x256xbf16, #tpu.memory_space<vmem>>, vector<1x1x256xbf16>
    %47 = vector.shape_cast %46 : vector<1x1x256xbf16> to vector<256xbf16>
    %48 = vector.shape_cast %47 : vector<256xbf16> to vector<1x256xbf16>
    %49 = vector.broadcast %48 : vector<1x256xbf16> to vector<256x256xbf16>
    %50 = arith.addf %45, %49 : vector<256x256xbf16>
    %cst_30 = arith.constant 0.000000e+00 : bf16
    %51 = vector.broadcast %cst_30 : bf16 to vector<256x256xbf16>
    %52 = arith.maximumf %50, %51 : vector<256x256xbf16>
    %c0_31 = arith.constant 0 : index
    %c1_32 = arith.constant 1 : index
    %c0_33 = arith.constant 0 : index
    %c0_34 = arith.constant 0 : index
    %53 = vector.load %arg8[%c0_31, %c1_32, %c0_33, %c0_34] : memref<2x2x256x256xbf16, #tpu.memory_space<vmem>>, vector<1x1x256x256xbf16>
    %54 = vector.shape_cast %53 : vector<1x1x256x256xbf16> to vector<256x256xbf16>
    %cst_35 = arith.constant dense<0.000000e+00> : vector<256x256xf32>
    %55 = tpu.matmul %52, %54, %cst_35 {dimension_numbers = #tpu.dot_dimension_numbers<[1], [0], [0], [1], [0, 0, 1, 1], [], []>} : vector<256x256xbf16>, vector<256x256xbf16>, vector<256x256xf32> -> vector<256x256xf32>
    %56 = arith.truncf %55 : vector<256x256xf32> to vector<256x256xbf16>
    %c0_36 = arith.constant 0 : index
    %c1_37 = arith.constant 1 : index
    %c0_38 = arith.constant 0 : index
    %57 = vector.load %arg9[%c0_36, %c1_37, %c0_38] : memref<2x2x256xbf16, #tpu.memory_space<vmem>>, vector<1x1x256xbf16>
    %58 = vector.shape_cast %57 : vector<1x1x256xbf16> to vector<256xbf16>
    %59 = vector.shape_cast %58 : vector<256xbf16> to vector<1x256xbf16>
    %60 = vector.broadcast %59 : vector<1x256xbf16> to vector<256x256xbf16>
    %61 = arith.addf %56, %60 : vector<256x256xbf16>
    %cst_39 = arith.constant 0.000000e+00 : bf16
    %62 = vector.broadcast %cst_39 : bf16 to vector<256x256xbf16>
    %63 = arith.maximumf %61, %62 : vector<256x256xbf16>
    %c0_40 = arith.constant 0 : index
    %c0_41 = arith.constant 0 : index
    %64 = vector.load %arg14[%c0_40, %c0_41] : memref<256x512xbf16, #tpu.memory_space<vmem>>, vector<256x256xbf16>
    tpu.vector_store %arg14[%c0_40, %c0_41], %63 {strides = array<i32>} : memref<256x512xbf16, #tpu.memory_space<vmem>>, vector<256x256xbf16>,
    %c0_42 = arith.constant 0 : index
    %c0_43 = arith.constant 0 : index
    %65 = vector.load %arg13[%c0_42, %c0_43] : memref<256x128xbf16, #tpu.memory_space<vmem>>, vector<256x128xbf16>
    %c1_44 = arith.constant 1 : index
    %c0_45 = arith.constant 0 : index
    %c0_46 = arith.constant 0 : index
    %66 = vector.load %arg6[%c1_44, %c0_45, %c0_46] : memref<2x128x256xbf16, #tpu.memory_space<vmem>>, vector<1x128x256xbf16>
    %67 = vector.shape_cast %66 : vector<1x128x256xbf16> to vector<128x256xbf16>
    %cst_47 = arith.constant dense<0.000000e+00> : vector<256x256xf32>
    %68 = tpu.matmul %65, %67, %cst_47 {dimension_numbers = #tpu.dot_dimension_numbers<[1], [0], [0], [1], [0, 0, 1, 1], [], []>} : vector<256x128xbf16>, vector<128x256xbf16>, vector<256x256xf32> -> vector<256x256xf32>
    %69 = arith.truncf %68 : vector<256x256xf32> to vector<256x256xbf16>
    %c1_48 = arith.constant 1 : index
    %c0_49 = arith.constant 0 : index
    %70 = vector.load %arg7[%c1_48, %c0_49] : memref<2x256xbf16, #tpu.memory_space<vmem>>, vector<1x256xbf16>
    %71 = vector.shape_cast %70 : vector<1x256xbf16> to vector<256xbf16>
    %72 = vector.shape_cast %71 : vector<256xbf16> to vector<1x256xbf16>
    %73 = vector.broadcast %72 : vector<1x256xbf16> to vector<256x256xbf16>
    %74 = arith.addf %69, %73 : vector<256x256xbf16>
    %cst_50 = arith.constant 0.000000e+00 : bf16
    %75 = vector.broadcast %cst_50 : bf16 to vector<256x256xbf16>
    %76 = arith.maximumf %74, %75 : vector<256x256xbf16>
    %c1_51 = arith.constant 1 : index
    %c0_52 = arith.constant 0 : index
    %c0_53 = arith.constant 0 : index
    %c0_54 = arith.constant 0 : index
    %77 = vector.load %arg8[%c1_51, %c0_52, %c0_53, %c0_54] : memref<2x2x256x256xbf16, #tpu.memory_space<vmem>>, vector<1x1x256x256xbf16>
    %78 = vector.shape_cast %77 : vector<1x1x256x256xbf16> to vector<256x256xbf16>
    %cst_55 = arith.constant dense<0.000000e+00> : vector<256x256xf32>
    %79 = tpu.matmul %76, %78, %cst_55 {dimension_numbers = #tpu.dot_dimension_numbers<[1], [0], [0], [1], [0, 0, 1, 1], [], []>} : vector<256x256xbf16>, vector<256x256xbf16>, vector<256x256xf32> -> vector<256x256xf32>
    %80 = arith.truncf %79 : vector<256x256xf32> to vector<256x256xbf16>
    %c1_56 = arith.constant 1 : index
    %c0_57 = arith.constant 0 : index
    %c0_58 = arith.constant 0 : index
    %81 = vector.load %arg9[%c1_56, %c0_57, %c0_58] : memref<2x2x256xbf16, #tpu.memory_space<vmem>>, vector<1x1x256xbf16>
    %82 = vector.shape_cast %81 : vector<1x1x256xbf16> to vector<256xbf16>
    %83 = vector.shape_cast %82 : vector<256xbf16> to vector<1x256xbf16>
    %84 = vector.broadcast %83 : vector<1x256xbf16> to vector<256x256xbf16>
    %85 = arith.addf %80, %84 : vector<256x256xbf16>
    %cst_59 = arith.constant 0.000000e+00 : bf16
    %86 = vector.broadcast %cst_59 : bf16 to vector<256x256xbf16>
    %87 = arith.maximumf %85, %86 : vector<256x256xbf16>
    %c1_60 = arith.constant 1 : index
    %c1_61 = arith.constant 1 : index
    %c0_62 = arith.constant 0 : index
    %c0_63 = arith.constant 0 : index
    %88 = vector.load %arg8[%c1_60, %c1_61, %c0_62, %c0_63] : memref<2x2x256x256xbf16, #tpu.memory_space<vmem>>, vector<1x1x256x256xbf16>
    %89 = vector.shape_cast %88 : vector<1x1x256x256xbf16> to vector<256x256xbf16>
    %cst_64 = arith.constant dense<0.000000e+00> : vector<256x256xf32>
    %90 = tpu.matmul %87, %89, %cst_64 {dimension_numbers = #tpu.dot_dimension_numbers<[1], [0], [0], [1], [0, 0, 1, 1], [], []>} : vector<256x256xbf16>, vector<256x256xbf16>, vector<256x256xf32> -> vector<256x256xf32>
    %91 = arith.truncf %90 : vector<256x256xf32> to vector<256x256xbf16>
    %c1_65 = arith.constant 1 : index
    %c1_66 = arith.constant 1 : index
    %c0_67 = arith.constant 0 : index
    %92 = vector.load %arg9[%c1_65, %c1_66, %c0_67] : memref<2x2x256xbf16, #tpu.memory_space<vmem>>, vector<1x1x256xbf16>
    %93 = vector.shape_cast %92 : vector<1x1x256xbf16> to vector<256xbf16>
    %94 = vector.shape_cast %93 : vector<256xbf16> to vector<1x256xbf16>
    %95 = vector.broadcast %94 : vector<1x256xbf16> to vector<256x256xbf16>
    %96 = arith.addf %91, %95 : vector<256x256xbf16>
    %cst_68 = arith.constant 0.000000e+00 : bf16
    %97 = vector.broadcast %cst_68 : bf16 to vector<256x256xbf16>
    %98 = arith.maximumf %96, %97 : vector<256x256xbf16>
    %c0_69 = arith.constant 0 : index
    %c256 = arith.constant 256 : index
    %99 = vector.load %arg14[%c0_69, %c256] : memref<256x512xbf16, #tpu.memory_space<vmem>>, vector<256x256xbf16>
    tpu.vector_store %arg14[%c0_69, %c256], %98 {strides = array<i32>} : memref<256x512xbf16, #tpu.memory_space<vmem>>, vector<256x256xbf16>,
    %c0_70 = arith.constant 0 : index
    %c0_71 = arith.constant 0 : index
    %100 = vector.load %arg14[%c0_70, %c0_71] : memref<256x512xbf16, #tpu.memory_space<vmem>>, vector<256x512xbf16>
    %c0_72 = arith.constant 0 : index
    %c0_73 = arith.constant 0 : index
    %101 = vector.load %arg10[%c0_72, %c0_73] : memref<512x12xbf16, #tpu.memory_space<vmem>>, vector<512x12xbf16>
    %cst_74 = arith.constant dense<0.000000e+00> : vector<256x12xf32>
    %102 = tpu.matmul %100, %101, %cst_74 {dimension_numbers = #tpu.dot_dimension_numbers<[1], [0], [0], [1], [0, 0, 1, 1], [], []>} : vector<256x512xbf16>, vector<512x12xbf16>, vector<256x12xf32> -> vector<256x12xf32>
    %c0_75 = arith.constant 0 : index
    %c0_76 = arith.constant 0 : index
    %103 = vector.load %arg11[%c0_75, %c0_76] : memref<1x12xf32, #tpu.memory_space<vmem>>, vector<1x12xf32>
    %104 = vector.broadcast %103 : vector<1x12xf32> to vector<256x12xf32>
    %105 = arith.addf %102, %104 : vector<256x12xf32>
    %106 = vector.extract_strided_slice %105 {offsets = [0, 0], sizes = [256, 8], strides = [1, 1]} : vector<256x12xf32> to vector<256x8xf32>
    %107 = math.tanh %106 : vector<256x8xf32>
    %108 = vector.extract_strided_slice %105 {offsets = [0, 8], sizes = [256, 4], strides = [1, 1]} : vector<256x12xf32> to vector<256x4xf32>
    %cst_77 = arith.constant dense<0xFF800000> : vector<256xf32>
    %109 = vector.multi_reduction <maximumf>, %108, %cst_77 [1] : vector<256x4xf32> to vector<256xf32>
    %110 = vector.shape_cast %109 : vector<256xf32> to vector<256x1xf32>
    %111 = vector.broadcast %110 : vector<256x1xf32> to vector<256x4xf32>
    %112 = arith.subf %108, %111 : vector<256x4xf32>
    %113 = math.exp %112 : vector<256x4xf32>
    %cst_78 = arith.constant dense<0.000000e+00> : vector<256xf32>
    %114 = vector.multi_reduction <add>, %113, %cst_78 [1] : vector<256x4xf32> to vector<256xf32>
    %115 = vector.shape_cast %114 : vector<256xf32> to vector<256x1xf32>
    %116 = tpu.reciprocal %115 {approx = true} : vector<256x1xf32> -> vector<256x1xf32>
    %117 = vector.broadcast %116 : vector<256x1xf32> to vector<256x4xf32>
    %118 = arith.mulf %113, %117 : vector<256x4xf32>
    %119 = tpu.concatenate %107, %108, %118 in 1 : vector<256x8xf32>, vector<256x4xf32>, vector<256x4xf32> -> vector<256x16xf32>
    %c0_79 = arith.constant 0 : index
    %c0_80 = arith.constant 0 : index
    %c0_81 = arith.constant 0 : index
    %120 = vector.load %arg12[%c0_79, %c0_80, %c0_81] : memref<1x256x16xf32, #tpu.memory_space<vmem>>, vector<1x256x16xf32>
    %121 = vector.shape_cast %120 : vector<1x256x16xf32> to vector<256x16xf32>
    %122 = vector.shape_cast %119 : vector<256x16xf32> to vector<1x256x16xf32>
    tpu.vector_store %arg12[%c0_79, %c0_80, %c0_81], %122 {strides = array<i32>} : memref<1x256x16xf32, #tpu.memory_space<vmem>>, vector<1x256x16xf32>,
    return
  }
  func.func @transform_0(%arg0: i32, %arg1: i32) -> (i32, i32, i32) {
    %c0_i32 = arith.constant 0 : i32
    %c0_i32_0 = arith.constant 0 : i32
    return %arg0, %arg1, %c0_i32 : i32, i32, i32
  }
  func.func @transform_1(%arg0: i32, %arg1: i32) -> (i32, i32, i32) {
    %c0_i32 = arith.constant 0 : i32
    %c0_i32_0 = arith.constant 0 : i32
    %c0_i32_1 = arith.constant 0 : i32
    return %arg0, %c0_i32, %c0_i32_0 : i32, i32, i32
  }
  func.func @transform_2(%arg0: i32, %arg1: i32) -> (i32, i32) {
    %c0_i32 = arith.constant 0 : i32
    %c0_i32_0 = arith.constant 0 : i32
    %c0_i32_1 = arith.constant 0 : i32
    return %c0_i32, %c0_i32_0 : i32, i32
  }
  func.func @transform_3(%arg0: i32, %arg1: i32) -> (i32, i32) {
    %c0_i32 = arith.constant 0 : i32
    %c0_i32_0 = arith.constant 0 : i32
    %c0_i32_1 = arith.constant 0 : i32
    return %c0_i32, %c0_i32_0 : i32, i32
  }
  func.func @transform_4(%arg0: i32, %arg1: i32) -> (i32, i32, i32) {
    %c0_i32 = arith.constant 0 : i32
    %c0_i32_0 = arith.constant 0 : i32
    %c0_i32_1 = arith.constant 0 : i32
    %c0_i32_2 = arith.constant 0 : i32
    return %c0_i32, %c0_i32_0, %c0_i32_1 : i32, i32, i32
  }
  func.func @transform_5(%arg0: i32, %arg1: i32) -> (i32, i32) {
    %c0_i32 = arith.constant 0 : i32
    %c0_i32_0 = arith.constant 0 : i32
    %c0_i32_1 = arith.constant 0 : i32
    return %c0_i32, %c0_i32_0 : i32, i32
  }
  func.func @transform_6(%arg0: i32, %arg1: i32) -> (i32, i32, i32, i32) {
    %c0_i32 = arith.constant 0 : i32
    %c0_i32_0 = arith.constant 0 : i32
    %c0_i32_1 = arith.constant 0 : i32
    %c0_i32_2 = arith.constant 0 : i32
    %c0_i32_3 = arith.constant 0 : i32
    return %c0_i32, %c0_i32_0, %c0_i32_1, %c0_i32_2 : i32, i32, i32, i32
  }
  func.func @transform_7(%arg0: i32, %arg1: i32) -> (i32, i32, i32) {
    %c0_i32 = arith.constant 0 : i32
    %c0_i32_0 = arith.constant 0 : i32
    %c0_i32_1 = arith.constant 0 : i32
    %c0_i32_2 = arith.constant 0 : i32
    return %c0_i32, %c0_i32_0, %c0_i32_1 : i32, i32, i32
  }
  func.func @transform_8(%arg0: i32, %arg1: i32) -> (i32, i32) {
    %c0_i32 = arith.constant 0 : i32
    %c0_i32_0 = arith.constant 0 : i32
    %c0_i32_1 = arith.constant 0 : i32
    return %c0_i32, %c0_i32_0 : i32, i32
  }
  func.func @transform_9(%arg0: i32, %arg1: i32) -> (i32, i32) {
    %c0_i32 = arith.constant 0 : i32
    %c0_i32_0 = arith.constant 0 : i32
    %c0_i32_1 = arith.constant 0 : i32
    return %c0_i32, %c0_i32_0 : i32, i32
  }
  func.func @transform_10(%arg0: i32, %arg1: i32) -> (i32, i32, i32) {
    %c0_i32 = arith.constant 0 : i32
    %c0_i32_0 = arith.constant 0 : i32
    return %arg0, %arg1, %c0_i32 : i32, i32, i32
  }
}

</mosaic_0001>

<bundles_post_ra>
// kernel: inverse_atlasnet_forward.1
= control target key start
LH: loop header
LB: loop body
LE: loop exit
PB: predicated region body
PF: predicated region fallthrough
CT: control target
= control target key end

     0   :  { %s8246_s13 = smov 0   ;;  %s8248_s14 = smov 0   ;;  %s10690_s0 = inlined_call_operand.vmem [shape: f32[2,256,3], index: 0, kind: input, shape index: {}]   ;;  %s10691_s1 = inlined_call_operand.vmem [shape: f32[2,1,128], index: 1, kind: input, shape index: {}]   ;;  %s10692_s2 = inlined_call_operand.vmem [shape: f32[3,128], index: 2, kind: input, shape index: {}]   ;;  %s10693_s3 = inlined_call_operand.vmem [shape: f32[1,128], index: 3, kind: input, shape index: {}]   ;;  %s10694_s4 = inlined_call_operand.vmem [shape: bf16[2,128,256], index: 4, kind: input, shape index: {}]   ;;  %s10695_s5 = inlined_call_operand.vmem [shape: bf16[2,256], index: 5, kind: input, shape index: {}]   ;;  %s10696_s6 = inlined_call_operand.vmem [shape: bf16[2,2,256,256], index: 6, kind: input, shape index: {}]   ;;  %s10697_s7 = inlined_call_operand.vmem [shape: bf16[2,2,256], index: 7, kind: input, shape index: {}]   ;;  %s10698_s8 = inlined_call_operand.vmem [shape: bf16[512,12], index: 8, kind: input, shape index: {}]   ;;  %s10699_s9 = inlined_call_operand.vmem [shape: f32[1,12], index: 9, kind: input, shape index: {}]   ;;  %s10700_s10 = inlined_call_operand.vmem [shape: f32[2,256,16], index: 10, kind: output, shape index: {}]  }
   0x1   :  { %s8250_s15 = smov 0  }
   0x2 LB: > { %s32_s16 = sadd.s32 1, %s8179_s14  ;;  %p6690_p0 = scmp.ge.s32.totalorder %s8183_s15, 1  ;;  %s8183_s15 = sphi %s8250_s15, %s20_s15   ;;  %s8179_s14 = sphi %s8248_s14, %s10754_s14   ;;  %s8175_s13 = sphi %s8246_s13, %s10753_s13  }
   0x3   : > { %p34_p1 = scmp.ge.s32.totalorder %s32_s16, 2  ;;  %p341_p2 = scmp.lt.s32.totalorder %s8183_s15, 3 }
   0x5   : > { %s10756_s16 = smov (%p34_p1, %s32_s16), 0  ;;  %p342_p3 = pnand %p6690_p0, %p341_p2 }
   0x7   : > { %345 = sbr.rel (%p342_p3) target bundleno = 2206 (0x89e), region = 60 }
   0xc   : > { %p391_p4 = scmp.lt.s32.totalorder %s8175_s13, 1  ;;  %v8185_v0 = vmov 2   ;;  %v8186_v1 = vmov 1   ;;  %v8187_v2 = vmov 0   ;;  %v7660_v6 = vld [vmem:[%s10694_s4 + $0x74] ss:$8 sps:$4 sm:$0xff]  }
   0xd   : > { %7607 = vset.pattern.permute.xlu0 %v8185_v0  ;;  %7606 = vset.pattern.permute.xlu1 %v8186_v1  ;;  %v7662_v7 = vld [vmem:[%s10694_s4 + $0x70] ss:$8 sps:$4 sm:$0xff]   ;;  %v7663_v9 = vld [vmem:[%s10694_s4 + $0x64] ss:$8 sps:$4 sm:$0xff]   ;;  %v7665_v10 = vld [vmem:[%s10694_s4 + $0x60] ss:$8 sps:$4 sm:$0xff]  }
   0xe   : > { %s10758_s13 = smov (!%p391_p4, %s8175_s13), 1  ;;  %1563 = vmatprep.mubr.bf16.mxu0 %v8187_v2  ;;  %1531 = vmatprep.subr.bf16.mxu0 %v7660_v6  ;;  %v7666_v11 = vld [vmem:[%s10694_s4 + $0x54] ss:$8 sps:$4 sm:$0xff]   ;;  %v7668_v12 = vld [vmem:[%s10694_s4 + $0x50] ss:$8 sps:$4 sm:$0xff]   ;;  %vm5881_vm0 = vcmask 97344  }
   0xf   : > { %s7207_s17 = sshll.u32 %s10758_s13, 8  ;;  %1532 = vmatpush1.bf16.msra.mxu0 %v7662_v7  ;;  %v7669_v13 = vld [vmem:[%s10694_s4 + $0x44] ss:$8 sps:$4 sm:$0xff]   ;;  %v7671_v14 = vld [vmem:[%s10694_s4 + $0x40] ss:$8 sps:$4 sm:$0xff]   ;;  %s8462_s21 = scalar_lea.vmem %s10691_s1, %s10758_s13  ;;  %vm6202_vm1 = vcmask 31744  }
  0x10   : > { %s8275_s20 = scalar_lea.vmem %s10690_s0, %s7207_s17  ;;  %1533 = vmatprep.subr.bf16.mxu0 %v7663_v9  ;;  %v7672_v16 = vld [vmem:[%s10694_s4 + $0x34] ss:$8 sps:$4 sm:$0xff]   ;;  %v7674_v17 = vld [vmem:[%s10694_s4 + $0x30] ss:$8 sps:$4 sm:$0xff]   ;;  %v7675_v19 = vld [vmem:[%s10694_s4 + $0x24] ss:$8 sps:$4 sm:$0xff]  }
  0x11   : > { %v414_v3 = vld [vmem:[%s8275_s20] sm:$0xff]  ;;  %v416_v4 = vld [vmem:[%s8275_s20 + $0x10] sm:$0xff]  ;;  %v415_v5 = vld [vmem:[%s8275_s20 + $0x8] sm:$0xff]  ;;  %s8190_s22 = smov 4   ;;  %vm6491_vm2 = vcmask 64512   ;;  %vm6524_vm3 = vcmask 97280  }
  0x12   : > { %843 = vperm.xlu0 %7607, %v414_v3   ;;  %646 = vperm.xlu1 %7606, %v414_v3   ;;  %v418_v8 = vld [vmem:[%s8275_s20 + $0x20] sm:$0xff]  ;;  %v417_v15 = vld [vmem:[%s8275_s20 + $0x18] sm:$0xff]  ;;  %v419_v18 = vld [vmem:[%s8275_s20 + $0x28] sm:$0xff]  ;;  %vm6557_vm4 = vcmask 130048  }
  0x13   : > { %1534 = vmatpush1.bf16.msra.mxu0 %v7665_v10  ;;  %v7677_v20 = vld [vmem:[%s10694_s4 + $0x20] ss:$8 sps:$4 sm:$0xff]   ;;  %v421_v21 = vld [vmem:[%s8275_s20 + $0x38] sm:$0xff]  ;;  %v7681_v25 = vld [vmem:[%s10694_s4 + $0x4] ss:$8 sps:$4 sm:$0xff]  }
  0x14   : > { %1535 = vmatprep.subr.bf16.mxu0 %v7666_v11  ;;  %v7678_v22 = vld [vmem:[%s10694_s4 + $0x14] ss:$8 sps:$4 sm:$0xff]   ;;  %v7680_v23 = vld [vmem:[%s10694_s4 + $0x10] ss:$8 sps:$4 sm:$0xff]   ;;  %v423_v24 = vld [vmem:[%s8275_s20 + $0x48] sm:$0xff] }
  0x15   : > { %v7683_v26 = vld [vmem:[%s10694_s4] ss:$8 sps:$4 sm:$0xff]   ;;  %v8340_v27 = vld [vmem:[%s8275_s20 + $0x58] sm:$0xff]  ;;  %v420_v30 = vld [vmem:[%s8275_s20 + $0x30] sm:$0xff] }
  0x16   : > { %851 = vperm.xlu0 %7607, %v416_v4   ;;  %650 = vperm.xlu1 %7606, %v415_v5   ;;  %v8343_v28 = vld [vmem:[%s8275_s20 + $0x68] sm:$0xff]  ;;  %v8348_v29 = vld [vmem:[%s8275_s20 + $0x78] sm:$0xff]  ;;  %v422_v31 = vld [vmem:[%s8275_s20 + $0x40] sm:$0xff] }
  0x17   : > { %1536 = vmatpush1.bf16.msra.mxu0 %v7668_v12  ;;  %v424_v32 = vld [vmem:[%s8275_s20 + $0x50] sm:$0xff]  ;;  %v426_v33 = vld [vmem:[%s8275_s20 + $0x60] sm:$0xff]  ;;  %v8377_v38 = vld [vmem:[%s8275_s20 + $0x88] sm:$0xff] }
  0x18   : > { %1537 = vmatprep.subr.bf16.mxu0 %v7669_v13  ;;  %v428_v34 = vld [vmem:[%s8275_s20 + $0x70] sm:$0xff]  ;;  %v8363_v35 = vld [vmem:[%s8275_s20 + $0x80] sm:$0xff]  ;;  %v8383_v39 = vld [vmem:[%s8275_s20 + $0x98] sm:$0xff] }
  0x19   : > { %v8366_v36 = vld [vmem:[%s8275_s20 + $0x90] sm:$0xff]  ;;  %v8373_v37 = vld [vmem:[%s8275_s20 + $0xa0] sm:$0xff]  ;;  %v8387_v40 = vld [vmem:[%s8275_s20 + $0xa8] sm:$0xff] }
  0x1a   : > { %859 = vperm.xlu0 %7607, %v418_v8   ;;  %7608 = vset.pattern.permute.xlu1 %v8185_v0  ;;  %v8392_v41 = vld [vmem:[%s8275_s20 + $0xb8] sm:$0xff]  ;;  %v8397_v42 = vld [vmem:[%s8275_s20 + $0xc8] sm:$0xff]  ;;  %v8408_v44 = vld [vmem:[%s8275_s20 + $0xb0] sm:$0xff] }
  0x1b   : > { %847 = vperm.xlu1 %7608, %v415_v5   ;;  %1538 = vmatpush1.bf16.msra.mxu0 %v7671_v14  ;;  %v8402_v43 = vld [vmem:[%s8275_s20 + $0xd8] sm:$0xff]  ;;  %v8414_v45 = vld [vmem:[%s8275_s20 + $0xc0] sm:$0xff]  ;;  %v8419_v46 = vld [vmem:[%s8275_s20 + $0xd0] sm:$0xff] }
  0x1c   : > { %1539 = vmatprep.subr.bf16.mxu0 %v7672_v16  ;;  %v8430_v53 = vld [vmem:[%s8275_s20 + $0xe0] sm:$0xff]  ;;  %v8468_v7 = vld [vmem:[%s8275_s20 + $0xe8] sm:$0xff] }
  0x1d   : > { %v8436_v54 = vld [vmem:[%s10692_s2 + $0x1] ss:$0 sm:$0xff]  ;;  %v8441_v55 = vld [vmem:[%s10692_s2] ss:$0 sm:$0xff]  ;;  %v8446_v56 = vld [vmem:[%s10692_s2 + $0x2] ss:$0 sm:$0xff] }
  0x1e   : > { %7614 = vset.pattern.permute.xlu0 %v8187_v2  ;;  %v8456_v63 = vld [vmem:[%s10693_s3] ss:$0 sm:$0xff] }
  0x1f   : > { %450 = vperm.xlu0 %7614, %v414_v3   ;;  %7609 = vset.pattern.permute.xlu1 %v8187_v2  ;;  %v8477_v14 = vld [vmem:[%s8462_s21] ss:$0 sm:$0xff] }
  0x20   : > { %460 = vperm.xlu1 %7609, %v416_v4   ;;  %1540 = vmatpush1.bf16.msra.mxu0 %v7674_v17 }
  0x21   : > { %1541 = vmatprep.subr.bf16.mxu0 %v7675_v19 }
  0x23   : > { %455 = vperm.xlu0 %7614, %v415_v5  }
  0x24   : > { %7610 = vset.pattern.permute.xlu1 %v8186_v1  ;;  %1542 = vmatpush1.bf16.msra.mxu0 %v7677_v20 }
  0x25   : > { %654 = vperm.xlu1 %7610, %v416_v4   ;;  %1543 = vmatprep.subr.bf16.mxu0 %v7678_v22 }
  0x27   : > { %465 = vperm.xlu0 %7614, %v417_v15  }
  0x28   : > { %1544 = vmatpush1.bf16.msra.mxu0 %v7680_v23 }
  0x29   : > { %658 = vperm.xlu1 %7610, %v417_v15   ;;  %1545 = vmatprep.subr.bf16.mxu0 %v7681_v25 }
  0x2b   : > { %475 = vperm.xlu0 %7614, %v419_v18  }
  0x2c   : > { %1546 = vmatpush1.bf16.msra.mxu0 %v7683_v26 }
  0x2d   : > { %7611 = vset.pattern.permute.xlu1 %v8185_v0 }
  0x2e   : > { %855 = vperm.xlu1 %7611, %v417_v15  }
  0x2f   : > { %485 = vperm.xlu0 %7614, %v421_v21  }
  0x32   : > { %7612 = vset.pattern.permute.xlu1 %v8187_v2 }
  0x33   : > { %470 = vperm.xlu1 %7612, %v418_v8   ;;  %495 = vperm.xlu0 %7614, %v423_v24  }
  0x37   : > { %7613 = vset.pattern.permute.xlu1 %v8186_v1  ;;  %505 = vperm.xlu0 %7614, %v8340_v27  }
  0x38   : > { %662 = vperm.xlu1 %7613, %v418_v8  }
  0x3b   : > { %515 = vperm.xlu0 %7614, %v8343_v28  }
  0x3c   : > { %666 = vperm.xlu1 %7613, %v419_v18  }
  0x3f   : > { %525 = vperm.xlu0 %7614, %v8348_v29  }
  0x40   : > { %7615 = vset.pattern.permute.xlu1 %v8185_v0 }
  0x41   : > { %863 = vperm.xlu1 %7615, %v419_v18  }
  0x43   : > { %7629 = vset.pattern.permute.xlu0 %v8185_v0 }
  0x44   : > { %867 = vperm.xlu0 %7629, %v420_v30  }
  0x45   : > { %7616 = vset.pattern.permute.xlu1 %v8187_v2 }
  0x46   : > { %480 = vperm.xlu1 %7616, %v420_v30  }
  0x48   : > { %875 = vperm.xlu0 %7629, %v422_v31  }
  0x4a   : > { %7617 = vset.pattern.permute.xlu1 %v8186_v1 }
  0x4b   : > { %670 = vperm.xlu1 %7617, %v420_v30  }
  0x4c   : > { %883 = vperm.xlu0 %7629, %v424_v32  }
  0x4f   : > { %674 = vperm.xlu1 %7617, %v421_v21  }
  0x50   : > { %891 = vperm.xlu0 %7629, %v426_v33  }
  0x53   : > { %7618 = vset.pattern.permute.xlu1 %v8185_v0 }
  0x54   : > { %871 = vperm.xlu1 %7618, %v421_v21   ;;  %899 = vperm.xlu0 %7629, %v428_v34  }
  0x58   : > { %7619 = vset.pattern.permute.xlu1 %v8187_v2  ;;  %907 = vperm.xlu0 %7629, %v8363_v35  }
  0x59   : > { %490 = vperm.xlu1 %7619, %v422_v31  }
  0x5c   : > { %915 = vperm.xlu0 %7629, %v8366_v36  }
  0x5d   : > { %7620 = vset.pattern.permute.xlu1 %v8186_v1 }
  0x5e   : > { %678 = vperm.xlu1 %7620, %v422_v31  }
  0x60   : > { %923 = vperm.xlu0 %7629, %v8373_v37  }
  0x62   : > { %682 = vperm.xlu1 %7620, %v423_v24  }
  0x64   : > { %7640 = vset.pattern.permute.xlu0 %v8187_v2 }
  0x65   : > { %535 = vperm.xlu0 %7640, %v8377_v38  }
  0x66   : > { %7621 = vset.pattern.permute.xlu1 %v8185_v0 }
  0x67   : > { %879 = vperm.xlu1 %7621, %v423_v24  }
  0x69   : > { %545 = vperm.xlu0 %7640, %v8383_v39  }
  0x6b   : > { %7622 = vset.pattern.permute.xlu1 %v8187_v2 }
  0x6c   : > { %500 = vperm.xlu1 %7622, %v424_v32  }
  0x6d   : > { %555 = vperm.xlu0 %7640, %v8387_v40  }
  0x70   : > { %7623 = vset.pattern.permute.xlu1 %v8186_v1 }
  0x71   : > { %686 = vperm.xlu1 %7623, %v424_v32   ;;  %565 = vperm.xlu0 %7640, %v8392_v41  }
  0x75   : > { %690 = vperm.xlu1 %7623, %v8340_v27   ;;  %575 = vperm.xlu0 %7640, %v8397_v42  }
  0x79   : > { %7624 = vset.pattern.permute.xlu1 %v8185_v0  ;;  %585 = vperm.xlu0 %7640, %v8402_v43  }
  0x7a   : > { %887 = vperm.xlu1 %7624, %v8340_v27  }
  0x7d   : > { %7649 = vset.pattern.permute.xlu0 %v8185_v0 }
  0x7e   : > { %7625 = vset.pattern.permute.xlu1 %v8187_v2  ;;  %931 = vperm.xlu0 %7649, %v8408_v44  }
  0x7f   : > { %510 = vperm.xlu1 %7625, %v426_v33  }
  0x82   : > { %939 = vperm.xlu0 %7649, %v8414_v45  }
  0x83   : > { %7626 = vset.pattern.permute.xlu1 %v8186_v1 }
  0x84   : > { %694 = vperm.xlu1 %7626, %v426_v33  }
  0x86   : > { %947 = vperm.xlu0 %7649, %v8419_v46  }
  0x88   : > { %698 = vperm.xlu1 %7626, %v8343_v28  }
  0x8a   : > { %955 = vperm.xlu0 %7649, %v8430_v53  }
  0x8c   : > { %7627 = vset.pattern.permute.xlu1 %v8185_v0 }
  0x8d   : > { %895 = vperm.xlu1 %7627, %v8343_v28   ;;  %v647_v47 = vpop.permute.xlu1 %646  ;;  %v844_v48 = vpop.permute.xlu0 %843 }
  0x8e   : > { %v777_v58 = vmul.f32 %v8436_v54, %v647_v47  ;;  %v974_v59 = vmul.f32 %v8446_v56, %v844_v48  ;;  %7654 = vset.pattern.permute.xlu0 %v8187_v2  ;;  %v8494_v47 = vld [vmem:[%s8275_s20 + $0xf8] sm:$0xff] }
  0x8f   : > { %595 = vperm.xlu0 %7654, %v8468_v7  }
  0x91   : > { %7628 = vset.pattern.permute.xlu1 %v8187_v2  ;;  %v651_v49 = vpop.permute.xlu1 %650  ;;  %v852_v50 = vpop.permute.xlu0 %851 }
  0x92   : > { %520 = vperm.xlu1 %7628, %v428_v34   ;;  %v778_v4 = vmul.f32 %v8436_v54, %v651_v49  ;;  %v976_v15 = vmul.f32 %v8446_v56, %v852_v50 }
  0x93   : > { %605 = vperm.xlu0 %7654, %v8494_v47  }
  0x95   : > { %v8426_v51 = vpop.permute.xlu0 %859 }
  0x96   : > { %7630 = vset.pattern.permute.xlu1 %v8186_v1  ;;  %v848_v52 = vpop.permute.xlu1 %847 }
  0x97   : > { %702 = vperm.xlu1 %7630, %v428_v34   ;;  %v975_v8 = vmul.f32 %v8446_v56, %v848_v52  ;;  %7658 = vset.pattern.permute.xlu0 %v8185_v0 }
  0x9a   : > { %v451_v57 = vpop.permute.xlu0 %450 }
  0x9b   : > { %v612_v60 = vmul.f32 %v8441_v55, %v451_v57  ;;  %706 = vperm.xlu1 %7630, %v8348_v29   ;;  %v461_v61 = vpop.permute.xlu1 %460 }
  0x9c   : > { %v614_v11 = vmul.f32 %v8441_v55, %v461_v61 }
  0x9d   : > { %v809_v62 = vadd.f32 %v777_v58, %v612_v60  ;;  %v8504_v58 = vld [vmem:[%s8275_s20 + $0xf0] sm:$0xff]  ;;  %s8189_s20 = smov 120  }
  0x9e   : > { %v456_v3 = vpop.permute.xlu0 %455  ;;  %963 = vperm.xlu0 %7658, %v8504_v58  }
  0x9f   : > { %v1006_v5 = vadd.f32 %v974_v59, %v809_v62  ;;  %v613_v6 = vmul.f32 %v8441_v55, %v456_v3  ;;  %7631 = vset.pattern.permute.xlu1 %v8185_v0 }
  0xa0   : > { %903 = vperm.xlu1 %7631, %v8348_v29   ;;  %v655_v9 = vpop.permute.xlu1 %654 }
  0xa1   : > { %v1045_v10 = vadd.f32 %v8456_v63, %v1006_v5  ;;  %v810_v12 = vadd.f32 %v778_v4, %v613_v6  ;;  %v779_v13 = vmul.f32 %v8436_v54, %v655_v9 }
  0xa2   : > { %v466_v16 = vpop.permute.xlu0 %465 }
  0xa3   : > { %v1007_v17 = vadd.f32 %v975_v8, %v810_v12  ;;  %v811_v18 = vadd.f32 %v779_v13, %v614_v11  ;;  %v1083_v20 = vadd.f32 %v8477_v14, %v1045_v10  ;;  %v615_v23 = vmul.f32 %v8441_v55, %v466_v16 }
  0xa4   : > { %7632 = vset.pattern.permute.xlu1 %v8187_v2  ;;  %v659_v19 = vpop.permute.xlu1 %658  ;;  %v978_v8 = vmul.f32 %v8446_v56, %v8426_v51 }
  0xa5   : > { %v1046_v21 = vadd.f32 %v8456_v63, %v1007_v17  ;;  %530 = vperm.xlu1 %7632, %v8363_v35   ;;  %v1008_v22 = vadd.f32 %v976_v15, %v811_v18  ;;  %v780_v24 = vmul.f32 %v8436_v54, %v659_v19  ;;  %v1115_v27 = vmax.f32 %v1083_v20, 0.0 }
  0xa6   : > { %v476_v25 = vpop.permute.xlu0 %475 }
  0xa7   : > { %v1084_v26 = vadd.f32 %v8477_v14, %v1046_v21  ;;  %v1047_v30 = vadd.f32 %v8456_v63, %v1008_v22  ;;  %v812_v31 = vadd.f32 %v780_v24, %v615_v23  ;;  %v7693_v24 = vld [vmem:[%s10696_s6 + $0x74] ss:$8 sps:$4 sm:$0xff]  }
  0xa8   : > { %2050 = vmatprep.subr.bf16.mxu1 %v7693_v24 }
  0xa9   : > { %v1116_v28 = vmax.f32 %v1084_v26, 0.0  ;;  %7633 = vset.pattern.permute.xlu1 %v8186_v1  ;;  %v856_v29 = vpop.permute.xlu1 %855  ;;  %v1085_v49 = vadd.f32 %v8477_v14, %v1047_v30  ;;  %v7696_v30 = vld [vmem:[%s10696_s6 + $0x64] ss:$8 sps:$4 sm:$0xff]  }
  0xaa   : > { %v977_v32 = vmul.f32 %v8446_v56, %v856_v29  ;;  %710 = vperm.xlu1 %7633, %v8363_v35   ;;  %v8491_v33 = vpop.permute.xlu0 %485 }
  0xab   : > { %v7244_v34 = vpack.c.bf16 %v1116_v28, %v1115_v27  ;;  %v1117_v59 = vmax.f32 %v1085_v49, 0.0 }
  0xac   : > { %v1009_v48 = vadd.f32 %v977_v32, %v812_v31 }
  0xad   : > { %7245 = vst [vmem:[#allocation2] sm:$0xff] %v7244_v34  }
  0xae   : > { %v1048_v50 = vadd.f32 %v8456_v63, %v1009_v48  ;;  %714 = vperm.xlu1 %7633, %v8377_v38   ;;  %v471_v52 = vpop.permute.xlu1 %470  ;;  %v8500_v57 = vpop.permute.xlu0 %495  ;;  %v7698_v48 = vld [vmem:[%s10696_s6 + $0x60] ss:$8 sps:$4 sm:$0xff]  }
  0xaf   : > { %v616_v4 = vmul.f32 %v8441_v55, %v471_v52  ;;  %v7699_v52 = vld [vmem:[%s10696_s6 + $0x54] ss:$8 sps:$4 sm:$0xff]  }
  0xb0   : > { %v1086_v35 = vadd.f32 %v8477_v14, %v1048_v50 }
  0xb2   : > { %v1118_v60 = vmax.f32 %v1086_v35, 0.0  ;;  %7634 = vset.pattern.permute.xlu1 %v8185_v0  ;;  %v8510_v62 = vpop.permute.xlu0 %505  ;;  %v7701_v35 = vld [vmem:[%s10696_s6 + $0x50] ss:$8 sps:$4 sm:$0xff]  }
  0xb3   : > { %911 = vperm.xlu1 %7634, %v8377_v38   ;;  %v663_v61 = vpop.permute.xlu1 %662  ;;  %v617_v38 = vmul.f32 %v8441_v55, %v476_v25  ;;  %v7695_v25 = vld [vmem:[%s10696_s6 + $0x70] ss:$8 sps:$4 sm:$0xff]  }
  0xb4   : > { %v7249_v3 = vpack.c.bf16 %v1118_v60, %v1117_v59  ;;  %v781_v5 = vmul.f32 %v8436_v54, %v663_v61  ;;  %v7684_v6 = vld [vmem:[#allocation2] sm:$0xff]   ;;  %2051 = vmatpush1.bf16.msra.mxu1 %v7695_v25  ;;  %v619_v59 = vmul.f32 %v8441_v55, %v8491_v33  ;;  %v7712_v25 = vld [vmem:[%s10696_s6 + $0x14] ss:$8 sps:$4 sm:$0xff]  }
  0xb5   : > { %1564 = vmatmul.mubr.bf16.vlgmr.msra.gmra.mxu0 %v7684_v6  ;;  %2052 = vmatprep.subr.bf16.mxu1 %v7696_v30  ;;  %v621_v30 = vmul.f32 %v8441_v55, %v8500_v57 }
  0xb6   : > { %7321 = vst [vmem:[#allocation2 + $0x8] sm:$0xff] %v7249_v3   ;;  %v813_v9 = vadd.f32 %v781_v5, %v616_v4  ;;  %1573 = vmatprep.mubr.bf16.mxu0 %v8187_v2  ;;  %v8521_v13 = vpop.permute.xlu0 %515  ;;  %v7702_v3 = vld [vmem:[%s10696_s6 + $0x44] ss:$8 sps:$4 sm:$0xff]   ;;  %v7704_v5 = vld [vmem:[%s10696_s6 + $0x40] ss:$8 sps:$4 sm:$0xff]  }
  0xb7   : > { %7635 = vset.pattern.permute.xlu1 %v8187_v2  ;;  %v667_v10 = vpop.permute.xlu1 %666 }
  0xb8   : > { %540 = vperm.xlu1 %7635, %v8366_v36   ;;  %v1010_v11 = vadd.f32 %v978_v8, %v813_v9  ;;  %v782_v12 = vmul.f32 %v8436_v54, %v667_v10  ;;  %2053 = vmatpush1.bf16.msra.mxu1 %v7698_v48 }
  0xb9   : > { %2054 = vmatprep.subr.bf16.mxu1 %v7699_v52 }
  0xba   : > { %v1049_v15 = vadd.f32 %v8456_v63, %v1010_v11  ;;  %v814_v16 = vadd.f32 %v782_v12, %v617_v38  ;;  %v8527_v20 = vpop.permute.xlu0 %525  ;;  %v7705_v38 = vld [vmem:[%s10696_s6 + $0x34] ss:$8 sps:$4 sm:$0xff]   ;;  %v7707_v11 = vld [vmem:[%s10696_s6 + $0x30] ss:$8 sps:$4 sm:$0xff]  }
  0xbc   : > { %7636 = vset.pattern.permute.xlu1 %v8186_v1  ;;  %v864_v51 = vpop.permute.xlu1 %863  ;;  %v1087_v21 = vadd.f32 %v8477_v14, %v1049_v15  ;;  %2055 = vmatpush1.bf16.msra.mxu1 %v7701_v35  ;;  %v7720_v35 = vld [vmem:[%s10696_s6 + $0xf0] ss:$8 sps:$4 sm:$0xff]  }
  0xbd   : > { %v979_v17 = vmul.f32 %v8446_v56, %v864_v51  ;;  %718 = vperm.xlu1 %7636, %v8366_v36   ;;  %v7685_v18 = vld [vmem:[#allocation2 + $0x8] sm:$0xff]   ;;  %2056 = vmatprep.subr.bf16.mxu1 %v7702_v3 }
  0xbe   : > { %1574 = vmatmul.mubr.bf16.gmra.mxu0 %v7685_v18  ;;  %v1119_v26 = vmax.f32 %v1087_v21, 0.0 }
  0xbf   : > { %v1011_v19 = vadd.f32 %v979_v17, %v814_v16  ;;  %1583 = vmatprep.mubr.bf16.mxu0 %v8187_v2  ;;  %v868_v28 = vpop.permute.xlu0 %867  ;;  %v7709_v16 = vld [vmem:[%s10696_s6 + $0x24] ss:$8 sps:$4 sm:$0xff]   ;;  %v7711_v17 = vld [vmem:[%s10696_s6 + $0x20] ss:$8 sps:$4 sm:$0xff]  }
  0xc0   : > { %v980_v49 = vmul.f32 %v8446_v56, %v868_v28  ;;  %2057 = vmatpush1.bf16.msra.mxu1 %v7704_v5 }
  0xc1   : > { %v1050_v22 = vadd.f32 %v8456_v63, %v1011_v19  ;;  %722 = vperm.xlu1 %7636, %v8383_v39   ;;  %v481_v23 = vpop.permute.xlu1 %480  ;;  %2058 = vmatprep.subr.bf16.mxu1 %v7705_v38 }
  0xc2   : > { %v618_v32 = vmul.f32 %v8441_v55, %v481_v23 }
  0xc3   : > { %v1088_v36 = vadd.f32 %v8477_v14, %v1050_v22  ;;  %v876_v21 = vpop.permute.xlu0 %875 }
  0xc4   : > { %2059 = vmatpush1.bf16.msra.mxu1 %v7707_v11 }
  0xc5   : > { %v1120_v27 = vmax.f32 %v1088_v36, 0.0  ;;  %7637 = vset.pattern.permute.xlu1 %v8185_v0  ;;  %2060 = vmatprep.subr.bf16.mxu1 %v7709_v16 }
  0xc6   : > { %919 = vperm.xlu1 %7637, %v8383_v39   ;;  %v671_v29 = vpop.permute.xlu1 %670 }
  0xc7   : > { %v7254_v31 = vpack.c.bf16 %v1120_v27, %v1119_v26  ;;  %v783_v34 = vmul.f32 %v8436_v54, %v671_v29  ;;  %v982_v26 = vmul.f32 %v8446_v56, %v876_v21  ;;  %v7714_v27 = vld [vmem:[%s10696_s6 + $0x10] ss:$8 sps:$4 sm:$0xff]   ;;  %v7715_v29 = vld [vmem:[%s10696_s6 + $0x4] ss:$8 sps:$4 sm:$0xff]  }
  0xc8   : > { %2061 = vmatpush1.bf16.msra.mxu1 %v7711_v17 }
  0xc9   : > { %7322 = vst [vmem:[#allocation2 + $0x10] sm:$0xff] %v7254_v31   ;;  %v815_v50 = vadd.f32 %v783_v34, %v618_v32  ;;  %2062 = vmatprep.subr.bf16.mxu1 %v7712_v25  ;;  %v7717_v34 = vld [vmem:[%s10696_s6] ss:$8 sps:$4 sm:$0xff]  }
  0xca   : > { %7638 = vset.pattern.permute.xlu1 %v8187_v2  ;;  %v675_v39 = vpop.permute.xlu1 %674 }
  0xcb   : > { %550 = vperm.xlu1 %7638, %v8373_v37   ;;  %v1012_v60 = vadd.f32 %v980_v49, %v815_v50  ;;  %v784_v61 = vmul.f32 %v8436_v54, %v675_v39  ;;  %v7718_v49 = vld [vmem:[%s10696_s6 + $0xf4] ss:$8 sps:$4 sm:$0xff]  }
  0xcc   : > { %2063 = vmatpush1.bf16.msra.mxu1 %v7714_v27  ;;  %v7734_v27 = vld [vmem:[%s10696_s6 + $0xa4] ss:$8 sps:$4 sm:$0xff]  }
  0xcd   : > { %v1051_v6 = vadd.f32 %v8456_v63, %v1012_v60  ;;  %v816_v8 = vadd.f32 %v784_v61, %v619_v59  ;;  %2064 = vmatprep.subr.bf16.mxu1 %v7715_v29  ;;  %v7721_v60 = vld [vmem:[%s10696_s6 + $0xe4] ss:$8 sps:$4 sm:$0xff]  }
  0xcf   : > { %7639 = vset.pattern.permute.xlu1 %v8186_v1  ;;  %v872_v4 = vpop.permute.xlu1 %871  ;;  %v1089_v12 = vadd.f32 %v8477_v14, %v1051_v6  ;;  %v7725_v6 = vld [vmem:[%s10696_s6 + $0xd4] ss:$8 sps:$4 sm:$0xff]  }
  0xd0   : > { %v981_v33 = vmul.f32 %v8446_v56, %v872_v4  ;;  %726 = vperm.xlu1 %7639, %v8373_v37   ;;  %v7686_v9 = vld [vmem:[#allocation2 + $0x10] sm:$0xff]   ;;  %2065 = vmatpush1.bf16.msra.mxu1 %v7717_v34  ;;  %v7723_v4 = vld [vmem:[%s10696_s6 + $0xe0] ss:$8 sps:$4 sm:$0xff]  }
  0xd1   : > { %1584 = vmatmul.mubr.bf16.gmra.mxu0 %v7686_v9  ;;  %v1121_v18 = vmax.f32 %v1089_v12, 0.0  ;;  %2066 = vmatprep.subr.bf16.mxu1 %v7718_v49  ;;  %v884_v9 = vpop.permute.xlu0 %883 }
  0xd2   : > { %v1013_v10 = vadd.f32 %v981_v33, %v816_v8  ;;  %1593 = vmatprep.mubr.bf16.mxu0 %v8187_v2 }
  0xd4   : > { %v1052_v51 = vadd.f32 %v8456_v63, %v1013_v10  ;;  %730 = vperm.xlu1 %7639, %v8387_v40   ;;  %v491_v37 = vpop.permute.xlu1 %490  ;;  %2067 = vmatpush2.bf16.msra.mxu1 %v7720_v35  ;;  %v7727_v10 = vld [vmem:[%s10696_s6 + $0xd0] ss:$8 sps:$4 sm:$0xff]  }
  0xd5   : > { %v620_v24 = vmul.f32 %v8441_v55, %v491_v37  ;;  %2068 = vmatprep.subr.bf16.mxu1 %v7721_v60  ;;  %v984_v37 = vmul.f32 %v8446_v56, %v884_v9 }
  0xd6   : > { %v1090_v15 = vadd.f32 %v8477_v14, %v1052_v51 }
  0xd8   : > { %v1122_v19 = vmax.f32 %v1090_v15, 0.0  ;;  %7641 = vset.pattern.permute.xlu1 %v8185_v0  ;;  %2069 = vmatpush2.bf16.msra.mxu1 %v7723_v4  ;;  %v7728_v15 = vld [vmem:[%s10696_s6 + $0xc4] ss:$8 sps:$4 sm:$0xff]  }
  0xd9   : > { %927 = vperm.xlu1 %7641, %v8387_v40   ;;  %v679_v22 = vpop.permute.xlu1 %678  ;;  %2070 = vmatprep.subr.bf16.mxu1 %v7725_v6 }
  0xda   : > { %v7259_v23 = vpack.c.bf16 %v1122_v19, %v1121_v18  ;;  %v785_v36 = vmul.f32 %v8436_v54, %v679_v22  ;;  %v623_v18 = vmul.f32 %v8441_v55, %v8510_v62  ;;  %v7731_v22 = vld [vmem:[%s10696_s6 + $0xb4] ss:$8 sps:$4 sm:$0xff]  }
  0xdc   : > { %7323 = vst [vmem:[#allocation2 + $0x18] sm:$0xff] %v7259_v23   ;;  %v817_v28 = vadd.f32 %v785_v36, %v620_v24  ;;  %2071 = vmatpush2.bf16.msra.mxu1 %v7727_v10  ;;  %v7733_v23 = vld [vmem:[%s10696_s6 + $0xb0] ss:$8 sps:$4 sm:$0xff]  }
  0xdd   : > { %7642 = vset.pattern.permute.xlu1 %v8187_v2  ;;  %v683_v40 = vpop.permute.xlu1 %682  ;;  %2072 = vmatprep.subr.bf16.mxu1 %v7728_v15 }
  0xde   : > { %560 = vperm.xlu1 %7642, %v8408_v44   ;;  %v1014_v31 = vadd.f32 %v982_v26, %v817_v28  ;;  %v786_v32 = vmul.f32 %v8436_v54, %v683_v40  ;;  %v7736_v28 = vld [vmem:[%s10696_s6 + $0xa0] ss:$8 sps:$4 sm:$0xff]  }
  0xe0   : > { %v1053_v50 = vadd.f32 %v8456_v63, %v1014_v31  ;;  %v818_v39 = vadd.f32 %v786_v32, %v621_v30  ;;  %v7737_v31 = vld [vmem:[%s10696_s6 + $0x94] ss:$8 sps:$4 sm:$0xff]   ;;  %v7740_v32 = vld [vmem:[%s10696_s6 + $0x90] ss:$8 sps:$4 sm:$0xff]  }
  0xe2   : > { %7643 = vset.pattern.permute.xlu1 %v8186_v1  ;;  %v880_v48 = vpop.permute.xlu1 %879  ;;  %v1091_v61 = vadd.f32 %v8477_v14, %v1053_v50  ;;  %v892_v50 = vpop.permute.xlu0 %891 }
  0xe3   : > { %v983_v57 = vmul.f32 %v8446_v56, %v880_v48  ;;  %734 = vperm.xlu1 %7643, %v8408_v44   ;;  %v7687_v52 = vld [vmem:[#allocation2 + $0x18] sm:$0xff]  }
  0xe4   : > { %1594 = vmatmul.mubr.bf16.gmra.mxu0 %v7687_v52  ;;  %v1123_v8 = vmax.f32 %v1091_v61, 0.0  ;;  %v7743_v52 = vld [vmem:[%s10696_s6 + $0x80] ss:$8 sps:$4 sm:$0xff]   ;;  %v986_v61 = vmul.f32 %v8446_v56, %v892_v50 }
  0xe5   : > { %v1015_v59 = vadd.f32 %v983_v57, %v818_v39  ;;  %1603 = vmatprep.mubr.bf16.mxu0 %v8187_v2  ;;  %v7741_v39 = vld [vmem:[%s10696_s6 + $0x84] ss:$8 sps:$4 sm:$0xff]  }
  0xe7   : > { %v1054_v3 = vadd.f32 %v8456_v63, %v1015_v59  ;;  %738 = vperm.xlu1 %7643, %v8392_v41   ;;  %v501_v44 = vpop.permute.xlu1 %500 }
  0xe8   : > { %v622_v12 = vmul.f32 %v8441_v55, %v501_v44 }
  0xe9   : > { %v1092_v5 = vadd.f32 %v8477_v14, %v1054_v3 }
  0xeb   : > { %v1124_v33 = vmax.f32 %v1092_v5, 0.0  ;;  %7644 = vset.pattern.permute.xlu1 %v8185_v0 }
  0xec   : > { %935 = vperm.xlu1 %7644, %v8392_v41   ;;  %v687_v38 = vpop.permute.xlu1 %686  ;;  %v7730_v41 = vld [vmem:[%s10696_s6 + $0xc0] ss:$8 sps:$4 sm:$0xff]  }
  0xed   : > { %v7264_v11 = vpack.c.bf16 %v1124_v33, %v1123_v8  ;;  %v787_v51 = vmul.f32 %v8436_v54, %v687_v38  ;;  %2073 = vmatpush2.bf16.msra.mxu1 %v7730_v41 }
  0xee   : > { %2074 = vmatprep.subr.bf16.mxu1 %v7731_v22 }
  0xef   : > { %7324 = vst [vmem:[#allocation2 + $0x20] sm:$0xff] %v7264_v11   ;;  %v819_v16 = vadd.f32 %v787_v51, %v622_v12 }
  0xf0   : > { %7645 = vset.pattern.permute.xlu1 %v8187_v2  ;;  %v691_v17 = vpop.permute.xlu1 %690 }
  0xf1   : > { %570 = vperm.xlu1 %7645, %v8414_v45   ;;  %v1016_v19 = vadd.f32 %v984_v37, %v819_v16  ;;  %v788_v21 = vmul.f32 %v8436_v54, %v691_v17  ;;  %2075 = vmatpush2.bf16.msra.mxu1 %v7733_v23  ;;  %v900_v16 = vpop.permute.xlu0 %899 }
  0xf2   : > { %2076 = vmatprep.subr.bf16.mxu1 %v7734_v27 }
  0xf3   : > { %v1055_v36 = vadd.f32 %v8456_v63, %v1016_v19  ;;  %v820_v25 = vadd.f32 %v788_v21, %v623_v18  ;;  %v988_v19 = vmul.f32 %v8446_v56, %v900_v16 }
  0xf5   : > { %7646 = vset.pattern.permute.xlu1 %v8186_v1  ;;  %v888_v24 = vpop.permute.xlu1 %887  ;;  %v1093_v29 = vadd.f32 %v8477_v14, %v1055_v36  ;;  %2077 = vmatpush2.bf16.msra.mxu1 %v7736_v28  ;;  %v908_v23 = vpop.permute.xlu0 %907 }
  0xf6   : > { %v985_v62 = vmul.f32 %v8446_v56, %v888_v24  ;;  %742 = vperm.xlu1 %7646, %v8414_v45   ;;  %v7688_v26 = vld [vmem:[#allocation2 + $0x20] sm:$0xff]   ;;  %2078 = vmatprep.subr.bf16.mxu1 %v7737_v31  ;;  %v627_v24 = vmul.f32 %v8441_v55, %v8527_v20 }
  0xf7   : > { %1604 = vmatmul.mubr.bf16.gmra.mxu0 %v7688_v26  ;;  %v1125_v48 = vmax.f32 %v1093_v29, 0.0 }
  0xf8   : > { %v1017_v40 = vadd.f32 %v985_v62, %v820_v25  ;;  %1613 = vmatprep.mubr.bf16.mxu0 %v8187_v2 }
  0xf9   : > { %2079 = vmatpush2.bf16.msra.mxu1 %v7740_v32 }
  0xfa   : > { %v1056_v30 = vadd.f32 %v8456_v63, %v1017_v40  ;;  %746 = vperm.xlu1 %7646, %v8397_v42   ;;  %v511_v45 = vpop.permute.xlu1 %510  ;;  %2080 = vmatprep.subr.bf16.mxu1 %v7741_v39  ;;  %v916_v40 = vpop.permute.xlu0 %915 }
  0xfb   : > { %v624_v59 = vmul.f32 %v8441_v55, %v511_v45 }
  0xfc   : > { %v1094_v34 = vadd.f32 %v8477_v14, %v1056_v30 }
  0xfd   : > { %2081 = vmatpush2.bf16.msra.mxu1 %v7743_v52 }
  0xfe   : > { %v1126_v49 = vmax.f32 %v1094_v34, 0.0  ;;  %7647 = vset.pattern.permute.xlu1 %v8185_v0  ;;  %v8725_v32 = vpop.permute.xlu0 %923 }
  0xff   : > { %943 = vperm.xlu1 %7647, %v8397_v42   ;;  %v695_v57 = vpop.permute.xlu1 %694  ;;  %v625_v42 = vmul.f32 %v8441_v55, %v8521_v13 }
 0x100   : > { %v7269_v35 = vpack.c.bf16 %v1126_v49, %v1125_v48  ;;  %v789_v60 = vmul.f32 %v8436_v54, %v695_v57  ;;  %v990_v57 = vmul.f32 %v8446_v56, %v908_v23 }
 0x102   : > { %7325 = vst [vmem:[#allocation2 + $0x28] sm:$0xff] %v7269_v35   ;;  %v821_v3 = vadd.f32 %v789_v60, %v624_v59  ;;  %v536_v35 = vpop.permute.xlu0 %535 }
 0x103   : > { %7648 = vset.pattern.permute.xlu1 %v8187_v2  ;;  %v699_v44 = vpop.permute.xlu1 %698 }
 0x104   : > { %580 = vperm.xlu1 %7648, %v8419_v46   ;;  %v1018_v4 = vadd.f32 %v986_v61, %v821_v3  ;;  %v790_v5 = vmul.f32 %v8436_v54, %v699_v44  ;;  %v629_v61 = vmul.f32 %v8441_v55, %v536_v35 }
 0x106   : > { %v1057_v8 = vadd.f32 %v8456_v63, %v1018_v4  ;;  %v822_v33 = vadd.f32 %v790_v5, %v625_v42 }
 0x108   : > { %7650 = vset.pattern.permute.xlu1 %v8186_v1  ;;  %v896_v6 = vpop.permute.xlu1 %895  ;;  %v1095_v13 = vadd.f32 %v8477_v14, %v1057_v8 }
 0x109   : > { %v987_v9 = vmul.f32 %v8446_v56, %v896_v6  ;;  %750 = vperm.xlu1 %7650, %v8419_v46   ;;  %v7689_v10 = vld [vmem:[#allocation2 + $0x28] sm:$0xff]  }
 0x10a   : > { %1614 = vmatmul.mubr.bf16.gmra.mxu0 %v7689_v10  ;;  %v1127_v37 = vmax.f32 %v1095_v13, 0.0 }
 0x10b   : > { %v1019_v38 = vadd.f32 %v987_v9, %v822_v33  ;;  %1623 = vmatprep.mubr.bf16.mxu0 %v8187_v2 }
 0x10d   : > { %v1058_v11 = vadd.f32 %v8456_v63, %v1019_v38  ;;  %754 = vperm.xlu1 %7650, %v8402_v43   ;;  %v521_v12 = vpop.permute.xlu1 %520 }
 0x10e   : > { %v626_v17 = vmul.f32 %v8441_v55, %v521_v12 }
 0x10f   : > { %v1096_v51 = vadd.f32 %v8477_v14, %v1058_v11 }
 0x111   : > { %v1128_v15 = vmax.f32 %v1096_v51, 0.0  ;;  %7651 = vset.pattern.permute.xlu1 %v8185_v0  ;;  %v992_v51 = vmul.f32 %v8446_v56, %v916_v40 }
 0x112   : > { %951 = vperm.xlu1 %7651, %v8402_v43   ;;  %v703_v46 = vpop.permute.xlu1 %702 }
 0x113   : > { %v7274_v41 = vpack.c.bf16 %v1128_v15, %v1127_v37  ;;  %v791_v18 = vmul.f32 %v8436_v54, %v703_v46  ;;  %v546_v15 = vpop.permute.xlu0 %545 }
 0x115   : > { %7326 = vst [vmem:[#allocation2 + $0x30] sm:$0xff] %v7274_v41   ;;  %v823_v21 = vadd.f32 %v791_v18, %v626_v17  ;;  %v631_v41 = vmul.f32 %v8441_v55, %v546_v15 }
 0x116   : > { %7652 = vset.pattern.permute.xlu1 %v8187_v2  ;;  %v707_v22 = vpop.permute.xlu1 %706 }
 0x117   : > { %590 = vperm.xlu1 %7652, %v8430_v53   ;;  %v1020_v43 = vadd.f32 %v988_v19, %v823_v21  ;;  %v792_v36 = vmul.f32 %v8436_v54, %v707_v22  ;;  %v556_v23 = vpop.permute.xlu0 %555 }
 0x119   : > { %v1059_v62 = vadd.f32 %v8456_v63, %v1020_v43  ;;  %v824_v26 = vadd.f32 %v792_v36, %v627_v24 }
 0x11b   : > { %7653 = vset.pattern.permute.xlu1 %v8186_v1  ;;  %v904_v25 = vpop.permute.xlu1 %903  ;;  %v1097_v20 = vadd.f32 %v8477_v14, %v1059_v62 }
 0x11c   : > { %v989_v27 = vmul.f32 %v8446_v56, %v904_v25  ;;  %758 = vperm.xlu1 %7653, %v8430_v53   ;;  %v7690_v28 = vld [vmem:[#allocation2 + $0x30] sm:$0xff]  }
 0x11d   : > { %1624 = vmatmul.mubr.bf16.gmra.mxu0 %v7690_v28  ;;  %v1129_v34 = vmax.f32 %v1097_v20, 0.0  ;;  %v566_v28 = vpop.permute.xlu0 %565 }
 0x11e   : > { %v1021_v29 = vadd.f32 %v989_v27, %v824_v26  ;;  %1633 = vmatprep.mubr.bf16.mxu0 %v8187_v2 }
 0x120   : > { %v1060_v30 = vadd.f32 %v8456_v63, %v1021_v29  ;;  %762 = vperm.xlu1 %7653, %v8468_v7   ;;  %v531_v45 = vpop.permute.xlu1 %530 }
 0x121   : > { %v628_v50 = vmul.f32 %v8441_v55, %v531_v45 }
 0x122   : > { %v1098_v31 = vadd.f32 %v8477_v14, %v1060_v30  ;;  %v994_v30 = vmul.f32 %v8446_v56, %v8725_v32 }
 0x124   : > { %v1130_v48 = vmax.f32 %v1098_v31, 0.0  ;;  %7655 = vset.pattern.permute.xlu1 %v8185_v0 }
 0x125   : > { %959 = vperm.xlu1 %7655, %v8468_v7   ;;  %v711_v53 = vpop.permute.xlu1 %710 }
 0x126   : > { %v7279_v49 = vpack.c.bf16 %v1130_v48, %v1129_v34  ;;  %v793_v39 = vmul.f32 %v8436_v54, %v711_v53  ;;  %v633_v48 = vmul.f32 %v8441_v55, %v556_v23 }
 0x128   : > { %7327 = vst [vmem:[#allocation2 + $0x38] sm:$0xff] %v7279_v49   ;;  %v825_v52 = vadd.f32 %v793_v39, %v628_v50  ;;  %v8764_v49 = vpop.permute.xlu0 %575 }
 0x129   : > { %7656 = vset.pattern.permute.xlu1 %v8187_v2  ;;  %v715_v59 = vpop.permute.xlu1 %714 }
 0x12a   : > { %600 = vperm.xlu1 %7656, %v8504_v58   ;;  %v1022_v60 = vadd.f32 %v990_v57, %v825_v52  ;;  %v794_v7 = vmul.f32 %v8436_v54, %v715_v59 }
 0x12c   : > { %v1061_v44 = vadd.f32 %v8456_v63, %v1022_v60  ;;  %v826_v42 = vadd.f32 %v794_v7, %v629_v61  ;;  %v8768_v32 = vpop.permute.xlu0 %585 }
 0x12e   : > { %7657 = vset.pattern.permute.xlu1 %v8186_v1  ;;  %v912_v3 = vpop.permute.xlu1 %911  ;;  %v1099_v8 = vadd.f32 %v8477_v14, %v1061_v44 }
 0x12f   : > { %v991_v4 = vmul.f32 %v8446_v56, %v912_v3  ;;  %766 = vperm.xlu1 %7657, %v8504_v58   ;;  %v7691_v5 = vld [vmem:[#allocation2 + $0x38] sm:$0xff]  }
 0x130   : > { %1634 = vmatmul.mubr.bf16.gmra.mxu0 %v7691_v5  ;;  %v1131_v10 = vmax.f32 %v1099_v8, 0.0 }
 0x131   : > { %v1023_v6 = vadd.f32 %v991_v4, %v826_v42  ;;  %1643 = vmatprep.mubr.bf16.mxu0 %v8187_v2  ;;  %v932_v4 = vpop.permute.xlu0 %931 }
 0x133   : > { %v1062_v33 = vadd.f32 %v8456_v63, %v1023_v6  ;;  %770 = vperm.xlu1 %7657, %v8494_v47   ;;  %v541_v1 = vpop.permute.xlu1 %540 }
 0x134   : > { %v630_v11 = vmul.f32 %v8441_v55, %v541_v1  ;;  %v996_v1 = vmul.f32 %v8446_v56, %v932_v4 }
 0x135   : > { %v1100_v9 = vadd.f32 %v8477_v14, %v1062_v33 }
 0x137   : > { %v1132_v38 = vmax.f32 %v1100_v9, 0.0  ;;  %7659 = vset.pattern.permute.xlu1 %v8185_v0 }
 0x138   : > { %967 = vperm.xlu1 %7659, %v8494_v47   ;;  %v719_v58 = vpop.permute.xlu1 %718 }
 0x139   : > { %v7284_v13 = vpack.c.bf16 %v1132_v38, %v1131_v10  ;;  %v795_v12 = vmul.f32 %v8436_v54, %v719_v58  ;;  %v635_v38 = vmul.f32 %v8441_v55, %v566_v28 }
 0x13b   : > { %7328 = vst [vmem:[#allocation2 + $0x40] sm:$0xff] %v7284_v13   ;;  %v827_v37 = vadd.f32 %v795_v12, %v630_v11  ;;  %v8188_v11 = vmov 1966171168  }
 0x13c   : > { %v723_v16 = vpop.permute.xlu1 %722  ;;  %v1767_v12 = vunpack.c.l.s4 %v8188_v11 }
 0x13d   : > { %v1024_v46 = vadd.f32 %v992_v51, %v827_v37  ;;  %v796_v17 = vmul.f32 %v8436_v54, %v723_v16  ;;  %v1769_v51 = vlaneseq }
 0x13f   : > { %v1063_v47 = vadd.f32 %v8456_v63, %v1024_v46  ;;  %v828_v18 = vadd.f32 %v796_v17, %v631_v41  ;;  %v1768_v17 = vunpack.c.0.s8 %v1767_v12 }
 0x141   : > { %v920_v0 = vpop.permute.xlu1 %919  ;;  %v1101_v24 = vadd.f32 %v8477_v14, %v1063_v47 }
 0x142   : > { %v993_v19 = vmul.f32 %v8446_v56, %v920_v0  ;;  %v7692_v21 = vld [vmem:[#allocation2 + $0x40] sm:$0xff]   ;;  %v1770_v0 = vshrl.u32 %v1769_v51, 7 }
 0x143   : > { %1644 = vmatmul.mubr.bf16.gmra.mxu0 %v7692_v21  ;;  %v1133_v62 = vmax.f32 %v1101_v24, 0.0 }
 0x144   : > { %v1025_v22 = vadd.f32 %v993_v19, %v828_v18  ;;  %1653 = vmatprep.mubr.bf16.mxu0 %v8187_v2  ;;  %v6764_v18 = vld.sshfl [vmem:[%s10695_s5] sm:$0x11 pattern:$0x75316420]  ;;  %v8787_v23 = vsub.s32 %v1768_v17, %v1770_v0 }
 0x146   : > { %v1064_v43 = vadd.f32 %v8456_v63, %v1025_v22  ;;  %v551_v36 = vpop.permute.xlu1 %550 }
 0x147   : > { %v632_v29 = vmul.f32 %v8441_v55, %v551_v36 }
 0x148   : > { %v1102_v25 = vadd.f32 %v8477_v14, %v1064_v43  ;;  %v1765_v43 = vcombine.high %v6764_v18, %v6764_v18 }
 0x14a   : > { %v1134_v26 = vmax.f32 %v1102_v25, 0.0 }
 0x14b   : > { %v727_v27 = vpop.permute.xlu1 %726 }
 0x14c   : > { %v7289_v40 = vpack.c.bf16 %v1134_v26, %v1133_v62  ;;  %v797_v20 = vmul.f32 %v8436_v54, %v727_v27  ;;  %v940_v62 = vpop.permute.xlu0 %939  ;;  %v1772_v27 = vrot.slane %v6764_v18, %v8787_v23 }
 0x14e   : > { %7329 = vst [vmem:[#allocation2 + $0x48] sm:$0xff] %v7289_v40   ;;  %v829_v45 = vadd.f32 %v797_v20, %v632_v29  ;;  %v1779_v20 = vrot.slane %v1765_v43, %v8787_v23 }
 0x14f   : > { %v731_v31 = vpop.permute.xlu1 %730 }
 0x150   : > { %v1026_v34 = vadd.f32 %v994_v30, %v829_v45  ;;  %v798_v53 = vmul.f32 %v8436_v54, %v731_v31  ;;  %v1781_v31 = vpack.i.b16 %v1772_v27, %v1772_v27 }
 0x152   : > { %v1065_v39 = vadd.f32 %v8456_v63, %v1026_v34  ;;  %v830_v57 = vadd.f32 %v798_v53, %v633_v48  ;;  %v8795_v34 = vsub.s32 0, %v1770_v0  ;;  %v1788_v48 = vpack.i.b16 %v1779_v20, %v1779_v20  ;;  %v8800_v53 = vld [vmem:[%s10692_s2] ss:$0 sm:$0xff] }
 0x154   : > { %v928_v50 = vpop.permute.xlu1 %927  ;;  %v1103_v60 = vadd.f32 %v8477_v14, %v1065_v39 }
 0x155   : > { %v995_v52 = vmul.f32 %v8446_v56, %v928_v50  ;;  %v7708_v35 = vld [vmem:[#allocation2 + $0x48] sm:$0xff]  }
 0x156   : > { %1654 = vmatmul.mubr.bf16.gmra.mxu0 %v7708_v35  ;;  %v1135_v44 = vmax.f32 %v1103_v60, 0.0  ;;  %v8811_v35 = vrot.slane %v1781_v31, %v8795_v34  ;;  %v7750_v31 = vld [vmem:[%s10696_s6 + $0x174] ss:$8 sps:$4 sm:$0xff]  }
 0x157   : > { %v1027_v59 = vadd.f32 %v995_v52, %v830_v57  ;;  %1663 = vmatprep.mubr.bf16.mxu0 %v8187_v2  ;;  %2570 = vmatprep.subr.bf16.mxu0 %v7750_v31 }
 0x159   : > { %v1066_v61 = vadd.f32 %v8456_v63, %v1027_v59  ;;  %v561_v7 = vpop.permute.xlu1 %560  ;;  %v8814_v59 = vrot.slane %v1788_v48, %v8795_v34 }
 0x15a   : > { %v634_v8 = vmul.f32 %v8441_v55, %v561_v7  ;;  %v8825_v7 = vld [vmem:[%s10692_s2 + $0x2] ss:$0 sm:$0xff] }
 0x15b   : > { %v1104_v3 = vadd.f32 %v8477_v14, %v1066_v61 }
 0x15d   : > { %v1136_v42 = vmax.f32 %v1104_v3, 0.0 }
 0x15e   : > { %v735_v5 = vpop.permute.xlu1 %734 }
 0x15f   : > { %v7294_v6 = vpack.c.bf16 %v1136_v42, %v1135_v44  ;;  %v799_v33 = vmul.f32 %v8436_v54, %v735_v5 }
 0x161   : > { %7330 = vst [vmem:[#allocation2 + $0x50] sm:$0xff] %v7294_v6   ;;  %v831_v9 = vadd.f32 %v799_v33, %v634_v8  ;;  %v8831_v33 = vld [vmem:[%s8462_s21] ss:$0 sm:$0xff]  ;;  %s10485_s21 = scalar_lea.vmem %s10700_s10, %s7207_s17 }
 0x162   : > { %v739_v10 = vpop.permute.xlu1 %738 }
 0x163   : > { %v1028_v58 = vadd.f32 %v996_v1, %v831_v9  ;;  %v800_v13 = vmul.f32 %v8436_v54, %v739_v10 }
 0x165   : > { %v1067_v15 = vadd.f32 %v8456_v63, %v1028_v58  ;;  %v832_v16 = vadd.f32 %v800_v13, %v635_v38 }
 0x167   : > { %v936_v37 = vpop.permute.xlu1 %935  ;;  %v1105_v19 = vadd.f32 %v8477_v14, %v1067_v15 }
 0x168   : > { %v997_v46 = vmul.f32 %v8446_v56, %v936_v37  ;;  %v7724_v41 = vld [vmem:[#allocation2 + $0x50] sm:$0xff]  }
 0x169   : > { %1664 = vmatmul.mubr.bf16.gmra.mxu0 %v7724_v41  ;;  %v1137_v36 = vmax.f32 %v1105_v19, 0.0 }
 0x16a   : > { %v1029_v47 = vadd.f32 %v997_v46, %v832_v16  ;;  %1673 = vmatprep.mubr.bf16.mxu0 %v8187_v2  ;;  %v948_v46 = vpop.permute.xlu0 %947 }
 0x16c   : > { %v1068_v21 = vadd.f32 %v8456_v63, %v1029_v47  ;;  %v571_v22 = vpop.permute.xlu1 %570  ;;  %v998_v63 = vmul.f32 %v8446_v56, %v940_v62  ;;  %v8807_v56 = vld [vmem:[%s10692_s2 + $0x1] ss:$0 sm:$0xff] }
 0x16d   : > { %v636_v40 = vmul.f32 %v8441_v55, %v571_v22 }
 0x16e   : > { %v1106_v24 = vadd.f32 %v8477_v14, %v1068_v21  ;;  %v1000_v21 = vmul.f32 %v8825_v7, %v948_v46 }
 0x170   : > { %v1138_v25 = vmax.f32 %v1106_v24, 0.0 }
 0x171   : > { %v743_v26 = vpop.permute.xlu1 %742 }
 0x172   : > { %v7299_v28 = vpack.c.bf16 %v1138_v25, %v1137_v36  ;;  %v801_v29 = vmul.f32 %v8436_v54, %v743_v26  ;;  %v637_v54 = vmul.f32 %v8800_v53, %v8764_v49  ;;  %v8819_v49 = vld [vmem:[%s10693_s3] ss:$0 sm:$0xff] }
 0x174   : > { %7331 = vst [vmem:[#allocation2 + $0x58] sm:$0xff] %v7299_v28   ;;  %v833_v30 = vadd.f32 %v801_v29, %v636_v40  ;;  %v639_v40 = vmul.f32 %v8800_v53, %v8768_v32  ;;  %v7748_v32 = vld [vmem:[%s10696_s6 + $0x170] ss:$8 sps:$4 sm:$0xff]  }
 0x175   : > { %v747_v45 = vpop.permute.xlu1 %746  ;;  %v1565_v14 = vpop.f32.mrf.mxu0  ;;  %2571 = vmatpush1.bf16.msra.mxu0 %v7748_v32  ;;  %v7771_v32 = vld [vmem:[%s10696_s6 + $0x114] ss:$8 sps:$4 sm:$0xff]  }
 0x176   : > { %v1030_v55 = vadd.f32 %v998_v63, %v833_v30  ;;  %v802_v50 = vmul.f32 %v8807_v56, %v747_v45 }
 0x177   : > { %v1567_v39 = vpop.f32.mrf.mxu0 }
 0x178   : > { %v1069_v60 = vadd.f32 %v8819_v49, %v1030_v55  ;;  %v834_v61 = vadd.f32 %v802_v50, %v637_v54 }
 0x179   : > { %v1569_v52 = vpop.f32.mrf.mxu0 }
 0x17a   : > { %v944_v57 = vpop.permute.xlu1 %943  ;;  %v1724_v44 = vpack.c.bf16 %v1569_v52, %v1565_v14  ;;  %v1107_v1 = vadd.f32 %v8831_v33, %v1069_v60 }
 0x17b   : > { %v999_v3 = vmul.f32 %v8825_v7, %v944_v57  ;;  %v7739_v42 = vld [vmem:[#allocation2 + $0x58] sm:$0xff]   ;;  %v1571_v4 = vpop.f32.mrf.mxu0  ;;  %v7751_v57 = vld [vmem:[%s10696_s6 + $0x160] ss:$8 sps:$4 sm:$0xff]  }
 0x17c   : > { %v1725_v6 = vpack.c.bf16 %v1571_v4, %v1567_v39  ;;  %1674 = vmatmul.mubr.bf16.gmra.mxu0 %v7739_v42  ;;  %v1794_v8 = vadd.bf16 %v8811_v35, %v1724_v44  ;;  %v1139_v37 = vmax.f32 %v1107_v1, 0.0  ;;  %v7753_v39 = vld [vmem:[%s10696_s6 + $0x164] ss:$8 sps:$4 sm:$0xff]   ;;  %v956_v44 = vpop.permute.xlu0 %955 }
 0x17d   : > { %v1031_v5 = vadd.f32 %v999_v3, %v834_v61  ;;  %1683 = vmatprep.mubr.bf16.mxu0 %v8187_v2  ;;  %2572 = vmatprep.subr.bf16.mxu0 %v7753_v39  ;;  %v7769_v39 = vld [vmem:[%s10696_s6 + $0x110] ss:$8 sps:$4 sm:$0xff]  }
 0x17e   : > { %v1575_v38 = vpop.f32.mrf.mxu0  ;;  %v1795_v58 = vadd.bf16 %v8814_v59, %v1725_v6  ;;  %v1826_v51 = vmax.bf16 %v8187_v2, %v1794_v8  ;;  %2573 = vmatpush1.bf16.msra.mxu0 %v7751_v57 }
 0x17f   : > { %v1070_v9 = vadd.f32 %v8819_v49, %v1031_v5  ;;  %v581_v10 = vpop.permute.xlu1 %580 }
 0x180   : > { %v1577_v11 = vpop.f32.mrf.mxu0  ;;  %v1827_v12 = vmax.bf16 %v8187_v2, %v1795_v58  ;;  %v638_v47 = vmul.f32 %v8800_v53, %v581_v10  ;;  %v7756_v10 = vld [vmem:[%s10696_s6 + $0x154] ss:$8 sps:$4 sm:$0xff]   ;;  %v7754_v58 = vld [vmem:[%s10696_s6 + $0x150] ss:$8 sps:$4 sm:$0xff]  }
 0x181   : > { %v1108_v13 = vadd.f32 %v8831_v33, %v1070_v9  ;;  %2574 = vmatprep.subr.bf16.mxu0 %v7756_v10 }
 0x182   : > { %v1579_v16 = vpop.f32.mrf.mxu0  ;;  %2082 = vmatprep.mubr.bf16.mxu1 %v1827_v12  ;;  %v596_v12 = vpop.permute.xlu0 %595  ;;  %2575 = vmatpush1.bf16.msra.mxu0 %v7754_v58 }
 0x183   : > { %v1140_v15 = vmax.f32 %v1108_v13, 0.0  ;;  %v1726_v41 = vpack.c.bf16 %v1579_v16, %v1575_v38  ;;  %2083 = vmatmul.mubr.bf16.vlgmr.msra.gmra.mxu1 %v1826_v51  ;;  %v1002_v51 = vmul.f32 %v8825_v7, %v956_v44  ;;  %v7759_v16 = vld [vmem:[%s10696_s6 + $0x144] ss:$8 sps:$4 sm:$0xff]  }
 0x184   : > { %v751_v17 = vpop.permute.xlu1 %750  ;;  %v1581_v19 = vpop.f32.mrf.mxu0  ;;  %2576 = vmatprep.subr.bf16.mxu0 %v7759_v16 }
 0x185   : > { %v7304_v0 = vpack.c.bf16 %v1140_v15, %v1139_v37  ;;  %v803_v18 = vmul.f32 %v8807_v56, %v751_v17  ;;  %v1727_v22 = vpack.c.bf16 %v1581_v19, %v1577_v11  ;;  %v1796_v24 = vadd.bf16 %v8811_v35, %v1726_v41 }
 0x186   : > { %v641_v41 = vmul.f32 %v8800_v53, %v596_v12 }
 0x187   : > { %7332 = vst [vmem:[#allocation2 + $0x60] sm:$0xff] %v7304_v0   ;;  %v835_v43 = vadd.f32 %v803_v18, %v638_v47  ;;  %v1797_v36 = vadd.bf16 %v8814_v59, %v1727_v22  ;;  %v1828_v28 = vmax.bf16 %v8187_v2, %v1796_v24  ;;  %v7757_v47 = vld [vmem:[%s10696_s6 + $0x140] ss:$8 sps:$4 sm:$0xff]   ;;  %v7762_v22 = vld [vmem:[%s10694_s4 + $0xf4] ss:$8 sps:$4 sm:$0xff]  }
 0x188   : > { %v755_v25 = vpop.permute.xlu1 %754  ;;  %2577 = vmatpush1.bf16.msra.mxu0 %v7757_v47  ;;  %v7763_v24 = vld [vmem:[%s10696_s6 + $0x130] ss:$8 sps:$4 sm:$0xff]   ;;  %3316 = vmatprep.subr.bf16.mxu1 %v7762_v22 }
 0x189   : > { %v1032_v62 = vadd.f32 %v1000_v21, %v835_v43  ;;  %v804_v26 = vmul.f32 %v8807_v56, %v755_v25  ;;  %v1829_v27 = vmax.bf16 %v8187_v2, %v1797_v36  ;;  %v7760_v21 = vld [vmem:[%s10694_s4 + $0xf0] ss:$8 sps:$4 sm:$0xff]  }
 0x18a   : > { %3317 = vmatpush1.bf16.msra.mxu1 %v7760_v21 }
 0x18b   : > { %2092 = vmatprep.mubr.bf16.mxu1 %v1829_v27  ;;  %v1071_v20 = vadd.f32 %v8819_v49, %v1032_v62  ;;  %v836_v63 = vadd.f32 %v804_v26, %v639_v40  ;;  %v7765_v26 = vld [vmem:[%s10696_s6 + $0x134] ss:$8 sps:$4 sm:$0xff]   ;;  %v7768_v40 = vld [vmem:[%s10696_s6 + $0x124] ss:$8 sps:$4 sm:$0xff]  }
 0x18c   : > { %2093 = vmatmul.mubr.bf16.gmra.mxu1 %v1828_v28  ;;  %v606_v28 = vpop.permute.xlu0 %605  ;;  %2578 = vmatprep.subr.bf16.mxu0 %v7765_v26 }
 0x18d   : > { %v952_v29 = vpop.permute.xlu1 %951  ;;  %v1109_v48 = vadd.f32 %v8831_v33, %v1071_v20  ;;  %2579 = vmatpush1.bf16.msra.mxu0 %v7763_v24  ;;  %v7784_v24 = vld [vmem:[%s10696_s6 + $0x1d0] ss:$8 sps:$4 sm:$0xff]  }
 0x18e   : > { %v1001_v30 = vmul.f32 %v8825_v7, %v952_v29  ;;  %v7744_v45 = vld [vmem:[#allocation2 + $0x60] sm:$0xff]   ;;  %2580 = vmatprep.subr.bf16.mxu0 %v7768_v40  ;;  %v7790_v40 = vld [vmem:[%s10694_s4 + $0xd0] ss:$8 sps:$4 sm:$0xff]  }
 0x18f   : > { %1684 = vmatmul.mubr.bf16.gmra.mxu0 %v7744_v45  ;;  %v1141_v61 = vmax.f32 %v1109_v48, 0.0  ;;  %v7766_v45 = vld [vmem:[%s10696_s6 + $0x120] ss:$8 sps:$4 sm:$0xff]  }
 0x190   : > { %v1033_v14 = vadd.f32 %v1001_v30, %v836_v63  ;;  %1693 = vmatprep.mubr.bf16.mxu0 %v8187_v2 }
 0x191   : > { %v1585_v50 = vpop.f32.mrf.mxu0  ;;  %2581 = vmatpush1.bf16.msra.mxu0 %v7766_v45  ;;  %v7795_v45 = vld [vmem:[%s10696_s6 + $0x1b4] ss:$8 sps:$4 sm:$0xff]  }
 0x192   : > { %v1072_v54 = vadd.f32 %v8819_v49, %v1033_v14  ;;  %v591_v55 = vpop.permute.xlu1 %590  ;;  %2582 = vmatprep.subr.bf16.mxu0 %v7771_v32 }
 0x193   : > { %v1587_v60 = vpop.f32.mrf.mxu0  ;;  %v640_v8 = vmul.f32 %v8800_v53, %v591_v55 }
 0x194   : > { %v1110_v52 = vadd.f32 %v8831_v33, %v1072_v54 }
 0x195   : > { %v1589_v42 = vpop.f32.mrf.mxu0  ;;  %2583 = vmatpush1.bf16.msra.mxu0 %v7769_v39  ;;  %v7801_v39 = vld [vmem:[%s10696_s6 + $0x194] ss:$8 sps:$4 sm:$0xff]  }
 0x196   : > { %v1142_v3 = vmax.f32 %v1110_v52, 0.0  ;;  %v1728_v4 = vpack.c.bf16 %v1589_v42, %v1585_v50  ;;  %v964_v50 = vpop.permute.xlu0 %963 }
 0x197   : > { %v759_v5 = vpop.permute.xlu1 %758  ;;  %v1591_v9 = vpop.f32.mrf.mxu0  ;;  %v1004_v42 = vmul.f32 %v8825_v7, %v964_v50 }
 0x198   : > { %v7309_v6 = vpack.c.bf16 %v1142_v3, %v1141_v61  ;;  %v805_v1 = vmul.f32 %v8807_v56, %v759_v5  ;;  %v1729_v38 = vpack.c.bf16 %v1591_v9, %v1587_v60  ;;  %v1798_v13 = vadd.bf16 %v8811_v35, %v1728_v4  ;;  %v7774_v5 = vld [vmem:[%s10696_s6 + $0x104] ss:$8 sps:$4 sm:$0xff]  }
 0x199   : > { %2584 = vmatprep.subr.bf16.mxu0 %v7774_v5 }
 0x19a   : > { %7333 = vst [vmem:[#allocation2 + $0x68] sm:$0xff] %v7309_v6   ;;  %v837_v11 = vadd.f32 %v805_v1, %v640_v8  ;;  %v1799_v37 = vadd.bf16 %v8814_v59, %v1729_v38  ;;  %v1830_v18 = vmax.bf16 %v8187_v2, %v1798_v13  ;;  %v7772_v1 = vld [vmem:[%s10696_s6 + $0x100] ss:$8 sps:$4 sm:$0xff]  }
 0x19b   : > { %v763_v15 = vpop.permute.xlu1 %762  ;;  %2585 = vmatpush1.bf16.msra.mxu0 %v7772_v1 }
 0x19c   : > { %v1034_v46 = vadd.f32 %v1002_v51, %v837_v11  ;;  %v806_v17 = vmul.f32 %v8807_v56, %v763_v15  ;;  %v1831_v0 = vmax.bf16 %v8187_v2, %v1799_v37  ;;  %v7780_v11 = vld [vmem:[%s10696_s6 + $0x1f4] ss:$8 sps:$4 sm:$0xff]   ;;  %v7775_v51 = vld [vmem:[%s10694_s4 + $0xe0] ss:$8 sps:$4 sm:$0xff]   ;;  %v7777_v37 = vld [vmem:[%s10694_s4 + $0xe4] ss:$8 sps:$4 sm:$0xff]   ;;  %v643_v15 = vmul.f32 %v8800_v53, %v606_v28 }
 0x19d   : > { %2586 = vmatprep.subr.bf16.mxu0 %v7780_v11  ;;  %3318 = vmatprep.subr.bf16.mxu1 %v7777_v37  ;;  %v7787_v28 = vld [vmem:[%s10696_s6 + $0x1c0] ss:$8 sps:$4 sm:$0xff]   ;;  %v7810_v11 = vld [vmem:[%s10694_s4 + $0xb4] ss:$8 sps:$4 sm:$0xff]  }
 0x19e   : > { %2102 = vmatprep.mubr.bf16.mxu1 %v1831_v0  ;;  %v1073_v43 = vadd.f32 %v8819_v49, %v1034_v46  ;;  %v838_v36 = vadd.f32 %v806_v17, %v641_v41  ;;  %v7783_v46 = vld [vmem:[%s10696_s6 + $0x1e4] ss:$8 sps:$4 sm:$0xff]   ;;  %3319 = vmatpush1.bf16.msra.mxu1 %v7775_v51 }
 0x19f   : > { %2103 = vmatmul.mubr.bf16.gmra.mxu1 %v1830_v18 }
 0x1a0   : > { %v960_v19 = vpop.permute.xlu1 %959  ;;  %v1111_v29 = vadd.f32 %v8831_v33, %v1073_v43 }
 0x1a1   : > { %v1003_v25 = vmul.f32 %v8825_v7, %v960_v19  ;;  %v7745_v62 = vld [vmem:[#allocation2 + $0x68] sm:$0xff]  }
 0x1a2   : > { %1694 = vmatmul.mubr.bf16.gmra.mxu0 %v7745_v62  ;;  %v1143_v48 = vmax.f32 %v1111_v29, 0.0 }
 0x1a3   : > { %v1035_v27 = vadd.f32 %v1003_v25, %v838_v36  ;;  %1703 = vmatprep.mubr.bf16.mxu0 %v8187_v2 }
 0x1a4   : > { %v1595_v30 = vpop.f32.mrf.mxu0 }
 0x1a5   : > { %v1074_v20 = vadd.f32 %v8819_v49, %v1035_v27  ;;  %v601_v63 = vpop.permute.xlu1 %600 }
 0x1a6   : > { %v1597_v31 = vpop.f32.mrf.mxu0  ;;  %v642_v61 = vmul.f32 %v8800_v53, %v601_v63  ;;  %v7781_v53 = vld [vmem:[%s10696_s6 + $0x1e0] ss:$8 sps:$4 sm:$0xff]  }
 0x1a7   : > { %v1112_v14 = vadd.f32 %v8831_v33, %v1074_v20 }
 0x1a8   : > { %v1599_v55 = vpop.f32.mrf.mxu0 }
 0x1a9   : > { %v1144_v54 = vmax.f32 %v1112_v14, 0.0  ;;  %v1730_v57 = vpack.c.bf16 %v1599_v55, %v1595_v30  ;;  %v7796_v55 = vld [vmem:[%s10696_s6 + $0x1a0] ss:$8 sps:$4 sm:$0xff]  }
 0x1aa   : > { %v767_v52 = vpop.permute.xlu1 %766  ;;  %v1601_v44 = vpop.f32.mrf.mxu0 }
 0x1ab   : > { %v7314_v60 = vpack.c.bf16 %v1144_v54, %v1143_v48  ;;  %v807_v3 = vmul.f32 %v8807_v56, %v767_v52  ;;  %v1731_v4 = vpack.c.bf16 %v1601_v44, %v1597_v31  ;;  %v1800_v6 = vadd.bf16 %v8811_v35, %v1730_v57  ;;  %v7793_v31 = vld [vmem:[%s10696_s6 + $0x1b0] ss:$8 sps:$4 sm:$0xff]   ;;  %v7798_v54 = vld [vmem:[%s10696_s6 + $0x1a4] ss:$8 sps:$4 sm:$0xff]  }
 0x1ac   : > { %v7799_v57 = vld [vmem:[%s10696_s6 + $0x190] ss:$8 sps:$4 sm:$0xff]   ;;  %v7807_v44 = vld [vmem:[%s10694_s4 + $0xc4] ss:$8 sps:$4 sm:$0xff]  }
 0x1ad   : > { %7334 = vst [vmem:[#allocation2 + $0x70] sm:$0xff] %v7314_v60   ;;  %v839_v8 = vadd.f32 %v807_v3, %v642_v61  ;;  %v1801_v9 = vadd.bf16 %v8814_v59, %v1731_v4  ;;  %v1832_v12 = vmax.bf16 %v8187_v2, %v1800_v6  ;;  %v7804_v60 = vld [vmem:[%s10696_s6 + $0x184] ss:$8 sps:$4 sm:$0xff]   ;;  %v7805_v3 = vld [vmem:[%s10694_s4 + $0xc0] ss:$8 sps:$4 sm:$0xff]  }
 0x1ae   : > { %v771_v10 = vpop.permute.xlu1 %770 }
 0x1af   : > { %v1036_v38 = vadd.f32 %v1004_v42, %v839_v8  ;;  %v808_v58 = vmul.f32 %v8807_v56, %v771_v10  ;;  %v1833_v13 = vmax.bf16 %v8187_v2, %v1801_v9  ;;  %v7778_v56 = vld [vmem:[%s10696_s6 + $0x1f0] ss:$8 sps:$4 sm:$0xff]   ;;  %v7802_v42 = vld [vmem:[%s10696_s6 + $0x180] ss:$8 sps:$4 sm:$0xff]  }
 0x1b0   : > { %2587 = vmatpush2.bf16.msra.mxu0 %v7778_v56 }
 0x1b1   : > { %2112 = vmatprep.mubr.bf16.mxu1 %v1833_v13  ;;  %v1075_v41 = vadd.f32 %v8819_v49, %v1036_v38  ;;  %v840_v17 = vadd.f32 %v808_v58, %v643_v15  ;;  %2588 = vmatprep.subr.bf16.mxu0 %v7783_v46  ;;  %v7808_v13 = vld [vmem:[%s10694_s4 + $0xb0] ss:$8 sps:$4 sm:$0xff]  }
 0x1b2   : > { %2113 = vmatmul.mubr.bf16.gmra.mxu1 %v1832_v12 }
 0x1b3   : > { %v968_v16 = vpop.permute.xlu1 %967  ;;  %v1113_v19 = vadd.f32 %v8831_v33, %v1075_v41 }
 0x1b4   : > { %v1005_v0 = vmul.f32 %v8825_v7, %v968_v16  ;;  %v7746_v47 = vld [vmem:[#allocation2 + $0x70] sm:$0xff]   ;;  %2589 = vmatpush2.bf16.msra.mxu0 %v7781_v53 }
 0x1b5   : > { %1704 = vmatmul.mubr.bf16.gmra.mxu0 %v7746_v47  ;;  %v7786_v7 = vld [vmem:[%s10696_s6 + $0x1d4] ss:$8 sps:$4 sm:$0xff]   ;;  %v1145_v25 = vmax.f32 %v1113_v19, 0.0  ;;  %v7813_v47 = vld [vmem:[%s10694_s4 + $0xa4] ss:$8 sps:$4 sm:$0xff]  }
 0x1b6   : > { %v1037_v18 = vadd.f32 %v1005_v0, %v840_v17  ;;  %1713 = vmatprep.mubr.bf16.mxu0 %v8187_v2  ;;  %2590 = vmatprep.subr.bf16.mxu0 %v7786_v7  ;;  %v7811_v0 = vld [vmem:[%s10694_s4 + $0xa0] ss:$8 sps:$4 sm:$0xff]  }
 0x1b7   : > { %v1605_v22 = vpop.f32.mrf.mxu0 }
 0x1b8   : > { %v1076_v21 = vadd.f32 %v8819_v49, %v1037_v18  ;;  %v7789_v49 = vld [vmem:[%s10696_s6 + $0x1c4] ss:$8 sps:$4 sm:$0xff]   ;;  %2591 = vmatpush2.bf16.msra.mxu0 %v7784_v24 }
 0x1b9   : > { %v1607_v36 = vpop.f32.mrf.mxu0  ;;  %2592 = vmatprep.subr.bf16.mxu0 %v7789_v49 }
 0x1ba   : > { %v1114_v43 = vadd.f32 %v8831_v33, %v1076_v21  ;;  %v7792_v33 = vld [vmem:[%s10694_s4 + $0xd4] ss:$8 sps:$4 sm:$0xff]  }
 0x1bb   : > { %v1609_v26 = vpop.f32.mrf.mxu0  ;;  %3320 = vmatprep.subr.bf16.mxu1 %v7792_v33 }
 0x1bc   : > { %v1146_v62 = vmax.f32 %v1114_v43, 0.0  ;;  %v1732_v27 = vpack.c.bf16 %v1609_v26, %v1605_v22  ;;  %3321 = vmatpush1.bf16.msra.mxu1 %v7790_v40  ;;  %2593 = vmatpush2.bf16.msra.mxu0 %v7787_v28  ;;  %v7816_v26 = vld [vmem:[%s10694_s4 + $0x94] ss:$8 sps:$4 sm:$0xff]  }
 0x1bd   : > { %v1611_v20 = vpop.f32.mrf.mxu0  ;;  %2594 = vmatprep.subr.bf16.mxu0 %v7795_v45  ;;  %3322 = vmatprep.subr.bf16.mxu1 %v7807_v44 }
 0x1be   : > { %v7319_v29 = vpack.c.bf16 %v1146_v62, %v1145_v25  ;;  %v1733_v63 = vpack.c.bf16 %v1611_v20, %v1607_v36  ;;  %v1802_v30 = vadd.bf16 %v8811_v35, %v1732_v27  ;;  %v7814_v62 = vld [vmem:[%s10694_s4 + $0x90] ss:$8 sps:$4 sm:$0xff]  }
 0x1c0   : > { %7335 = vst [vmem:[#allocation2 + $0x78] sm:$0xff] %v7319_v29   ;;  %v1803_v14 = vadd.bf16 %v8814_v59, %v1733_v63  ;;  %v1834_v48 = vmax.bf16 %v8187_v2, %v1802_v30  ;;  %2595 = vmatpush2.bf16.msra.mxu0 %v7793_v31  ;;  %3323 = vmatpush1.bf16.msra.mxu1 %v7805_v3  ;;  %v7819_v31 = vld [vmem:[%s10694_s4 + $0x84] ss:$8 sps:$4 sm:$0xff]  }
 0x1c1   : > { %2596 = vmatprep.subr.bf16.mxu0 %v7798_v54  ;;  %3324 = vmatprep.subr.bf16.mxu1 %v7810_v11 }
 0x1c2   : > { %v1835_v32 = vmax.bf16 %v8187_v2, %v1803_v14  ;;  %v7817_v14 = vld [vmem:[%s10694_s4 + $0x80] ss:$8 sps:$4 sm:$0xff]  }
 0x1c4   : > { %2122 = vmatprep.mubr.bf16.mxu1 %v1835_v32  ;;  %2597 = vmatpush2.bf16.msra.mxu0 %v7796_v55 }
 0x1c5   : > { %2123 = vmatmul.mubr.bf16.gmra.mxu1 %v1834_v48  ;;  %2598 = vmatprep.subr.bf16.mxu0 %v7801_v39 }
 0x1c6   : > { %3325 = vmatpush1.bf16.msra.mxu1 %v7808_v13 }
 0x1c7   : > { %v7747_v50 = vld [vmem:[#allocation2 + $0x78] sm:$0xff]   ;;  %3326 = vmatprep.subr.bf16.mxu1 %v7813_v47 }
 0x1c8   : > { %1714 = vmatmul.mubr.bf16.gmra.mxu0 %v7747_v50 }
 0x1c9   : > { %2599 = vmatpush2.bf16.msra.mxu0 %v7799_v57 }
 0x1ca   : > { %v1615_v52 = vpop.f32.mrf.mxu0  ;;  %2600 = vmatprep.subr.bf16.mxu0 %v7804_v60  ;;  %3327 = vmatpush1.bf16.msra.mxu1 %v7811_v0 }
 0x1cb   : > { %3328 = vmatprep.subr.bf16.mxu1 %v7816_v26 }
 0x1cc   : > { %v1617_v61 = vpop.f32.mrf.mxu0 }
 0x1cd   : > { %2601 = vmatpush2.bf16.msra.mxu0 %v7802_v42 }
 0x1ce   : > { %v1619_v4 = vpop.f32.mrf.mxu0  ;;  %3329 = vmatpush1.bf16.msra.mxu1 %v7814_v62 }
 0x1cf   : > { %v1734_v5 = vpack.c.bf16 %v1619_v4, %v1615_v52  ;;  %3330 = vmatprep.subr.bf16.mxu1 %v7819_v31 }
 0x1d0   : > { %v1621_v6 = vpop.f32.mrf.mxu0 }
 0x1d1   : > { %v1735_v8 = vpack.c.bf16 %v1621_v6, %v1617_v61  ;;  %v1804_v1 = vadd.bf16 %v8811_v35, %v1734_v5 }
 0x1d2   : > { %3331 = vmatpush1.bf16.msra.mxu1 %v7817_v14 }
 0x1d3   : > { %v1805_v9 = vadd.bf16 %v8814_v59, %v1735_v8  ;;  %v1836_v38 = vmax.bf16 %v8187_v2, %v1804_v1 }
 0x1d5   : > { %v1837_v10 = vmax.bf16 %v8187_v2, %v1805_v9 }
 0x1d7   : > { %2132 = vmatprep.mubr.bf16.mxu1 %v1837_v10 }
 0x1d8   : > { %2133 = vmatmul.mubr.bf16.gmra.mxu1 %v1836_v38  ;;  %v6797_v38 = vld.sshfl [vmem:[%s10697_s7] sm:$0x11 pattern:$0x75316420] }
 0x1d9   : > { %v2284_v13 = vcombine.high %v6797_v38, %v6797_v38 }
 0x1dd   : > { %v1625_v58 = vpop.f32.mrf.mxu0 }
 0x1df   : > { %v1627_v12 = vpop.f32.mrf.mxu0 }
 0x1e1   : > { %v1629_v51 = vpop.f32.mrf.mxu0 }
 0x1e2   : > { %v1736_v37 = vpack.c.bf16 %v1629_v51, %v1625_v58 }
 0x1e3   : > { %v1631_v56 = vpop.f32.mrf.mxu0 }
 0x1e4   : > { %v1737_v15 = vpack.c.bf16 %v1631_v56, %v1627_v12  ;;  %v1806_v16 = vadd.bf16 %v8811_v35, %v1736_v37  ;;  %v9061_v12 = vrot.slane %v6797_v38, %v8787_v23  ;;  %v9064_v37 = vrot.slane %v2284_v13, %v8787_v23 }
 0x1e6   : > { %v1807_v46 = vadd.bf16 %v8814_v59, %v1737_v15  ;;  %v1838_v17 = vmax.bf16 %v8187_v2, %v1806_v16  ;;  %v2307_v0 = vpack.i.b16 %v9064_v37, %v9064_v37 }
 0x1e8   : > { %v1839_v41 = vmax.bf16 %v8187_v2, %v1807_v46 }
 0x1ea   : > { %2142 = vmatprep.mubr.bf16.mxu1 %v1839_v41  ;;  %v2300_v41 = vpack.i.b16 %v9061_v12, %v9061_v12 }
 0x1eb   : > { %2143 = vmatmul.mubr.bf16.gmra.mxu1 %v1838_v17 }
 0x1f0   : > { %v1635_v53 = vpop.f32.mrf.mxu0 }
 0x1f2   : > { %v1637_v18 = vpop.f32.mrf.mxu0 }
 0x1f4   : > { %v1639_v19 = vpop.f32.mrf.mxu0 }
 0x1f5   : > { %v1738_v21 = vpack.c.bf16 %v1639_v19, %v1635_v53  ;;  %v9073_v19 = vrot.slane %v2300_v41, %v8795_v34  ;;  %v7832_v41 = vld [vmem:[%s10696_s6 + $0x274] ss:$8 sps:$4 sm:$0xff]  }
 0x1f6   : > { %v1641_v22 = vpop.f32.mrf.mxu0  ;;  %3838 = vmatprep.subr.bf16.mxu0 %v7832_v41  ;;  %v7820_v41 = vld [vmem:[#allocation2] sm:$0xff]  }
 0x1f7   : > { %v1739_v7 = vpack.c.bf16 %v1641_v22, %v1637_v18  ;;  %v1808_v24 = vadd.bf16 %v8811_v35, %v1738_v21 }
 0x1f9   : > { %v1809_v43 = vadd.bf16 %v8814_v59, %v1739_v7  ;;  %v1840_v25 = vmax.bf16 %v8187_v2, %v1808_v24  ;;  %v9077_v7 = vrot.slane %v2307_v0, %v8795_v34 }
 0x1fb   : > { %v1841_v36 = vmax.bf16 %v8187_v2, %v1809_v43 }
 0x1fd   : > { %2152 = vmatprep.mubr.bf16.mxu1 %v1841_v36 }
 0x1fe   : > { %2153 = vmatmul.mubr.bf16.gmra.mxu1 %v1840_v25 }
 0x203   : > { %v1645_v49 = vpop.f32.mrf.mxu0 }
 0x205   : > { %v1647_v27 = vpop.f32.mrf.mxu0 }
 0x207   : > { %v1649_v28 = vpop.f32.mrf.mxu0 }
 0x208   : > { %v1740_v40 = vpack.c.bf16 %v1649_v28, %v1645_v49 }
 0x209   : > { %v1651_v33 = vpop.f32.mrf.mxu0 }
 0x20a   : > { %v1741_v29 = vpack.c.bf16 %v1651_v33, %v1647_v27  ;;  %v1810_v20 = vadd.bf16 %v8811_v35, %v1740_v40 }
 0x20c   : > { %v1811_v63 = vadd.bf16 %v8814_v59, %v1741_v29  ;;  %v1842_v45 = vmax.bf16 %v8187_v2, %v1810_v20 }
 0x20e   : > { %v1843_v30 = vmax.bf16 %v8187_v2, %v1811_v63 }
 0x210   : > { %2162 = vmatprep.mubr.bf16.mxu1 %v1843_v30 }
 0x211   : > { %2163 = vmatmul.mubr.bf16.gmra.mxu1 %v1842_v45 }
 0x216   : > { %v1655_v32 = vpop.f32.mrf.mxu0 }
 0x218   : > { %v1657_v48 = vpop.f32.mrf.mxu0 }
 0x21a   : > { %v1659_v54 = vpop.f32.mrf.mxu0 }
 0x21b   : > { %v1742_v55 = vpack.c.bf16 %v1659_v54, %v1655_v32 }
 0x21c   : > { %v1661_v50 = vpop.f32.mrf.mxu0 }
 0x21d   : > { %v1743_v39 = vpack.c.bf16 %v1661_v50, %v1657_v48  ;;  %v1812_v57 = vadd.bf16 %v8811_v35, %v1742_v55 }
 0x21f   : > { %v1813_v52 = vadd.bf16 %v8814_v59, %v1743_v39  ;;  %v1844_v61 = vmax.bf16 %v8187_v2, %v1812_v57 }
 0x221   : > { %v1845_v60 = vmax.bf16 %v8187_v2, %v1813_v52 }
 0x223   : > { %2172 = vmatprep.mubr.bf16.mxu1 %v1845_v60 }
 0x224   : > { %2173 = vmatmul.mubr.bf16.gmra.mxu1 %v1844_v61 }
 0x229   : > { %v1665_v3 = vpop.f32.mrf.mxu0 }
 0x22b   : > { %v1667_v44 = vpop.f32.mrf.mxu0 }
 0x22d   : > { %v1669_v42 = vpop.f32.mrf.mxu0 }
 0x22e   : > { %v1744_v4 = vpack.c.bf16 %v1669_v42, %v1665_v3 }
 0x22f   : > { %v1671_v5 = vpop.f32.mrf.mxu0 }
 0x230   : > { %v1745_v6 = vpack.c.bf16 %v1671_v5, %v1667_v44  ;;  %v1814_v8 = vadd.bf16 %v8811_v35, %v1744_v4 }
 0x232   : > { %v1815_v1 = vadd.bf16 %v8814_v59, %v1745_v6  ;;  %v1846_v10 = vmax.bf16 %v8187_v2, %v1814_v8 }
 0x234   : > { %v1847_v9 = vmax.bf16 %v8187_v2, %v1815_v1 }
 0x236   : > { %2182 = vmatprep.mubr.bf16.mxu1 %v1847_v9 }
 0x237   : > { %2183 = vmatmul.mubr.bf16.gmra.mxu1 %v1846_v10 }
 0x23c   : > { %v1675_v58 = vpop.f32.mrf.mxu0 }
 0x23e   : > { %v1677_v11 = vpop.f32.mrf.mxu0 }
 0x240   : > { %v1679_v51 = vpop.f32.mrf.mxu0 }
 0x241   : > { %v1746_v56 = vpack.c.bf16 %v1679_v51, %v1675_v58 }
 0x242   : > { %v1681_v15 = vpop.f32.mrf.mxu0 }
 0x243   : > { %v1747_v16 = vpack.c.bf16 %v1681_v15, %v1677_v11  ;;  %v2084_v46 = vpop.f32.mrf.mxu1  ;;  %v1816_v17 = vadd.bf16 %v8811_v35, %v1746_v56 }
 0x245   : > { %v1817_v47 = vadd.bf16 %v8814_v59, %v1747_v16  ;;  %v2086_v53 = vpop.f32.mrf.mxu1  ;;  %v1848_v24 = vmax.bf16 %v8187_v2, %v1816_v17 }
 0x247   : > { %v2088_v18 = vpop.f32.mrf.mxu1  ;;  %v1849_v21 = vmax.bf16 %v8187_v2, %v1817_v47  ;;  %v7834_v47 = vld [vmem:[%s10696_s6 + $0x260] ss:$8 sps:$4 sm:$0xff]  }
 0x248   : > { %v2243_v22 = vpack.c.bf16 %v2088_v18, %v2084_v46  ;;  %v7830_v46 = vld [vmem:[%s10696_s6 + $0x270] ss:$8 sps:$4 sm:$0xff]  }
 0x249   : > { %v2090_v43 = vpop.f32.mrf.mxu1  ;;  %2192 = vmatprep.mubr.bf16.mxu1 %v1849_v21 }
 0x24a   : > { %v2244_v36 = vpack.c.bf16 %v2090_v43, %v2086_v53  ;;  %2193 = vmatmul.mubr.bf16.gmra.mxu1 %v1848_v24  ;;  %v2313_v25 = vadd.bf16 %v9073_v19, %v2243_v22  ;;  %v7836_v53 = vld [vmem:[%s10696_s6 + $0x264] ss:$8 sps:$4 sm:$0xff]  }
 0x24c   : > { %v2314_v62 = vadd.bf16 %v9077_v7, %v2244_v36  ;;  %v2094_v26 = vpop.f32.mrf.mxu1  ;;  %v2345_v28 = vmax.bf16 %v8187_v2, %v2313_v25 }
 0x24e   : > { %v2096_v49 = vpop.f32.mrf.mxu1  ;;  %v2346_v27 = vmax.bf16 %v8187_v2, %v2314_v62 }
 0x24f   : > { %v1685_v40 = vpop.f32.mrf.mxu0 }
 0x250   : > { %v2098_v33 = vpop.f32.mrf.mxu1  ;;  %2602 = vmatprep.mubr.bf16.mxu0 %v2346_v27 }
 0x251   : > { %v2245_v29 = vpack.c.bf16 %v2098_v33, %v2094_v26  ;;  %v1687_v20 = vpop.f32.mrf.mxu0  ;;  %2603 = vmatmul.mubr.bf16.vlgmr.msra.gmra.mxu0 %v2345_v28 }
 0x252   : > { %v2100_v63 = vpop.f32.mrf.mxu1  ;;  %3839 = vmatpush1.bf16.msra.mxu0 %v7830_v46 }
 0x253   : > { %v2246_v30 = vpack.c.bf16 %v2100_v63, %v2096_v49  ;;  %v1689_v45 = vpop.f32.mrf.mxu0  ;;  %v2315_v14 = vadd.bf16 %v9073_v19, %v2245_v29  ;;  %3840 = vmatprep.subr.bf16.mxu0 %v7836_v53 }
 0x254   : > { %v1748_v31 = vpack.c.bf16 %v1689_v45, %v1685_v40  ;;  %v7840_v45 = vld [vmem:[%s10696_s6 + $0x254] ss:$8 sps:$4 sm:$0xff]  }
 0x255   : > { %v2316_v32 = vadd.bf16 %v9077_v7, %v2246_v30  ;;  %v1691_v48 = vpop.f32.mrf.mxu0  ;;  %v2347_v57 = vmax.bf16 %v8187_v2, %v2315_v14  ;;  %v7838_v30 = vld [vmem:[%s10696_s6 + $0x250] ss:$8 sps:$4 sm:$0xff]  }
 0x256   : > { %v1749_v54 = vpack.c.bf16 %v1691_v48, %v1687_v20  ;;  %v1818_v55 = vadd.bf16 %v8811_v35, %v1748_v31  ;;  %3841 = vmatpush1.bf16.msra.mxu0 %v7834_v47  ;;  %v7844_v31 = vld [vmem:[%s10696_s6 + $0x244] ss:$8 sps:$4 sm:$0xff]   ;;  %v7842_v48 = vld [vmem:[%s10696_s6 + $0x240] ss:$8 sps:$4 sm:$0xff]  }
 0x257   : > { %v2348_v50 = vmax.bf16 %v8187_v2, %v2316_v32  ;;  %3842 = vmatprep.subr.bf16.mxu0 %v7840_v45 }
 0x258   : > { %v1819_v39 = vadd.bf16 %v8814_v59, %v1749_v54  ;;  %v1850_v60 = vmax.bf16 %v8187_v2, %v1818_v55 }
 0x259   : > { %2612 = vmatprep.mubr.bf16.mxu0 %v2348_v50 }
 0x25a   : > { %2613 = vmatmul.mubr.bf16.gmra.mxu0 %v2347_v57  ;;  %v1851_v52 = vmax.bf16 %v8187_v2, %v1819_v39 }
 0x25b   : > { %3843 = vmatpush1.bf16.msra.mxu0 %v7838_v30  ;;  %v7823_v30 = vld [vmem:[#allocation2 + $0x18] sm:$0xff]  }
 0x25c   : > { %2202 = vmatprep.mubr.bf16.mxu1 %v1851_v52  ;;  %3844 = vmatprep.subr.bf16.mxu0 %v7844_v31  ;;  %v7865_v31 = vld [vmem:[%s10696_s6 + $0x2e4] ss:$8 sps:$4 sm:$0xff]  }
 0x25d   : > { %2203 = vmatmul.mubr.bf16.gmra.mxu1 %v1850_v60  ;;  %v7846_v60 = vld [vmem:[%s10696_s6 + $0x230] ss:$8 sps:$4 sm:$0xff]  }
 0x25f   : > { %v2104_v61 = vpop.f32.mrf.mxu1  ;;  %3845 = vmatpush1.bf16.msra.mxu0 %v7842_v48  ;;  %v7868_v48 = vld [vmem:[%s10696_s6 + $0x2d4] ss:$8 sps:$4 sm:$0xff]  }
 0x261   : > { %v2106_v3 = vpop.f32.mrf.mxu1 }
 0x262   : > { %v1695_v44 = vpop.f32.mrf.mxu0 }
 0x263   : > { %v2108_v42 = vpop.f32.mrf.mxu1 }
 0x264   : > { %v2247_v4 = vpack.c.bf16 %v2108_v42, %v2104_v61  ;;  %v1697_v5 = vpop.f32.mrf.mxu0  ;;  %v7848_v61 = vld [vmem:[%s10696_s6 + $0x234] ss:$8 sps:$4 sm:$0xff]  }
 0x265   : > { %v2110_v6 = vpop.f32.mrf.mxu1  ;;  %3846 = vmatprep.subr.bf16.mxu0 %v7848_v61  ;;  %v7871_v61 = vld [vmem:[%s10696_s6 + $0x2c4] ss:$8 sps:$4 sm:$0xff]  }
 0x266   : > { %v2248_v8 = vpack.c.bf16 %v2110_v6, %v2106_v3  ;;  %v1699_v1 = vpop.f32.mrf.mxu0  ;;  %v2317_v9 = vadd.bf16 %v9073_v19, %v2247_v4  ;;  %3847 = vmatpush1.bf16.msra.mxu0 %v7846_v60  ;;  %v7869_v60 = vld [vmem:[%s10696_s6 + $0x2c0] ss:$8 sps:$4 sm:$0xff]  }
 0x267   : > { %v1750_v10 = vpack.c.bf16 %v1699_v1, %v1695_v44 }
 0x268   : > { %v2318_v38 = vadd.bf16 %v9077_v7, %v2248_v8  ;;  %v1701_v58 = vpop.f32.mrf.mxu0  ;;  %v2349_v15 = vmax.bf16 %v8187_v2, %v2317_v9 }
 0x269   : > { %v1751_v13 = vpack.c.bf16 %v1701_v58, %v1697_v5  ;;  %v1820_v11 = vadd.bf16 %v8811_v35, %v1750_v10 }
 0x26a   : > { %v2350_v51 = vmax.bf16 %v8187_v2, %v2318_v38 }
 0x26b   : > { %v1821_v56 = vadd.bf16 %v8814_v59, %v1751_v13  ;;  %v1852_v17 = vmax.bf16 %v8187_v2, %v1820_v11  ;;  %v7850_v11 = vld [vmem:[%s10696_s6 + $0x220] ss:$8 sps:$4 sm:$0xff]  }
 0x26c   : > { %2622 = vmatprep.mubr.bf16.mxu0 %v2350_v51  ;;  %v7852_v51 = vld [vmem:[%s10696_s6 + $0x224] ss:$8 sps:$4 sm:$0xff]  }
 0x26d   : > { %2623 = vmatmul.mubr.bf16.gmra.mxu0 %v2349_v15  ;;  %v1853_v16 = vmax.bf16 %v8187_v2, %v1821_v56  ;;  %3848 = vmatprep.subr.bf16.mxu0 %v7852_v51  ;;  %v7854_v15 = vld [vmem:[%s10696_s6 + $0x210] ss:$8 sps:$4 sm:$0xff]  }
 0x26e   : > { %3849 = vmatpush1.bf16.msra.mxu0 %v7850_v11  ;;  %v7877_v11 = vld [vmem:[%s10696_s6 + $0x2a4] ss:$8 sps:$4 sm:$0xff]   ;;  %v7827_v51 = vld [vmem:[#allocation2 + $0x38] sm:$0xff]  }
 0x26f   : > { %2212 = vmatprep.mubr.bf16.mxu1 %v1853_v16  ;;  %v7856_v16 = vld [vmem:[%s10696_s6 + $0x214] ss:$8 sps:$4 sm:$0xff]  }
 0x270   : > { %2213 = vmatmul.mubr.bf16.gmra.mxu1 %v1852_v17  ;;  %3850 = vmatprep.subr.bf16.mxu0 %v7856_v16 }
 0x272   : > { %v2114_v0 = vpop.f32.mrf.mxu1  ;;  %3851 = vmatpush1.bf16.msra.mxu0 %v7854_v15 }
 0x274   : > { %v2116_v18 = vpop.f32.mrf.mxu1 }
 0x275   : > { %v1705_v21 = vpop.f32.mrf.mxu0 }
 0x276   : > { %v2118_v22 = vpop.f32.mrf.mxu1 }
 0x277   : > { %v2249_v24 = vpack.c.bf16 %v2118_v22, %v2114_v0  ;;  %v1707_v43 = vpop.f32.mrf.mxu0 }
 0x278   : > { %v2120_v36 = vpop.f32.mrf.mxu1 }
 0x279   : > { %v2250_v25 = vpack.c.bf16 %v2120_v36, %v2116_v18  ;;  %v1709_v62 = vpop.f32.mrf.mxu0  ;;  %v2319_v26 = vadd.bf16 %v9073_v19, %v2249_v24  ;;  %v7821_v24 = vld [vmem:[#allocation2 + $0x8] sm:$0xff]  }
 0x27a   : > { %v1752_v49 = vpack.c.bf16 %v1709_v62, %v1705_v21  ;;  %v7859_v36 = vld [vmem:[%s10696_s6 + $0x204] ss:$8 sps:$4 sm:$0xff]   ;;  %v7860_v62 = vld [vmem:[%s10696_s6 + $0x2f0] ss:$8 sps:$4 sm:$0xff]  }
 0x27b   : > { %v2320_v27 = vadd.bf16 %v9077_v7, %v2250_v25  ;;  %v1711_v28 = vpop.f32.mrf.mxu0  ;;  %v2351_v63 = vmax.bf16 %v8187_v2, %v2319_v26  ;;  %3852 = vmatprep.subr.bf16.mxu0 %v7859_v36  ;;  %v7862_v26 = vld [vmem:[%s10696_s6 + $0x2f4] ss:$8 sps:$4 sm:$0xff]  }
 0x27c   : > { %v1753_v40 = vpack.c.bf16 %v1711_v28, %v1707_v43  ;;  %v1822_v33 = vadd.bf16 %v8811_v35, %v1752_v49  ;;  %v7857_v43 = vld [vmem:[%s10696_s6 + $0x200] ss:$8 sps:$4 sm:$0xff]   ;;  %v7822_v49 = vld [vmem:[#allocation2 + $0x10] sm:$0xff]  }
 0x27d   : > { %v2352_v29 = vmax.bf16 %v8187_v2, %v2320_v27  ;;  %3853 = vmatpush1.bf16.msra.mxu0 %v7857_v43  ;;  %v7883_v43 = vld [vmem:[%s10696_s6 + $0x284] ss:$8 sps:$4 sm:$0xff]  }
 0x27e   : > { %v1823_v20 = vadd.bf16 %v8814_v59, %v1753_v40  ;;  %v1854_v32 = vmax.bf16 %v8187_v2, %v1822_v33  ;;  %3854 = vmatprep.subr.bf16.mxu0 %v7862_v26 }
 0x27f   : > { %2632 = vmatprep.mubr.bf16.mxu0 %v2352_v29 }
 0x280   : > { %2633 = vmatmul.mubr.bf16.gmra.mxu0 %v2351_v63  ;;  %v1855_v14 = vmax.bf16 %v8187_v2, %v1823_v20 }
 0x281   : > { %3855 = vmatpush2.bf16.msra.mxu0 %v7860_v62 }
 0x282   : > { %2222 = vmatprep.mubr.bf16.mxu1 %v1855_v14  ;;  %v7863_v14 = vld [vmem:[%s10696_s6 + $0x2e0] ss:$8 sps:$4 sm:$0xff]   ;;  %3856 = vmatprep.subr.bf16.mxu0 %v7865_v31 }
 0x283   : > { %2223 = vmatmul.mubr.bf16.gmra.mxu1 %v1854_v32 }
 0x285   : > { %v2124_v54 = vpop.f32.mrf.mxu1  ;;  %3857 = vmatpush2.bf16.msra.mxu0 %v7863_v14  ;;  %v7841_v14 = vld [vmem:[#allocation2 + $0x60] sm:$0xff]  }
 0x286   : > { %3858 = vmatprep.subr.bf16.mxu0 %v7868_v48 }
 0x287   : > { %v2126_v55 = vpop.f32.mrf.mxu1 }
 0x288   : > { %v1715_v50 = vpop.f32.mrf.mxu0 }
 0x289   : > { %v2128_v39 = vpop.f32.mrf.mxu1 }
 0x28a   : > { %v2251_v57 = vpack.c.bf16 %v2128_v39, %v2124_v54  ;;  %v1717_v52 = vpop.f32.mrf.mxu0  ;;  %v7866_v54 = vld [vmem:[%s10696_s6 + $0x2d0] ss:$8 sps:$4 sm:$0xff]  }
 0x28b   : > { %v2130_v3 = vpop.f32.mrf.mxu1  ;;  %3859 = vmatpush2.bf16.msra.mxu0 %v7866_v54 }
 0x28c   : > { %v2252_v44 = vpack.c.bf16 %v2130_v3, %v2126_v55  ;;  %v1719_v42 = vpop.f32.mrf.mxu0  ;;  %v2321_v4 = vadd.bf16 %v9073_v19, %v2251_v57  ;;  %v7824_v55 = vld [vmem:[#allocation2 + $0x20] sm:$0xff]   ;;  %3860 = vmatprep.subr.bf16.mxu0 %v7871_v61 }
 0x28d   : > { %v1754_v5 = vpack.c.bf16 %v1719_v42, %v1715_v50 }
 0x28e   : > { %v2322_v6 = vadd.bf16 %v9077_v7, %v2252_v44  ;;  %v1721_v8 = vpop.f32.mrf.mxu0  ;;  %v2353_v58 = vmax.bf16 %v8187_v2, %v2321_v4  ;;  %v7825_v44 = vld [vmem:[#allocation2 + $0x28] sm:$0xff]  }
 0x28f   : > { %v1755_v1 = vpack.c.bf16 %v1721_v8, %v1717_v52  ;;  %v1824_v9 = vadd.bf16 %v8811_v35, %v1754_v5  ;;  %3861 = vmatpush2.bf16.msra.mxu0 %v7869_v60  ;;  %v7849_v60 = vld [vmem:[#allocation2 + $0x70] sm:$0xff]  }
 0x290   : > { %v2354_v10 = vmax.bf16 %v8187_v2, %v2322_v6 }
 0x291   : > { %v1825_v38 = vadd.bf16 %v8814_v59, %v1755_v1  ;;  %v1856_v35 = vmax.bf16 %v8187_v2, %v1824_v9  ;;  %v7826_v1 = vld [vmem:[#allocation2 + $0x30] sm:$0xff]  }
 0x292   : > { %2642 = vmatprep.mubr.bf16.mxu0 %v2354_v10  ;;  %v7872_v9 = vld [vmem:[%s10696_s6 + $0x2b0] ss:$8 sps:$4 sm:$0xff]   ;;  %v7874_v10 = vld [vmem:[%s10696_s6 + $0x2b4] ss:$8 sps:$4 sm:$0xff]  }
 0x293   : > { %2643 = vmatmul.mubr.bf16.gmra.mxu0 %v2353_v58  ;;  %v1857_v13 = vmax.bf16 %v8187_v2, %v1825_v38  ;;  %3862 = vmatprep.subr.bf16.mxu0 %v7874_v10 }
 0x294   : > { %3863 = vmatpush2.bf16.msra.mxu0 %v7872_v9 }
 0x295   : > { %2232 = vmatprep.mubr.bf16.mxu1 %v1857_v13  ;;  %v7875_v13 = vld [vmem:[%s10696_s6 + $0x2a0] ss:$8 sps:$4 sm:$0xff]   ;;  %3864 = vmatprep.subr.bf16.mxu0 %v7877_v11 }
 0x296   : > { %2233 = vmatmul.mubr.bf16.gmra.mxu1 %v1856_v35 }
 0x297   : > { %3348 = vmatprep.mubr.bf16.mxu1 %v8187_v2 }
 0x298   : > { %v2134_v59 = vpop.f32.mrf.mxu1  ;;  %3865 = vmatpush2.bf16.msra.mxu0 %v7875_v13 }
 0x29a   : > { %v2136_v56 = vpop.f32.mrf.mxu1 }
 0x29c   : > { %v2138_v46 = vpop.f32.mrf.mxu1 }
 0x29d   : > { %v2253_v17 = vpack.c.bf16 %v2138_v46, %v2134_v59 }
 0x29e   : > { %v2140_v0 = vpop.f32.mrf.mxu1  ;;  %3349 = vmatmul.mubr.bf16.vlgmr.msra.gmra.mxu1 %v7820_v41 }
 0x29f   : > { %v2254_v47 = vpack.c.bf16 %v2140_v0, %v2136_v56  ;;  %3358 = vmatprep.mubr.bf16.mxu1 %v8187_v2  ;;  %v2323_v53 = vadd.bf16 %v9073_v19, %v2253_v17  ;;  %v7828_v17 = vld [vmem:[#allocation2 + $0x40] sm:$0xff]  }
 0x2a1   : > { %v2324_v18 = vadd.bf16 %v9077_v7, %v2254_v47  ;;  %v2355_v22 = vmax.bf16 %v8187_v2, %v2323_v53  ;;  %v7878_v47 = vld [vmem:[%s10696_s6 + $0x290] ss:$8 sps:$4 sm:$0xff]   ;;  %v7880_v53 = vld [vmem:[%s10696_s6 + $0x294] ss:$8 sps:$4 sm:$0xff]  }
 0x2a2   : > { %3866 = vmatprep.subr.bf16.mxu0 %v7880_v53 }
 0x2a3   : > { %v2356_v21 = vmax.bf16 %v8187_v2, %v2324_v18  ;;  %3867 = vmatpush2.bf16.msra.mxu0 %v7878_v47 }
 0x2a4   : > { %3868 = vmatprep.subr.bf16.mxu0 %v7883_v43  ;;  %v7887_v43 = vld [vmem:[%s10696_s6 + $0x360] ss:$8 sps:$4 sm:$0xff]  }
 0x2a5   : > { %2652 = vmatprep.mubr.bf16.mxu0 %v2356_v21  ;;  %v7829_v21 = vld [vmem:[#allocation2 + $0x48] sm:$0xff]  }
 0x2a6   : > { %2653 = vmatmul.mubr.bf16.gmra.mxu0 %v2355_v22  ;;  %3359 = vmatmul.mubr.bf16.gmra.mxu1 %v7821_v24  ;;  %v7881_v24 = vld [vmem:[%s10696_s6 + $0x280] ss:$8 sps:$4 sm:$0xff]  }
 0x2a7   : > { %3368 = vmatprep.mubr.bf16.mxu1 %v8187_v2  ;;  %3869 = vmatpush2.bf16.msra.mxu0 %v7881_v24 }
 0x2ab   : > { %v2144_v25 = vpop.f32.mrf.mxu1 }
 0x2ad   : > { %v2146_v27 = vpop.f32.mrf.mxu1 }
 0x2ae   : > { %3369 = vmatmul.mubr.bf16.gmra.mxu1 %v7822_v49 }
 0x2af   : > { %v2148_v28 = vpop.f32.mrf.mxu1  ;;  %3378 = vmatprep.mubr.bf16.mxu1 %v8187_v2 }
 0x2b0   : > { %v2255_v40 = vpack.c.bf16 %v2148_v28, %v2144_v25 }
 0x2b1   : > { %v2150_v33 = vpop.f32.mrf.mxu1 }
 0x2b2   : > { %v2256_v29 = vpack.c.bf16 %v2150_v33, %v2146_v27  ;;  %v2325_v20 = vadd.bf16 %v9073_v19, %v2255_v40  ;;  %v7833_v27 = vld [vmem:[#allocation2 + $0x50] sm:$0xff]  }
 0x2b4   : > { %v2326_v63 = vadd.bf16 %v9077_v7, %v2256_v29  ;;  %v2357_v32 = vmax.bf16 %v8187_v2, %v2325_v20  ;;  %v7837_v29 = vld [vmem:[#allocation2 + $0x58] sm:$0xff]  }
 0x2b6   : > { %3379 = vmatmul.mubr.bf16.gmra.mxu1 %v7823_v30  ;;  %v2358_v45 = vmax.bf16 %v8187_v2, %v2326_v63 }
 0x2b7   : > { %3388 = vmatprep.mubr.bf16.mxu1 %v8187_v2 }
 0x2b8   : > { %2662 = vmatprep.mubr.bf16.mxu0 %v2358_v45 }
 0x2b9   : > { %2663 = vmatmul.mubr.bf16.gmra.mxu0 %v2357_v32 }
 0x2be   : > { %v2154_v50 = vpop.f32.mrf.mxu1  ;;  %3389 = vmatmul.mubr.bf16.gmra.mxu1 %v7824_v55 }
 0x2bf   : > { %3398 = vmatprep.mubr.bf16.mxu1 %v8187_v2 }
 0x2c0   : > { %v2156_v39 = vpop.f32.mrf.mxu1 }
 0x2c2   : > { %v2158_v57 = vpop.f32.mrf.mxu1 }
 0x2c3   : > { %v2257_v52 = vpack.c.bf16 %v2158_v57, %v2154_v50 }
 0x2c4   : > { %v2160_v3 = vpop.f32.mrf.mxu1 }
 0x2c5   : > { %v2258_v42 = vpack.c.bf16 %v2160_v3, %v2156_v39  ;;  %v2327_v4 = vadd.bf16 %v9073_v19, %v2257_v52  ;;  %v7845_v39 = vld [vmem:[#allocation2 + $0x68] sm:$0xff]  }
 0x2c6   : > { %3399 = vmatmul.mubr.bf16.gmra.mxu1 %v7825_v44 }
 0x2c7   : > { %v2328_v5 = vadd.bf16 %v9077_v7, %v2258_v42  ;;  %3408 = vmatprep.mubr.bf16.mxu1 %v8187_v2  ;;  %v2359_v8 = vmax.bf16 %v8187_v2, %v2327_v4 }
 0x2c9   : > { %v2360_v6 = vmax.bf16 %v8187_v2, %v2328_v5 }
 0x2cb   : > { %2672 = vmatprep.mubr.bf16.mxu0 %v2360_v6  ;;  %v7853_v6 = vld [vmem:[#allocation2 + $0x78] sm:$0xff]  }
 0x2cc   : > { %2673 = vmatmul.mubr.bf16.gmra.mxu0 %v2359_v8 }
 0x2ce   : > { %3409 = vmatmul.mubr.bf16.gmra.mxu1 %v7826_v1 }
 0x2cf   : > { %3418 = vmatprep.mubr.bf16.mxu1 %v8187_v2 }
 0x2d1   : > { %v2164_v38 = vpop.f32.mrf.mxu1 }
 0x2d3   : > { %v2166_v58 = vpop.f32.mrf.mxu1 }
 0x2d5   : > { %v2168_v35 = vpop.f32.mrf.mxu1 }
 0x2d6   : > { %v2259_v59 = vpack.c.bf16 %v2168_v35, %v2164_v38  ;;  %3419 = vmatmul.mubr.bf16.gmra.mxu1 %v7827_v51 }
 0x2d7   : > { %v2170_v56 = vpop.f32.mrf.mxu1  ;;  %3428 = vmatprep.mubr.bf16.mxu1 %v8187_v2 }
 0x2d8   : > { %v2260_v15 = vpack.c.bf16 %v2170_v56, %v2166_v58  ;;  %v2329_v16 = vadd.bf16 %v9073_v19, %v2259_v59 }
 0x2da   : > { %v2330_v46 = vadd.bf16 %v9077_v7, %v2260_v15  ;;  %v2361_v0 = vmax.bf16 %v8187_v2, %v2329_v16 }
 0x2dc   : > { %v2362_v41 = vmax.bf16 %v8187_v2, %v2330_v46 }
 0x2de   : > { %2682 = vmatprep.mubr.bf16.mxu0 %v2362_v41  ;;  %3429 = vmatmul.mubr.bf16.gmra.mxu1 %v7828_v17 }
 0x2df   : > { %2683 = vmatmul.mubr.bf16.gmra.mxu0 %v2361_v0  ;;  %3438 = vmatprep.mubr.bf16.mxu1 %v8187_v2 }
 0x2e4   : > { %v2174_v18 = vpop.f32.mrf.mxu1 }
 0x2e6   : > { %v2176_v22 = vpop.f32.mrf.mxu1  ;;  %3439 = vmatmul.mubr.bf16.gmra.mxu1 %v7829_v21  ;;  %v7884_v21 = vld [vmem:[%s10696_s6 + $0x370] ss:$8 sps:$4 sm:$0xff]  }
 0x2e7   : > { %3448 = vmatprep.mubr.bf16.mxu1 %v8187_v2 }
 0x2e8   : > { %v2178_v36 = vpop.f32.mrf.mxu1 }
 0x2e9   : > { %v2261_v25 = vpack.c.bf16 %v2178_v36, %v2174_v18  ;;  %v7889_v36 = vld [vmem:[%s10696_s6 + $0x364] ss:$8 sps:$4 sm:$0xff]  }
 0x2ea   : > { %v2180_v62 = vpop.f32.mrf.mxu1 }
 0x2eb   : > { %v2262_v26 = vpack.c.bf16 %v2180_v62, %v2176_v22  ;;  %v2331_v49 = vadd.bf16 %v9073_v19, %v2261_v25  ;;  %v7886_v22 = vld [vmem:[%s10696_s6 + $0x374] ss:$8 sps:$4 sm:$0xff]  }
 0x2ec   : > { %4359 = vmatprep.subr.bf16.mxu1 %v7886_v22 }
 0x2ed   : > { %v2332_v28 = vadd.bf16 %v9077_v7, %v2262_v26  ;;  %v2363_v33 = vmax.bf16 %v8187_v2, %v2331_v49  ;;  %4360 = vmatpush1.bf16.msra.mxu1 %v7884_v21 }
 0x2ee   : > { %3449 = vmatmul.mubr.bf16.gmra.mxu1 %v7833_v27  ;;  %4361 = vmatprep.subr.bf16.mxu1 %v7889_v36 }
 0x2ef   : > { %v2364_v40 = vmax.bf16 %v8187_v2, %v2332_v28  ;;  %3458 = vmatprep.mubr.bf16.mxu1 %v8187_v2 }
 0x2f1   : > { %2692 = vmatprep.mubr.bf16.mxu0 %v2364_v40  ;;  %4362 = vmatpush1.bf16.msra.mxu1 %v7887_v43 }
 0x2f2   : > { %2693 = vmatmul.mubr.bf16.gmra.mxu0 %v2363_v33 }
 0x2f6   : > { %3459 = vmatmul.mubr.bf16.gmra.mxu1 %v7837_v29  ;;  %v7893_v29 = vld [vmem:[%s10698_s8 + $0x78] sm:$0xff]  }
 0x2f7   : > { %v2184_v20 = vpop.f32.mrf.mxu1  ;;  %3468 = vmatprep.mubr.bf16.mxu1 %v8187_v2  ;;  %7336 = vmatprep.subr.bf16.mxu0 %v7893_v29  ;;  %v7899_v29 = vld [vmem:[%s10698_s8 + $0x30] sm:$0xff]  }
 0x2f9   : > { %v2186_v63 = vpop.f32.mrf.mxu1 }
 0x2fb   : > { %v2188_v30 = vpop.f32.mrf.mxu1 }
 0x2fc   : > { %v2263_v45 = vpack.c.bf16 %v2188_v30, %v2184_v20  ;;  %v7892_v30 = vld [vmem:[%s10696_s6 + $0x354] ss:$8 sps:$4 sm:$0xff]  }
 0x2fd   : > { %v2190_v31 = vpop.f32.mrf.mxu1  ;;  %4363 = vmatprep.subr.bf16.mxu1 %v7892_v30 }
 0x2fe   : > { %v2264_v32 = vpack.c.bf16 %v2190_v31, %v2186_v63  ;;  %3469 = vmatmul.mubr.bf16.gmra.mxu1 %v7841_v14  ;;  %v2333_v48 = vadd.bf16 %v9073_v19, %v2263_v45  ;;  %v7890_v63 = vld [vmem:[%s10696_s6 + $0x350] ss:$8 sps:$4 sm:$0xff]   ;;  %v6943_v31 = vld.sshfl [vmem:[%s10695_s5] sm:$0x11 pattern:$0x75316420] }
 0x2ff   : > { %3478 = vmatprep.mubr.bf16.mxu1 %v8187_v2  ;;  %4364 = vmatpush1.bf16.msra.mxu1 %v7890_v63 }
 0x300   : > { %v2334_v54 = vadd.bf16 %v9077_v7, %v2264_v32  ;;  %v2365_v50 = vmax.bf16 %v8187_v2, %v2333_v48  ;;  %v7898_v32 = vld [vmem:[%s10696_s6 + $0x344] ss:$8 sps:$4 sm:$0xff]   ;;  %v7896_v48 = vld [vmem:[%s10696_s6 + $0x340] ss:$8 sps:$4 sm:$0xff]  }
 0x301   : > { %4365 = vmatprep.subr.bf16.mxu1 %v7898_v32 }
 0x302   : > { %v2366_v55 = vmax.bf16 %v8187_v2, %v2334_v54  ;;  %v3550_v54 = vcombine.high %v6943_v31, %v6943_v31 }
 0x303   : > { %4366 = vmatpush1.bf16.msra.mxu1 %v7896_v48 }
 0x304   : > { %2702 = vmatprep.mubr.bf16.mxu0 %v2366_v55 }
 0x305   : > { %2703 = vmatmul.mubr.bf16.gmra.mxu0 %v2365_v50 }
 0x306   : > { %3479 = vmatmul.mubr.bf16.gmra.mxu1 %v7845_v39  ;;  %v3557_v39 = vrot.slane %v6943_v31, %v8787_v23 }
 0x307   : > { %3488 = vmatprep.mubr.bf16.mxu1 %v8187_v2 }
 0x30a   : > { %v2194_v57 = vpop.f32.mrf.mxu1 }
 0x30c   : > { %v2196_v52 = vpop.f32.mrf.mxu1 }
 0x30e   : > { %v2198_v61 = vpop.f32.mrf.mxu1  ;;  %3489 = vmatmul.mubr.bf16.gmra.mxu1 %v7849_v60 }
 0x30f   : > { %v2265_v3 = vpack.c.bf16 %v2198_v61, %v2194_v57  ;;  %3498 = vmatprep.mubr.bf16.mxu1 %v8187_v2  ;;  %v3564_v57 = vrot.slane %v3550_v54, %v8787_v23  ;;  %v7903_v61 = vld [vmem:[%s10696_s6 + $0x330] ss:$8 sps:$4 sm:$0xff]   ;;  %v7901_v54 = vld [vmem:[%s10698_s8 + $0x28] sm:$0xff]  }
 0x310   : > { %v2200_v44 = vpop.f32.mrf.mxu1 }
 0x311   : > { %v2266_v42 = vpack.c.bf16 %v2200_v44, %v2196_v52  ;;  %v2335_v4 = vadd.bf16 %v9073_v19, %v2265_v3  ;;  %v9289_v14 = vpop.f32.mrf.mxu0  ;;  %v7905_v3 = vld [vmem:[%s10696_s6 + $0x334] ss:$8 sps:$4 sm:$0xff]  }
 0x312   : > { %4367 = vmatprep.subr.bf16.mxu1 %v7905_v3 }
 0x313   : > { %v2336_v5 = vadd.bf16 %v9077_v7, %v2266_v42  ;;  %v2367_v1 = vmax.bf16 %v8187_v2, %v2335_v4  ;;  %v9300_v55 = vpop.f32.mrf.mxu0  ;;  %v3566_v42 = vshrl.u32 %v3557_v39, 16  ;;  %4368 = vmatpush1.bf16.msra.mxu1 %v7903_v61 }
 0x315   : > { %v2368_v8 = vmax.bf16 %v8187_v2, %v2336_v5  ;;  %v9304_v52 = vpop.f32.mrf.mxu0  ;;  %v3574_v5 = vshrl.u32 %v3564_v57, 16 }
 0x316   : > { %3499 = vmatmul.mubr.bf16.gmra.mxu1 %v7853_v6 }
 0x317   : > { %2712 = vmatprep.mubr.bf16.mxu0 %v2368_v8  ;;  %v9312_v6 = vpop.f32.mrf.mxu0 }
 0x318   : > { %2713 = vmatmul.mubr.bf16.gmra.mxu0 %v2367_v1 }
 0x31d   : > { %v2204_v9 = vpop.f32.mrf.mxu1 }
 0x31f   : > { %v2206_v10 = vpop.f32.mrf.mxu1 }
 0x321   : > { %v2208_v38 = vpop.f32.mrf.mxu1 }
 0x322   : > { %v2267_v58 = vpack.c.bf16 %v2208_v38, %v2204_v9  ;;  %v3567_v38 = vpack.i.b16 %v3566_v42, %v3566_v42  ;;  %v7923_v42 = vld [vmem:[%s10696_s6 + $0x304] ss:$8 sps:$4 sm:$0xff]  }
 0x323   : > { %v2210_v13 = vpop.f32.mrf.mxu1 }
 0x324   : > { %v2268_v11 = vpack.c.bf16 %v2210_v13, %v2206_v10  ;;  %v2337_v51 = vadd.bf16 %v9073_v19, %v2267_v58  ;;  %v3575_v13 = vpack.i.b16 %v3574_v5, %v3574_v5  ;;  %v7906_v5 = vld [vmem:[%s10698_s8 + $0x20] sm:$0xff]  }
 0x326   : > { %v2338_v35 = vadd.bf16 %v9077_v7, %v2268_v11  ;;  %v2369_v56 = vmax.bf16 %v8187_v2, %v2337_v51  ;;  %v9316_v11 = vpop.f32.mrf.mxu0 }
 0x328   : > { %v2370_v59 = vmax.bf16 %v8187_v2, %v2338_v35 }
 0x32a   : > { %2722 = vmatprep.mubr.bf16.mxu0 %v2370_v59  ;;  %v7910_v59 = vld [vmem:[%s10696_s6 + $0x320] ss:$8 sps:$4 sm:$0xff]  }
 0x32b   : > { %2723 = vmatmul.mubr.bf16.gmra.mxu0 %v2369_v56  ;;  %v7912_v56 = vld [vmem:[%s10696_s6 + $0x324] ss:$8 sps:$4 sm:$0xff]  }
 0x32c   : > { %4369 = vmatprep.subr.bf16.mxu1 %v7912_v56 }
 0x32d   : > { %4370 = vmatpush1.bf16.msra.mxu1 %v7910_v59  ;;  %v7908_v59 = vld [vmem:[%s10698_s8 + $0x18] sm:$0xff]  }
 0x330   : > { %v2214_v15 = vpop.f32.mrf.mxu1 }
 0x332   : > { %v2216_v16 = vpop.f32.mrf.mxu1 }
 0x334   : > { %v2218_v46 = vpop.f32.mrf.mxu1 }
 0x335   : > { %v2269_v41 = vpack.c.bf16 %v2218_v46, %v2214_v15  ;;  %v9330_v46 = vrot.slane %v3575_v13, %v8795_v34  ;;  %v7924_v13 = vld [vmem:[%s10696_s6 + $0x3f0] ss:$8 sps:$4 sm:$0xff]  }
 0x336   : > { %v2220_v17 = vpop.f32.mrf.mxu1 }
 0x337   : > { %v2270_v0 = vpack.c.bf16 %v2220_v17, %v2216_v16  ;;  %v2339_v47 = vadd.bf16 %v9073_v19, %v2269_v41  ;;  %v9327_v16 = vrot.slane %v3567_v38, %v8795_v34  ;;  %v9332_v41 = vpop.f32.mrf.mxu0  ;;  %v7907_v38 = vld [vmem:[%s10698_s8 + $0x58] sm:$0xff]  }
 0x339   : > { %v2340_v53 = vadd.bf16 %v9077_v7, %v2270_v0  ;;  %v2371_v24 = vmax.bf16 %v8187_v2, %v2339_v47  ;;  %v7917_v47 = vld [vmem:[%s10696_s6 + $0x310] ss:$8 sps:$4 sm:$0xff]  }
 0x33b   : > { %v2372_v18 = vmax.bf16 %v8187_v2, %v2340_v53  ;;  %v7919_v53 = vld [vmem:[%s10696_s6 + $0x314] ss:$8 sps:$4 sm:$0xff]  }
 0x33c   : > { %4371 = vmatprep.subr.bf16.mxu1 %v7919_v53 }
 0x33d   : > { %2732 = vmatprep.mubr.bf16.mxu0 %v2372_v18  ;;  %4372 = vmatpush1.bf16.msra.mxu1 %v7917_v47 }
 0x33e   : > { %2733 = vmatmul.mubr.bf16.gmra.mxu0 %v2371_v24  ;;  %v9342_v24 = vpop.f32.mrf.mxu0  ;;  %4373 = vmatprep.subr.bf16.mxu1 %v7923_v42 }
 0x343   : > { %v2224_v25 = vpop.f32.mrf.mxu1 }
 0x345   : > { %v2226_v62 = vpop.f32.mrf.mxu1 }
 0x347   : > { %v2228_v26 = vpop.f32.mrf.mxu1 }
 0x348   : > { %v2271_v49 = vpack.c.bf16 %v2228_v26, %v2224_v25  ;;  %v7894_v25 = vld [vmem:[%s10698_s8 + $0x38] sm:$0xff]  }
 0x349   : > { %v2230_v27 = vpop.f32.mrf.mxu1 }
 0x34a   : > { %v2272_v28 = vpack.c.bf16 %v2230_v27, %v2226_v62  ;;  %v2341_v40 = vadd.bf16 %v9073_v19, %v2271_v49  ;;  %v7895_v49 = vld [vmem:[%s10698_s8 + $0x70] sm:$0xff]  }
 0x34c   : > { %v2342_v33 = vadd.bf16 %v9077_v7, %v2272_v28  ;;  %v2373_v45 = vmax.bf16 %v8187_v2, %v2341_v40  ;;  %v9352_v28 = vpop.f32.mrf.mxu0 }
 0x34e   : > { %v2374_v20 = vmax.bf16 %v8187_v2, %v2342_v33 }
 0x350   : > { %2742 = vmatprep.mubr.bf16.mxu0 %v2374_v20  ;;  %v9357_v20 = vpop.f32.mrf.mxu0 }
 0x351   : > { %2743 = vmatmul.mubr.bf16.gmra.mxu0 %v2373_v45  ;;  %v7900_v45 = vld [vmem:[%s10698_s8 + $0x68] sm:$0xff]  }
 0x356   : > { %v2234_v50 = vpop.f32.mrf.mxu1 }
 0x358   : > { %v2236_v60 = vpop.f32.mrf.mxu1 }
 0x35a   : > { %v2238_v44 = vpop.f32.mrf.mxu1 }
 0x35b   : > { %v2273_v4 = vpack.c.bf16 %v2238_v44, %v2234_v50  ;;  %v9368_v50 = vpop.f32.mrf.mxu0  ;;  %v7921_v44 = vld [vmem:[%s10696_s6 + $0x300] ss:$8 sps:$4 sm:$0xff]  }
 0x35c   : > { %v2240_v8 = vpop.f32.mrf.mxu1  ;;  %4374 = vmatpush1.bf16.msra.mxu1 %v7921_v44 }
 0x35d   : > { %v2274_v1 = vpack.c.bf16 %v2240_v8, %v2236_v60  ;;  %v2343_v9 = vadd.bf16 %v9073_v19, %v2273_v4  ;;  %v7902_v60 = vld [vmem:[%s10698_s8 + $0x60] sm:$0xff]   ;;  %v7926_v8 = vld [vmem:[%s10696_s6 + $0x3f4] ss:$8 sps:$4 sm:$0xff]  }
 0x35e   : > { %v3350_v10 = vpop.f32.mrf.mxu1  ;;  %4375 = vmatprep.subr.bf16.mxu1 %v7926_v8 }
 0x35f   : > { %v2344_v58 = vadd.bf16 %v9077_v7, %v2274_v1  ;;  %v2375_v19 = vmax.bf16 %v8187_v2, %v2343_v9  ;;  %v9386_v1 = vpop.f32.mrf.mxu0 }
 0x360   : > { %v3352_v51 = vpop.f32.mrf.mxu1  ;;  %4376 = vmatpush2.bf16.msra.mxu1 %v7924_v13 }
 0x361   : > { %v2376_v35 = vmax.bf16 %v8187_v2, %v2344_v58  ;;  %v9400_v56 = vpop.f32.mrf.mxu0 }
 0x362   : > { %v3354_v15 = vpop.f32.mrf.mxu1 }
 0x363   : > { %v3509_v7 = vpack.c.bf16 %v3354_v15, %v3350_v10  ;;  %2752 = vmatprep.mubr.bf16.mxu0 %v2376_v35 }
 0x364   : > { %2753 = vmatmul.mubr.bf16.gmra.mxu0 %v2375_v19  ;;  %v3356_v17 = vpop.f32.mrf.mxu1 }
 0x365   : > { %v3510_v0 = vpack.c.bf16 %v3356_v17, %v3352_v51  ;;  %v3581_v18 = vadd.bf16 %v9327_v16, %v3509_v7  ;;  %v7909_v7 = vld [vmem:[%s10698_s8 + $0x50] sm:$0xff]  }
 0x366   : > { %v3360_v21 = vpop.f32.mrf.mxu1 }
 0x367   : > { %v3582_v22 = vadd.bf16 %v9330_v46, %v3510_v0  ;;  %v3613_v62 = vmax.bf16 %v8187_v2, %v3581_v18  ;;  %v9406_v0 = vpop.f32.mrf.mxu0  ;;  %v7913_v18 = vld [vmem:[%s10698_s8 + $0x10] sm:$0xff]  }
 0x368   : > { %v3362_v43 = vpop.f32.mrf.mxu1 }
 0x369   : > { %v3614_v36 = vmax.bf16 %v8187_v2, %v3582_v22 }
 0x36a   : > { %v3364_v26 = vpop.f32.mrf.mxu1 }
 0x36b   : > { %v3511_v27 = vpack.c.bf16 %v3364_v26, %v3360_v21  ;;  %3870 = vmatprep.mubr.bf16.mxu0 %v3614_v36  ;;  %v7927_v26 = vld [vmem:[%s10696_s6 + $0x3e0] ss:$8 sps:$4 sm:$0xff]  }
 0x36c   : > { %v3366_v40 = vpop.f32.mrf.mxu1  ;;  %3871 = vmatmul.mubr.bf16.vlgmr.msra.gmra.mxu0 %v3613_v62 }
 0x36d   : > { %v3512_v33 = vpack.c.bf16 %v3366_v40, %v3362_v43  ;;  %7337 = vmatpush3.bf16.msra.mxu0 %v7894_v25  ;;  %v3583_v63 = vadd.bf16 %v9327_v16, %v3511_v27  ;;  %v7914_v43 = vld [vmem:[%s10698_s8 + $0x48] sm:$0xff]   ;;  %v9416_v25 = vpop.f32.mrf.mxu0 }
 0x36e   : > { %v3370_v30 = vpop.f32.mrf.mxu1  ;;  %7338 = vmatprep.subr.bf16.mxu0 %v7895_v49  ;;  %v7929_v49 = vld [vmem:[%s10696_s6 + $0x3e4] ss:$8 sps:$4 sm:$0xff]  }
 0x36f   : > { %v3584_v31 = vadd.bf16 %v9330_v46, %v3512_v33  ;;  %v3615_v39 = vmax.bf16 %v8187_v2, %v3583_v63  ;;  %v7915_v40 = vld [vmem:[%s10698_s8 + $0x8] sm:$0xff]   ;;  %v7916_v63 = vld [vmem:[%s10698_s8 + $0x40] sm:$0xff]   ;;  %4377 = vmatprep.subr.bf16.mxu1 %v7929_v49 }
 0x370   : > { %v3372_v32 = vpop.f32.mrf.mxu1  ;;  %4378 = vmatpush2.bf16.msra.mxu1 %v7927_v26 }
 0x371   : > { %v3616_v48 = vmax.bf16 %v8187_v2, %v3584_v31  ;;  %7339 = vmatpush3.bf16.msra.mxu0 %v7899_v29 }
 0x372   : > { %v3374_v57 = vpop.f32.mrf.mxu1  ;;  %7340 = vmatprep.subr.bf16.mxu0 %v7900_v45  ;;  %v9432_v45 = vpop.f32.mrf.mxu0 }
 0x373   : > { %v3513_v61 = vpack.c.bf16 %v3374_v57, %v3370_v30  ;;  %3880 = vmatprep.mubr.bf16.mxu0 %v3616_v48  ;;  %v7920_v48 = vld [vmem:[%s10698_s8] sm:$0xff]  }
 0x374   : > { %v3376_v3 = vpop.f32.mrf.mxu1  ;;  %3881 = vmatmul.mubr.bf16.gmra.mxu0 %v3615_v39 }
 0x375   : > { %v3514_v4 = vpack.c.bf16 %v3376_v3, %v3372_v32  ;;  %7341 = vmatpush3.bf16.msra.mxu0 %v7901_v54  ;;  %v3585_v9 = vadd.bf16 %v9327_v16, %v3513_v61  ;;  %v7932_v61 = vld [vmem:[%s10696_s6 + $0x3d4] ss:$8 sps:$4 sm:$0xff]   ;;  %v9445_v3 = vpop.f32.mrf.mxu0 }
 0x376   : > { %v3380_v10 = vpop.f32.mrf.mxu1  ;;  %7342 = vmatprep.subr.bf16.mxu0 %v7902_v60  ;;  %v7930_v60 = vld [vmem:[%s10696_s6 + $0x3d0] ss:$8 sps:$4 sm:$0xff]   ;;  %4379 = vmatprep.subr.bf16.mxu1 %v7932_v61 }
 0x377   : > { %v3586_v58 = vadd.bf16 %v9330_v46, %v3514_v4  ;;  %v3617_v19 = vmax.bf16 %v8187_v2, %v3585_v9  ;;  %v9448_v4 = vpop.f32.mrf.mxu0  ;;  %4380 = vmatpush2.bf16.msra.mxu1 %v7930_v60 }
 0x378   : > { %v3382_v51 = vpop.f32.mrf.mxu1 }
 0x379   : > { %v3618_v35 = vmax.bf16 %v8187_v2, %v3586_v58  ;;  %7343 = vmatpush3.bf16.msra.mxu0 %v7906_v5  ;;  %v9451_v58 = vpop.f32.mrf.mxu0 }
 0x37a   : > { %v3384_v15 = vpop.f32.mrf.mxu1  ;;  %7344 = vmatprep.subr.bf16.mxu0 %v7907_v38 }
 0x37b   : > { %v3515_v17 = vpack.c.bf16 %v3384_v15, %v3380_v10  ;;  %3890 = vmatprep.mubr.bf16.mxu0 %v3618_v35  ;;  %v7933_v15 = vld [vmem:[%s10696_s6 + $0x3c0] ss:$8 sps:$4 sm:$0xff]  }
 0x37c   : > { %v3386_v47 = vpop.f32.mrf.mxu1  ;;  %3891 = vmatmul.mubr.bf16.gmra.mxu0 %v3617_v19 }
 0x37d   : > { %v3516_v53 = vpack.c.bf16 %v3386_v47, %v3382_v51  ;;  %7345 = vmatpush3.bf16.msra.mxu0 %v7908_v59  ;;  %v3587_v21 = vadd.bf16 %v9327_v16, %v3515_v17  ;;  %v9462_v17 = vpop.f32.mrf.mxu0 }
 0x37e   : > { %v3390_v22 = vpop.f32.mrf.mxu1  ;;  %7346 = vmatprep.subr.bf16.mxu0 %v7909_v7  ;;  %v7935_v7 = vld [vmem:[%s10696_s6 + $0x3c4] ss:$8 sps:$4 sm:$0xff]  }
 0x37f   : > { %v3588_v36 = vadd.bf16 %v9330_v46, %v3516_v53  ;;  %v3619_v33 = vmax.bf16 %v8187_v2, %v3587_v21  ;;  %4381 = vmatprep.subr.bf16.mxu1 %v7935_v7 }
 0x380   : > { %v3392_v62 = vpop.f32.mrf.mxu1  ;;  %4382 = vmatpush2.bf16.msra.mxu1 %v7933_v15 }
 0x381   : > { %v3620_v27 = vmax.bf16 %v8187_v2, %v3588_v36  ;;  %7347 = vmatpush3.bf16.msra.mxu0 %v7913_v18 }
 0x382   : > { %v3394_v29 = vpop.f32.mrf.mxu1  ;;  %7348 = vmatprep.subr.bf16.mxu0 %v7914_v43  ;;  %v9465_v43 = vpop.f32.mrf.mxu0 }
 0x383   : > { %v3517_v30 = vpack.c.bf16 %v3394_v29, %v3390_v22  ;;  %3900 = vmatprep.mubr.bf16.mxu0 %v3620_v27 }
 0x384   : > { %v3396_v31 = vpop.f32.mrf.mxu1  ;;  %3901 = vmatmul.mubr.bf16.gmra.mxu0 %v3619_v33  ;;  %v9469_v49 = vpop.f32.mrf.mxu0 }
 0x385   : > { %v3518_v32 = vpack.c.bf16 %v3396_v31, %v3392_v62  ;;  %7349 = vmatpush3.bf16.msra.mxu0 %v7915_v40  ;;  %v3589_v54 = vadd.bf16 %v9327_v16, %v3517_v30  ;;  %v7938_v30 = vld [vmem:[%s10696_s6 + $0x3b4] ss:$8 sps:$4 sm:$0xff]  }
 0x386   : > { %v3400_v39 = vpop.f32.mrf.mxu1  ;;  %7350 = vmatprep.subr.bf16.mxu0 %v7916_v63  ;;  %v7936_v63 = vld [vmem:[%s10696_s6 + $0x3b0] ss:$8 sps:$4 sm:$0xff]   ;;  %4383 = vmatprep.subr.bf16.mxu1 %v7938_v30 }
 0x387   : > { %v3590_v57 = vadd.bf16 %v9330_v46, %v3518_v32  ;;  %v3621_v5 = vmax.bf16 %v8187_v2, %v3589_v54  ;;  %v9479_v32 = vpop.f32.mrf.mxu0  ;;  %4384 = vmatpush2.bf16.msra.mxu1 %v7936_v63 }
 0x388   : > { %v3402_v44 = vpop.f32.mrf.mxu1 }
 0x389   : > { %v3622_v42 = vmax.bf16 %v8187_v2, %v3590_v57  ;;  %7351 = vmatpush3.bf16.msra.mxu0 %v7920_v48  ;;  %v7941_v57 = vld [vmem:[%s10696_s6 + $0x3a4] ss:$8 sps:$4 sm:$0xff]  }
 0x38a   : > { %v3404_v8 = vpop.f32.mrf.mxu1  ;;  %4385 = vmatprep.subr.bf16.mxu1 %v7941_v57 }
 0x38b   : > { %v3519_v9 = vpack.c.bf16 %v3404_v8, %v3400_v39  ;;  %3910 = vmatprep.mubr.bf16.mxu0 %v3622_v42  ;;  %v7939_v39 = vld [vmem:[%s10696_s6 + $0x3a0] ss:$8 sps:$4 sm:$0xff]   ;;  %v9489_v42 = vpop.f32.mrf.mxu0 }
 0x38c   : > { %v3406_v10 = vpop.f32.mrf.mxu1  ;;  %3911 = vmatmul.mubr.bf16.gmra.mxu0 %v3621_v5  ;;  %4386 = vmatpush2.bf16.msra.mxu1 %v7939_v39 }
 0x38d   : > { %v3520_v38 = vpack.c.bf16 %v3406_v10, %v3402_v44  ;;  %v3591_v13 = vadd.bf16 %v9327_v16, %v3519_v9 }
 0x38e   : > { %v3410_v51 = vpop.f32.mrf.mxu1 }
 0x38f   : > { %v3592_v35 = vadd.bf16 %v9330_v46, %v3520_v38  ;;  %v3623_v47 = vmax.bf16 %v8187_v2, %v3591_v13  ;;  %v9493_v13 = vpop.f32.mrf.mxu0 }
 0x390   : > { %v3412_v59 = vpop.f32.mrf.mxu1 }
 0x391   : > { %v3624_v19 = vmax.bf16 %v8187_v2, %v3592_v35 }
 0x392   : > { %v3414_v53 = vpop.f32.mrf.mxu1 }
 0x393   : > { %v3521_v18 = vpack.c.bf16 %v3414_v53, %v3410_v51  ;;  %3920 = vmatprep.mubr.bf16.mxu0 %v3624_v19 }
 0x394   : > { %v3416_v21 = vpop.f32.mrf.mxu1  ;;  %3921 = vmatmul.mubr.bf16.gmra.mxu0 %v3623_v47 }
 0x395   : > { %v3522_v22 = vpack.c.bf16 %v3416_v21, %v3412_v59  ;;  %v3593_v36 = vadd.bf16 %v9327_v16, %v3521_v18  ;;  %v9495_v59 = vpop.f32.mrf.mxu0 }
 0x396   : > { %v3420_v62 = vpop.f32.mrf.mxu1 }
 0x397   : > { %v3594_v26 = vadd.bf16 %v9330_v46, %v3522_v22  ;;  %v3625_v33 = vmax.bf16 %v8187_v2, %v3593_v36  ;;  %v9500_v18 = vpop.f32.mrf.mxu0 }
 0x398   : > { %v3422_v27 = vpop.f32.mrf.mxu1 }
 0x399   : > { %v3626_v40 = vmax.bf16 %v8187_v2, %v3594_v26 }
 0x39a   : > { %v3424_v29 = vpop.f32.mrf.mxu1 }
 0x39b   : > { %v3523_v31 = vpack.c.bf16 %v3424_v29, %v3420_v62  ;;  %3930 = vmatprep.mubr.bf16.mxu0 %v3626_v40  ;;  %v7944_v40 = vld [vmem:[%s10696_s6 + $0x394] ss:$8 sps:$4 sm:$0xff]  }
 0x39c   : > { %v3426_v48 = vpop.f32.mrf.mxu1  ;;  %3931 = vmatmul.mubr.bf16.gmra.mxu0 %v3625_v33  ;;  %v9509_v33 = vpop.f32.mrf.mxu0  ;;  %4387 = vmatprep.subr.bf16.mxu1 %v7944_v40 }
 0x39d   : > { %v3524_v54 = vpack.c.bf16 %v3426_v48, %v3422_v27  ;;  %v3595_v60 = vadd.bf16 %v9327_v16, %v3523_v31  ;;  %v7942_v27 = vld [vmem:[%s10696_s6 + $0x390] ss:$8 sps:$4 sm:$0xff]  }
 0x39e   : > { %v3430_v61 = vpop.f32.mrf.mxu1  ;;  %4388 = vmatpush2.bf16.msra.mxu1 %v7942_v27 }
 0x39f   : > { %v3596_v44 = vadd.bf16 %v9330_v46, %v3524_v54  ;;  %v3627_v9 = vmax.bf16 %v8187_v2, %v3595_v60  ;;  %v9514_v54 = vpop.f32.mrf.mxu0 }
 0x3a0   : > { %v3432_v5 = vpop.f32.mrf.mxu1 }
 0x3a1   : > { %v3628_v8 = vmax.bf16 %v8187_v2, %v3596_v44 }
 0x3a2   : > { %v3434_v10 = vpop.f32.mrf.mxu1 }
 0x3a3   : > { %v3525_v38 = vpack.c.bf16 %v3434_v10, %v3430_v61  ;;  %3940 = vmatprep.mubr.bf16.mxu0 %v3628_v8  ;;  %v9517_v61 = vpop.f32.mrf.mxu0  ;;  %v7945_v8 = vld [vmem:[%s10696_s6 + $0x380] ss:$8 sps:$4 sm:$0xff]  }
 0x3a4   : > { %v3436_v51 = vpop.f32.mrf.mxu1  ;;  %3941 = vmatmul.mubr.bf16.gmra.mxu0 %v3627_v9  ;;  %v7947_v9 = vld [vmem:[%s10696_s6 + $0x384] ss:$8 sps:$4 sm:$0xff]  }
 0x3a5   : > { %v3526_v35 = vpack.c.bf16 %v3436_v51, %v3432_v5  ;;  %v3597_v19 = vadd.bf16 %v9327_v16, %v3525_v38  ;;  %4389 = vmatprep.subr.bf16.mxu1 %v7947_v9 }
 0x3a6   : > { %v3440_v15 = vpop.f32.mrf.mxu1  ;;  %4390 = vmatpush2.bf16.msra.mxu1 %v7945_v8 }
 0x3a7   : > { %v3598_v7 = vadd.bf16 %v9330_v46, %v3526_v35  ;;  %v3629_v21 = vmax.bf16 %v8187_v2, %v3597_v19  ;;  %v9527_v35 = vpop.f32.mrf.mxu0 }
 0x3a8   : > { %v3442_v47 = vpop.f32.mrf.mxu1 }
 0x3a9   : > { %v3630_v53 = vmax.bf16 %v8187_v2, %v3598_v7 }
 0x3aa   : > { %v3444_v22 = vpop.f32.mrf.mxu1 }
 0x3ab   : > { %v3527_v36 = vpack.c.bf16 %v3444_v22, %v3440_v15  ;;  %3950 = vmatprep.mubr.bf16.mxu0 %v3630_v53 }
 0x3ac   : > { %v3446_v62 = vpop.f32.mrf.mxu1  ;;  %3951 = vmatmul.mubr.bf16.gmra.mxu0 %v3629_v21  ;;  %v9531_v21 = vpop.f32.mrf.mxu0 }
 0x3ad   : > { %v3528_v26 = vpack.c.bf16 %v3446_v62, %v3442_v47  ;;  %v3599_v29 = vadd.bf16 %v9327_v16, %v3527_v36 }
 0x3ae   : > { %v3450_v63 = vpop.f32.mrf.mxu1  ;;  %v9535_v40 = vpop.f32.mrf.mxu0 }
 0x3af   : > { %v3600_v30 = vadd.bf16 %v9330_v46, %v3528_v26  ;;  %v3631_v39 = vmax.bf16 %v8187_v2, %v3599_v29 }
 0x3b0   : > { %v3452_v31 = vpop.f32.mrf.mxu1 }
 0x3b1   : > { %v3632_v48 = vmax.bf16 %v8187_v2, %v3600_v30  ;;  %v9538_v30 = vpop.f32.mrf.mxu0 }
 0x3b2   : > { %v3454_v57 = vpop.f32.mrf.mxu1 }
 0x3b3   : > { %v3529_v60 = vpack.c.bf16 %v3454_v57, %v3450_v63  ;;  %3960 = vmatprep.mubr.bf16.mxu0 %v3632_v48 }
 0x3b4   : > { %v3456_v44 = vpop.f32.mrf.mxu1  ;;  %3961 = vmatmul.mubr.bf16.gmra.mxu0 %v3631_v39 }
 0x3b5   : > { %v3530_v5 = vpack.c.bf16 %v3456_v44, %v3452_v31  ;;  %v3601_v10 = vadd.bf16 %v9327_v16, %v3529_v60  ;;  %v9541_v44 = vpop.f32.mrf.mxu0 }
 0x3b6   : > { %v3460_v38 = vpop.f32.mrf.mxu1 }
 0x3b7   : > { %v3602_v51 = vadd.bf16 %v9330_v46, %v3530_v5  ;;  %v3633_v7 = vmax.bf16 %v8187_v2, %v3601_v10 }
 0x3b8   : > { %v3462_v19 = vpop.f32.mrf.mxu1 }
 0x3b9   : > { %v3634_v15 = vmax.bf16 %v8187_v2, %v3602_v51  ;;  %v9546_v51 = vpop.f32.mrf.mxu0 }
 0x3ba   : > { %v3464_v47 = vpop.f32.mrf.mxu1 }
 0x3bb   : > { %v3531_v53 = vpack.c.bf16 %v3464_v47, %v3460_v38  ;;  %3970 = vmatprep.mubr.bf16.mxu0 %v3634_v15 }
 0x3bc   : > { %v3466_v22 = vpop.f32.mrf.mxu1  ;;  %3971 = vmatmul.mubr.bf16.gmra.mxu0 %v3633_v7 }
 0x3bd   : > { %v3532_v36 = vpack.c.bf16 %v3466_v22, %v3462_v19  ;;  %v3603_v62 = vadd.bf16 %v9327_v16, %v3531_v53  ;;  %v9549_v22 = vpop.f32.mrf.mxu0 }
 0x3be   : > { %v3470_v26 = vpop.f32.mrf.mxu1 }
 0x3bf   : > { %v3604_v27 = vadd.bf16 %v9330_v46, %v3532_v36  ;;  %v3635_v31 = vmax.bf16 %v8187_v2, %v3603_v62 }
 0x3c0   : > { %v3472_v29 = vpop.f32.mrf.mxu1 }
 0x3c1   : > { %v3636_v63 = vmax.bf16 %v8187_v2, %v3604_v27  ;;  %v9553_v27 = vpop.f32.mrf.mxu0 }
 0x3c2   : > { %v3474_v48 = vpop.f32.mrf.mxu1 }
 0x3c3   : > { %v3533_v39 = vpack.c.bf16 %v3474_v48, %v3470_v26  ;;  %3980 = vmatprep.mubr.bf16.mxu0 %v3636_v63 }
 0x3c4   : > { %v3476_v57 = vpop.f32.mrf.mxu1  ;;  %3981 = vmatmul.mubr.bf16.gmra.mxu0 %v3635_v31 }
 0x3c5   : > { %v3534_v60 = vpack.c.bf16 %v3476_v57, %v3472_v29  ;;  %v3605_v5 = vadd.bf16 %v9327_v16, %v3533_v39  ;;  %v2828_v39 = vshrl.u32 %v9064_v37, 16  ;;  %v2820_v37 = vshrl.u32 %v9061_v12, 16 }
 0x3c6   : > { %v3480_v8 = vpop.f32.mrf.mxu1 }
 0x3c7   : > { %v3606_v9 = vadd.bf16 %v9330_v46, %v3534_v60  ;;  %v3637_v19 = vmax.bf16 %v8187_v2, %v3605_v5  ;;  %v9558_v60 = vpop.f32.mrf.mxu0 }
 0x3c8   : > { %v3482_v10 = vpop.f32.mrf.mxu1 }
 0x3c9   : > { %v3638_v38 = vmax.bf16 %v8187_v2, %v3606_v9 }
 0x3ca   : > { %v3484_v15 = vpop.f32.mrf.mxu1 }
 0x3cb   : > { %v3535_v7 = vpack.c.bf16 %v3484_v15, %v3480_v8  ;;  %3990 = vmatprep.mubr.bf16.mxu0 %v3638_v38  ;;  %v2829_v38 = vpack.i.b16 %v2828_v39, %v2828_v39  ;;  %v9562_v15 = vpop.f32.mrf.mxu0  ;;  %v2821_v39 = vpack.i.b16 %v2820_v37, %v2820_v37 }
 0x3cc   : > { %v3486_v47 = vpop.f32.mrf.mxu1  ;;  %3991 = vmatmul.mubr.bf16.gmra.mxu0 %v3637_v19 }
 0x3cd   : > { %v3536_v53 = vpack.c.bf16 %v3486_v47, %v3482_v10  ;;  %v3607_v36 = vadd.bf16 %v9327_v16, %v3535_v7 }
 0x3ce   : > { %v3490_v62 = vpop.f32.mrf.mxu1 }
 0x3cf   : > { %v3608_v26 = vadd.bf16 %v9330_v46, %v3536_v53  ;;  %v3639_v31 = vmax.bf16 %v8187_v2, %v3607_v36 }
 0x3d0   : > { %v3492_v29 = vpop.f32.mrf.mxu1 }
 0x3d1   : > { %v3640_v63 = vmax.bf16 %v8187_v2, %v3608_v26  ;;  %v9570_v26 = vrot.slane %v2829_v38, %v8795_v34 }
 0x3d2   : > { %v3494_v48 = vpop.f32.mrf.mxu1 }
 0x3d3   : > { %v3537_v57 = vpack.c.bf16 %v3494_v48, %v3490_v62  ;;  %4000 = vmatprep.mubr.bf16.mxu0 %v3640_v63  ;;  %v2764_v62 = vpack.c.bf16 %v9312_v6, %v9300_v55  ;;  %v9572_v63 = vpop.f32.mrf.mxu0  ;;  %v2763_v6 = vpack.c.bf16 %v9304_v52, %v9289_v14 }
 0x3d4   : > { %v3496_v5 = vpop.f32.mrf.mxu1  ;;  %4001 = vmatmul.mubr.bf16.gmra.mxu0 %v3639_v31 }
 0x3d5   : > { %v3538_v8 = vpack.c.bf16 %v3496_v5, %v3492_v29  ;;  %v3609_v9 = vadd.bf16 %v9327_v16, %v3537_v57  ;;  %v9574_v57 = vpop.f32.mrf.mxu0  ;;  %v2836_v5 = vadd.bf16 %v9570_v26, %v2764_v62 }
 0x3d6   : > { %v3500_v10 = vpop.f32.mrf.mxu1 }
 0x3d7   : > { %v3610_v19 = vadd.bf16 %v9330_v46, %v3538_v8  ;;  %v3641_v53 = vmax.bf16 %v8187_v2, %v3609_v9  ;;  %v9583_v9 = vrot.slane %v2821_v39, %v8795_v34 }
 0x3d8   : > { %v3502_v7 = vpop.f32.mrf.mxu1 }
 0x3d9   : > { %v3642_v47 = vmax.bf16 %v8187_v2, %v3610_v19  ;;  %v2766_v19 = vpack.c.bf16 %v9352_v28, %v9332_v41  ;;  %v2768_v41 = vpack.c.bf16 %v9400_v56, %v9368_v50 }
 0x3da   : > { %v3504_v36 = vpop.f32.mrf.mxu1 }
 0x3db   : > { %v3539_v29 = vpack.c.bf16 %v3504_v36, %v3500_v10  ;;  %4010 = vmatprep.mubr.bf16.mxu0 %v3642_v47  ;;  %v9585_v10 = vpop.f32.mrf.mxu0  ;;  %v2838_v14 = vadd.bf16 %v9570_v26, %v2766_v19  ;;  %v2765_v47 = vpack.c.bf16 %v9342_v24, %v9316_v11  ;;  %v2840_v62 = vadd.bf16 %v9570_v26, %v2768_v41 }
 0x3dc   : > { %v3506_v31 = vpop.f32.mrf.mxu1  ;;  %4011 = vmatmul.mubr.bf16.gmra.mxu0 %v3641_v53  ;;  %v2767_v11 = vpack.c.bf16 %v9386_v1, %v9357_v20  ;;  %v2770_v24 = vpack.c.bf16 %v9445_v3, %v9416_v25  ;;  %v2769_v20 = vpack.c.bf16 %v9432_v45, %v9406_v0  ;;  %v2772_v25 = vpack.c.bf16 %v9465_v43, %v9451_v58 }
 0x3dd   : > { %v3540_v48 = vpack.c.bf16 %v3506_v31, %v3502_v7  ;;  %v3611_v12 = vadd.bf16 %v9327_v16, %v3539_v29  ;;  %v2868_v16 = vmax.bf16 %v8187_v2, %v2836_v5  ;;  %v9592_v7 = vpop.f32.mrf.mxu0  ;;  %v2870_v28 = vmax.bf16 %v8187_v2, %v2838_v14 }
 0x3de   : > { %v2837_v36 = vadd.bf16 %v9583_v9, %v2765_v47  ;;  %v2872_v50 = vmax.bf16 %v8187_v2, %v2840_v62  ;;  %v2842_v39 = vadd.bf16 %v9570_v26, %v2770_v24  ;;  %v2771_v0 = vpack.c.bf16 %v9462_v17, %v9448_v4 }
 0x3df   : > { %v3612_v8 = vadd.bf16 %v9330_v46, %v3540_v48  ;;  %v3643_v38 = vmax.bf16 %v8187_v2, %v3611_v12  ;;  %v2835_v46 = vadd.bf16 %v9583_v9, %v2763_v6  ;;  %v9598_v37 = vpop.f32.mrf.mxu0  ;;  %v2839_v48 = vadd.bf16 %v9583_v9, %v2767_v11  ;;  %v7948_v11 = vld [vmem:[%s10698_s8 + $0xf8] sm:$0xff]  }
 0x3e0   : > { %v2869_v31 = vmax.bf16 %v8187_v2, %v2837_v36  ;;  %v2874_v3 = vmax.bf16 %v8187_v2, %v2842_v39  ;;  %v2844_v6 = vadd.bf16 %v9570_v26, %v2772_v25  ;;  %v2774_v58 = vpack.c.bf16 %v9493_v13, %v9479_v32  ;;  %7560 = vmatprep.subr.bf16.mxu1 %v7948_v11 }
 0x3e1   : > { %v3644_v55 = vmax.bf16 %v8187_v2, %v3612_v8  ;;  %v2867_v52 = vmax.bf16 %v8187_v2, %v2835_v46  ;;  %v9603_v53 = vpop.f32.mrf.mxu0  ;;  %v2871_v5 = vmax.bf16 %v8187_v2, %v2839_v48  ;;  %v2841_v8 = vadd.bf16 %v9583_v9, %v2769_v20  ;;  %7448 = vmatprep.subr.bf16.mxu0 %v7948_v11  ;;  %v9685_v48 = vld [vmem:[%s10698_s8 + $0xb8] sm:$0xff]   ;;  %v7009_v20 = vld.sshfl [vmem:[%s10697_s7 + $0x2] sm:$0x11 pattern:$0x75316420] }
 0x3e2   : > { %v2876_v43 = vmax.bf16 %v8187_v2, %v2844_v6  ;;  %v2843_v19 = vadd.bf16 %v9583_v9, %v2771_v0  ;;  %v2846_v46 = vadd.bf16 %v9570_v26, %v2774_v58  ;;  %v2773_v4 = vpack.c.bf16 %v9489_v42, %v9469_v49 }
 0x3e3   : > { %4020 = vmatprep.mubr.bf16.mxu0 %v3644_v55  ;;  %v9607_v29 = vpop.f32.mrf.mxu0  ;;  %v2776_v17 = vpack.c.bf16 %v9514_v54, %v9500_v18  ;;  %v2775_v49 = vpack.c.bf16 %v9509_v33, %v9495_v59  ;;  %v2778_v42 = vpack.c.bf16 %v9535_v40, %v9527_v35  ;;  %v2777_v33 = vpack.c.bf16 %v9531_v21, %v9517_v61 }
 0x3e4   : > { %4021 = vmatmul.mubr.bf16.gmra.mxu0 %v3643_v38  ;;  %v2873_v38 = vmax.bf16 %v8187_v2, %v2841_v8  ;;  %v2878_v32 = vmax.bf16 %v8187_v2, %v2846_v46  ;;  %v2845_v47 = vadd.bf16 %v9583_v9, %v2773_v4  ;;  %v2780_v40 = vpack.c.bf16 %v9549_v22, %v9541_v44 }
 0x3e5   : > { %5559 = vmatprep.mubr.bf16.mxu0 %v2868_v16  ;;  %v9615_v56 = vpop.f32.mrf.mxu0  ;;  %v2848_v41 = vadd.bf16 %v9570_v26, %v2776_v17  ;;  %v2847_v62 = vadd.bf16 %v9583_v9, %v2775_v49  ;;  %v2850_v24 = vadd.bf16 %v9570_v26, %v2778_v42  ;;  %v2849_v39 = vadd.bf16 %v9583_v9, %v2777_v33 }
 0x3e6   : > { %v2877_v36 = vmax.bf16 %v8187_v2, %v2845_v47  ;;  %v2852_v61 = vadd.bf16 %v9570_v26, %v2780_v40  ;;  %v2779_v44 = vpack.c.bf16 %v9546_v51, %v9538_v30  ;;  %v2782_v25 = vpack.c.bf16 %v9572_v63, %v9558_v60  ;;  %v7950_v30 = vld [vmem:[%s10698_s8 + $0xf0] sm:$0xff]  }
 0x3e7   : > { %v9619_v12 = vpop.f32.mrf.mxu0  ;;  %v2880_v18 = vmax.bf16 %v8187_v2, %v2848_v41  ;;  %v2879_v59 = vmax.bf16 %v8187_v2, %v2847_v62  ;;  %v2881_v21 = vmax.bf16 %v8187_v2, %v2849_v39  ;;  %v4073_v6 = vcombine.high %v7009_v20, %v7009_v20 }
 0x3e8   : > { %v2854_v51 = vadd.bf16 %v9570_v26, %v2782_v25  ;;  %v9715_v60 = vrot.slane %v7009_v20, %v8787_v23  ;;  %v2786_v11 = vpack.c.bf16 %v9619_v12, %v9607_v29  ;;  %v7953_v20 = vld [vmem:[%s10698_s8 + $0xa8] sm:$0xff]  }
 0x3e9   : > { %v9718_v63 = vrot.slane %v4073_v6, %v8787_v23 }
 0x3ea   : > { %v2886_v4 = vmax.bf16 %v8187_v2, %v2854_v51 }
 0x3eb   : > { %v9624_v1 = vpop.f32.mrf.mxu0  ;;  %v4096_v23 = vpack.i.b16 %v9718_v63, %v9718_v63 }
 0x3ec   : > { %5560 = vmatmul.mubr.bf16.vlgmr.msra.gmra.mxu0 %v2867_v52  ;;  %v2875_v52 = vmax.bf16 %v8187_v2, %v2843_v19  ;;  %v2781_v19 = vpack.c.bf16 %v9562_v15, %v9553_v27  ;;  %v7951_v27 = vld [vmem:[%s10698_s8 + $0xb0] sm:$0xff]  }
 0x3ed   : > { %5567 = vmatprep.mubr.bf16.mxu0 %v2870_v28  ;;  %v9630_v55 = vpop.f32.mrf.mxu0  ;;  %7449 = vmatpush3.bf16.msra.mxu0 %v9685_v48  ;;  %v9741_v49 = vrot.slane %v4096_v23, %v8795_v34 }
 0x3ee   : > { %7450 = vmatprep.subr.bf16.mxu0 %v7950_v30  ;;  %v2853_v15 = vadd.bf16 %v9583_v9, %v2781_v19 }
 0x3ef   : > { %v9636_v45 = vpop.f32.mrf.mxu0 }
 0x3f0   : > { %v2885_v42 = vmax.bf16 %v8187_v2, %v2853_v15  ;;  %v2787_v23 = vpack.c.bf16 %v9636_v45, %v9624_v1 }
 0x3f1   : > { %v9642_v16 = vpop.f32.mrf.mxu0  ;;  %7451 = vmatpush3.bf16.msra.mxu0 %v7951_v27 }
 0x3f4   : > { %5568 = vmatmul.mubr.bf16.gmra.mxu0 %v2869_v31 }
 0x3f5   : > { %5575 = vmatprep.mubr.bf16.mxu0 %v2872_v50  ;;  %v2882_v50 = vmax.bf16 %v8187_v2, %v2850_v24 }
 0x3fc   : > { %5576 = vmatmul.mubr.bf16.gmra.mxu0 %v2871_v5 }
 0x3fd   : > { %5583 = vmatprep.mubr.bf16.mxu0 %v2874_v3  ;;  %v2884_v3 = vmax.bf16 %v8187_v2, %v2852_v61 }
 0x3fe   : > { %v9645_v14 = vpop.f32.mrf.mxu0 }
 0x400   : > { %v9653_v13 = vpop.f32.mrf.mxu0 }
 0x402   : > { %v9657_v28 = vpop.f32.mrf.mxu0 }
 0x404   : > { %5584 = vmatmul.mubr.bf16.gmra.mxu0 %v2873_v38  ;;  %v9665_v54 = vpop.f32.mrf.mxu0  ;;  %v2851_v38 = vadd.bf16 %v9583_v9, %v2779_v44  ;;  %v7952_v44 = vld [vmem:[%s10698_s8 + $0xe8] sm:$0xff]  }
 0x405   : > { %5591 = vmatprep.mubr.bf16.mxu0 %v2876_v43  ;;  %7452 = vmatprep.subr.bf16.mxu0 %v7952_v44 }
 0x406   : > { %v2883_v43 = vmax.bf16 %v8187_v2, %v2851_v38  ;;  %v2788_v38 = vpack.c.bf16 %v9642_v16, %v9630_v55  ;;  %7453 = vmatpush3.bf16.msra.mxu0 %v7953_v20 }
 0x408   : > { %v2860_v55 = vadd.bf16 %v9570_v26, %v2788_v38 }
 0x40c   : > { %5592 = vmatmul.mubr.bf16.gmra.mxu0 %v2875_v52  ;;  %v2784_v52 = vpack.c.bf16 %v9598_v37, %v9585_v10 }
 0x40d   : > { %5599 = vmatprep.mubr.bf16.mxu0 %v2878_v32  ;;  %v4089_v32 = vpack.i.b16 %v9715_v60, %v9715_v60 }
 0x40e   : > { %v2856_v10 = vadd.bf16 %v9570_v26, %v2784_v52 }
 0x40f   : > { %v9738_v41 = vrot.slane %v4089_v32, %v8795_v34 }
 0x411   : > { %v9668_v31 = vpop.f32.mrf.mxu0 }
 0x413   : > { %v9677_v35 = vpop.f32.mrf.mxu0 }
 0x414   : > { %5600 = vmatmul.mubr.bf16.gmra.mxu0 %v2877_v36 }
 0x415   : > { %5607 = vmatprep.mubr.bf16.mxu0 %v2880_v18  ;;  %v9688_v5 = vpop.f32.mrf.mxu0  ;;  %v2783_v18 = vpack.c.bf16 %v9592_v7, %v9574_v57 }
 0x417   : > { %v9695_v22 = vpop.f32.mrf.mxu0  ;;  %v2855_v39 = vadd.bf16 %v9583_v9, %v2783_v18  ;;  %v2859_v18 = vadd.bf16 %v9583_v9, %v2787_v23 }
 0x419   : > { %v2887_v25 = vmax.bf16 %v8187_v2, %v2855_v39  ;;  %v2792_v39 = vpack.c.bf16 %v9695_v22, %v9677_v35 }
 0x41c   : > { %5608 = vmatmul.mubr.bf16.gmra.mxu0 %v2879_v59  ;;  %v2888_v59 = vmax.bf16 %v8187_v2, %v2856_v10 }
 0x41d   : > { %5615 = vmatprep.mubr.bf16.mxu0 %v2882_v50 }
 0x424   : > { %v9703_v8 = vpop.f32.mrf.mxu0  ;;  %5616 = vmatmul.mubr.bf16.gmra.mxu0 %v2881_v21  ;;  %v2858_v21 = vadd.bf16 %v9570_v26, %v2786_v11 }
 0x425   : > { %5623 = vmatprep.mubr.bf16.mxu0 %v2884_v3  ;;  %v2785_v3 = vpack.c.bf16 %v9615_v56, %v9603_v53 }
 0x426   : > { %v9706_v0 = vpop.f32.mrf.mxu0 }
 0x427   : > { %v2857_v53 = vadd.bf16 %v9583_v9, %v2785_v3  ;;  %v2791_v3 = vpack.c.bf16 %v9688_v5, %v9668_v31 }
 0x428   : > { %v9712_v58 = vpop.f32.mrf.mxu0 }
 0x42a   : > { %v9723_v46 = vpop.f32.mrf.mxu0 }
 0x42b   : > { %v2794_v38 = vpack.c.bf16 %v9723_v46, %v9706_v0 }
 0x42c   : > { %v3872_v17 = vpop.f32.mrf.mxu0  ;;  %5624 = vmatmul.mubr.bf16.gmra.mxu0 %v2883_v43  ;;  %v2890_v43 = vmax.bf16 %v8187_v2, %v2858_v21 }
 0x42d   : > { %5631 = vmatprep.mubr.bf16.mxu0 %v2886_v4  ;;  %v2866_v31 = vadd.bf16 %v9570_v26, %v2794_v38 }
 0x42e   : > { %v3874_v47 = vpop.f32.mrf.mxu0 }
 0x42f   : > { %v2898_v23 = vmax.bf16 %v8187_v2, %v2866_v31 }
 0x430   : > { %v3876_v37 = vpop.f32.mrf.mxu0 }
 0x431   : > { %v4031_v36 = vpack.c.bf16 %v3876_v37, %v3872_v17  ;;  %v2892_v37 = vmax.bf16 %v8187_v2, %v2860_v55 }
 0x432   : > { %v3878_v62 = vpop.f32.mrf.mxu0 }
 0x433   : > { %v4032_v24 = vpack.c.bf16 %v3878_v62, %v3874_v47  ;;  %v4102_v33 = vadd.bf16 %v9738_v41, %v4031_v36  ;;  %v2790_v47 = vpack.c.bf16 %v9665_v54, %v9653_v13 }
 0x434   : > { %v3882_v40 = vpop.f32.mrf.mxu0  ;;  %5632 = vmatmul.mubr.bf16.gmra.mxu0 %v2885_v42 }
 0x435   : > { %v4103_v50 = vadd.bf16 %v9741_v49, %v4032_v24  ;;  %5639 = vmatprep.mubr.bf16.mxu0 %v2888_v59  ;;  %v4134_v7 = vmax.bf16 %v8187_v2, %v4102_v33  ;;  %v2862_v1 = vadd.bf16 %v9570_v26, %v2790_v47  ;;  %v7954_v24 = vld [vmem:[%s10698_s8 + $0xe0] sm:$0xff]   ;;  %v2891_v33 = vmax.bf16 %v8187_v2, %v2859_v18 }
 0x436   : > { %v3884_v61 = vpop.f32.mrf.mxu0  ;;  %v7955_v59 = vld [vmem:[%s10698_s8 + $0xa0] sm:$0xff]   ;;  %7454 = vmatprep.subr.bf16.mxu0 %v7954_v24 }
 0x437   : > { %v4135_v57 = vmax.bf16 %v8187_v2, %v4103_v50  ;;  %v2894_v21 = vmax.bf16 %v8187_v2, %v2862_v1  ;;  %7455 = vmatpush3.bf16.msra.mxu0 %v7955_v59 }
 0x438   : > { %v3886_v29 = vpop.f32.mrf.mxu0 }
 0x439   : > { %v4033_v12 = vpack.c.bf16 %v3886_v29, %v3882_v40  ;;  %4391 = vmatprep.mubr.bf16.mxu1 %v4135_v57  ;;  %v2789_v40 = vpack.c.bf16 %v9657_v28, %v9645_v14 }
 0x43a   : > { %v3888_v6 = vpop.f32.mrf.mxu0  ;;  %4392 = vmatmul.mubr.bf16.vlgmr.msra.gmra.mxu1 %v4134_v7 }
 0x43b   : > { %v4034_v51 = vpack.c.bf16 %v3888_v6, %v3884_v61  ;;  %7568 = vmatpush3.bf16.msra.mxu1 %v9685_v48  ;;  %v4104_v19 = vadd.bf16 %v9738_v41, %v4033_v12  ;;  %v2861_v14 = vadd.bf16 %v9583_v9, %v2789_v40  ;;  %v2864_v12 = vadd.bf16 %v9570_v26, %v2792_v39  ;;  %v7958_v40 = vld [vmem:[%s10698_s8 + $0xd0] sm:$0xff]  }
 0x43c   : > { %v3892_v52 = vpop.f32.mrf.mxu0  ;;  %5640 = vmatmul.mubr.bf16.gmra.mxu0 %v2887_v25  ;;  %7561 = vmatprep.subr.bf16.mxu1 %v7950_v30  ;;  %v2889_v30 = vmax.bf16 %v8187_v2, %v2857_v53  ;;  %v2863_v53 = vadd.bf16 %v9583_v9, %v2791_v3  ;;  %v2793_v26 = vpack.c.bf16 %v9712_v58, %v9703_v8 }
 0x43d   : > { %v4105_v4 = vadd.bf16 %v9741_v49, %v4034_v51  ;;  %5647 = vmatprep.mubr.bf16.mxu0 %v2890_v43  ;;  %v4136_v48 = vmax.bf16 %v8187_v2, %v4104_v19  ;;  %v2893_v25 = vmax.bf16 %v8187_v2, %v2861_v14  ;;  %v2896_v43 = vmax.bf16 %v8187_v2, %v2864_v12 }
 0x43e   : > { %v3894_v56 = vpop.f32.mrf.mxu0 }
 0x43f   : > { %v4137_v16 = vmax.bf16 %v8187_v2, %v4105_v4  ;;  %7569 = vmatpush3.bf16.msra.mxu1 %v7951_v27 }
 0x440   : > { %v3896_v17 = vpop.f32.mrf.mxu0  ;;  %7562 = vmatprep.subr.bf16.mxu1 %v7952_v44 }
 0x441   : > { %v4035_v32 = vpack.c.bf16 %v3896_v17, %v3892_v52  ;;  %4401 = vmatprep.mubr.bf16.mxu1 %v4137_v16  ;;  %v7956_v16 = vld [vmem:[%s10698_s8 + $0xd8] sm:$0xff]   ;;  %v2895_v17 = vmax.bf16 %v8187_v2, %v2863_v53 }
 0x442   : > { %v3898_v15 = vpop.f32.mrf.mxu0  ;;  %4402 = vmatmul.mubr.bf16.gmra.mxu1 %v4136_v48  ;;  %v7957_v48 = vld [vmem:[%s10698_s8 + $0x98] sm:$0xff]   ;;  %7456 = vmatprep.subr.bf16.mxu0 %v7956_v16 }
 0x443   : > { %v4036_v10 = vpack.c.bf16 %v3898_v15, %v3894_v56  ;;  %7570 = vmatpush3.bf16.msra.mxu1 %v7953_v20  ;;  %v4106_v27 = vadd.bf16 %v9738_v41, %v4035_v32  ;;  %7457 = vmatpush3.bf16.msra.mxu0 %v7957_v48 }
 0x444   : > { %v3902_v36 = vpop.f32.mrf.mxu0  ;;  %5648 = vmatmul.mubr.bf16.gmra.mxu0 %v2889_v30  ;;  %7563 = vmatprep.subr.bf16.mxu1 %v7954_v24 }
 0x445   : > { %v4107_v42 = vadd.bf16 %v9741_v49, %v4036_v10  ;;  %5655 = vmatprep.mubr.bf16.mxu0 %v2892_v37  ;;  %v4138_v13 = vmax.bf16 %v8187_v2, %v4106_v27  ;;  %v2865_v37 = vadd.bf16 %v9583_v9, %v2793_v26  ;;  %7458 = vmatprep.subr.bf16.mxu0 %v7958_v40 }
 0x446   : > { %v3904_v62 = vpop.f32.mrf.mxu0 }
 0x447   : > { %v4139_v45 = vmax.bf16 %v8187_v2, %v4107_v42  ;;  %7571 = vmatpush3.bf16.msra.mxu1 %v7955_v59  ;;  %v2897_v18 = vmax.bf16 %v8187_v2, %v2865_v37 }
 0x448   : > { %v3906_v54 = vpop.f32.mrf.mxu0  ;;  %7564 = vmatprep.subr.bf16.mxu1 %v7956_v16 }
 0x449   : > { %v4037_v11 = vpack.c.bf16 %v3906_v54, %v3902_v36  ;;  %4411 = vmatprep.mubr.bf16.mxu1 %v4139_v45 }
 0x44a   : > { %v3908_v50 = vpop.f32.mrf.mxu0  ;;  %4412 = vmatmul.mubr.bf16.gmra.mxu1 %v4138_v13 }
 0x44b   : > { %v4038_v61 = vpack.c.bf16 %v3908_v50, %v3904_v62  ;;  %v4108_v57 = vadd.bf16 %v9738_v41, %v4037_v11  ;;  %7572 = vmatpush3.bf16.msra.mxu1 %v7957_v48  ;;  %v7959_v50 = vld [vmem:[%s10698_s8 + $0x90] sm:$0xff]  }
 0x44c   : > { %v3912_v7 = vpop.f32.mrf.mxu0  ;;  %5656 = vmatmul.mubr.bf16.gmra.mxu0 %v2891_v33  ;;  %7565 = vmatprep.subr.bf16.mxu1 %v7958_v40 }
 0x44d   : > { %v4109_v29 = vadd.bf16 %v9741_v49, %v4038_v61  ;;  %5663 = vmatprep.mubr.bf16.mxu0 %v2894_v21  ;;  %v4140_v22 = vmax.bf16 %v8187_v2, %v4108_v57  ;;  %7459 = vmatpush3.bf16.msra.mxu0 %v7959_v50 }
 0x44e   : > { %v3914_v28 = vpop.f32.mrf.mxu0 }
 0x44f   : > { %v4141_v35 = vmax.bf16 %v8187_v2, %v4109_v29  ;;  %7573 = vmatpush3.bf16.msra.mxu1 %v7959_v50 }
 0x450   : > { %v3916_v44 = vpop.f32.mrf.mxu0 }
 0x451   : > { %v4039_v20 = vpack.c.bf16 %v3916_v44, %v3912_v7  ;;  %4421 = vmatprep.mubr.bf16.mxu1 %v4141_v35 }
 0x452   : > { %v3918_v6 = vpop.f32.mrf.mxu0  ;;  %4422 = vmatmul.mubr.bf16.gmra.mxu1 %v4140_v22 }
 0x453   : > { %v4040_v51 = vpack.c.bf16 %v3918_v6, %v3914_v28  ;;  %v4110_v19 = vadd.bf16 %v9738_v41, %v4039_v20 }
 0x454   : > { %v3922_v52 = vpop.f32.mrf.mxu0  ;;  %5664 = vmatmul.mubr.bf16.gmra.mxu0 %v2893_v25 }
 0x455   : > { %v4111_v4 = vadd.bf16 %v9741_v49, %v4040_v51  ;;  %5671 = vmatprep.mubr.bf16.mxu0 %v2896_v43  ;;  %v4142_v55 = vmax.bf16 %v8187_v2, %v4110_v19 }
 0x456   : > { %v3924_v56 = vpop.f32.mrf.mxu0 }
 0x457   : > { %v4143_v5 = vmax.bf16 %v8187_v2, %v4111_v4  ;;  %v7961_v4 = vld [vmem:[%s10698_s8 + $0x88] sm:$0xff]  }
 0x458   : > { %v3926_v0 = vpop.f32.mrf.mxu0 }
 0x459   : > { %v4041_v46 = vpack.c.bf16 %v3926_v0, %v3922_v52  ;;  %4431 = vmatprep.mubr.bf16.mxu1 %v4143_v5  ;;  %v7960_v52 = vld [vmem:[%s10698_s8 + $0xc8] sm:$0xff]  }
 0x45a   : > { %v3928_v32 = vpop.f32.mrf.mxu0  ;;  %4432 = vmatmul.mubr.bf16.gmra.mxu1 %v4142_v55  ;;  %7566 = vmatprep.subr.bf16.mxu1 %v7960_v52 }
 0x45b   : > { %v4042_v30 = vpack.c.bf16 %v3928_v32, %v3924_v56  ;;  %v4112_v15 = vadd.bf16 %v9738_v41, %v4041_v46  ;;  %7460 = vmatprep.subr.bf16.mxu0 %v7960_v52  ;;  %7574 = vmatpush3.bf16.msra.mxu1 %v7961_v4 }
 0x45c   : > { %v3932_v47 = vpop.f32.mrf.mxu0  ;;  %5672 = vmatmul.mubr.bf16.gmra.mxu0 %v2895_v17 }
 0x45d   : > { %v4113_v10 = vadd.bf16 %v9741_v49, %v4042_v30  ;;  %5679 = vmatprep.mubr.bf16.mxu0 %v2898_v23  ;;  %v4144_v58 = vmax.bf16 %v8187_v2, %v4112_v15  ;;  %7461 = vmatpush3.bf16.msra.mxu0 %v7961_v4 }
 0x45e   : > { %v3934_v27 = vpop.f32.mrf.mxu0 }
 0x45f   : > { %v4145_v8 = vmax.bf16 %v8187_v2, %v4113_v10  ;;  %v7963_v10 = vld [vmem:[%s10698_s8 + $0x80] sm:$0xff]  }
 0x460   : > { %v3936_v36 = vpop.f32.mrf.mxu0 }
 0x461   : > { %v4043_v42 = vpack.c.bf16 %v3936_v36, %v3932_v47  ;;  %4441 = vmatprep.mubr.bf16.mxu1 %v4145_v8  ;;  %v7962_v47 = vld [vmem:[%s10698_s8 + $0xc0] sm:$0xff]  }
 0x462   : > { %v3938_v62 = vpop.f32.mrf.mxu0  ;;  %4442 = vmatmul.mubr.bf16.gmra.mxu1 %v4144_v58  ;;  %7462 = vmatprep.subr.bf16.mxu0 %v7962_v47 }
 0x463   : > { %v4044_v1 = vpack.c.bf16 %v3938_v62, %v3934_v27  ;;  %v4114_v45 = vadd.bf16 %v9738_v41, %v4043_v42  ;;  %7567 = vmatprep.subr.bf16.mxu1 %v7962_v47  ;;  %7463 = vmatpush3.bf16.msra.mxu0 %v7963_v10 }
 0x464   : > { %v3942_v13 = vpop.f32.mrf.mxu0  ;;  %5680 = vmatmul.mubr.bf16.gmra.mxu0 %v2897_v18  ;;  %7575 = vmatpush3.bf16.msra.mxu1 %v7963_v10 }
 0x465   : > { %v4115_v54 = vadd.bf16 %v9741_v49, %v4044_v1  ;;  %v4146_v24 = vmax.bf16 %v8187_v2, %v4114_v45 }
 0x466   : > { %v3944_v9 = vpop.f32.mrf.mxu0 }
 0x467   : > { %v4147_v11 = vmax.bf16 %v8187_v2, %v4115_v54 }
 0x468   : > { %v3946_v59 = vpop.f32.mrf.mxu0 }
 0x469   : > { %v4045_v33 = vpack.c.bf16 %v3946_v59, %v3942_v13  ;;  %4451 = vmatprep.mubr.bf16.mxu1 %v4147_v11 }
 0x46a   : > { %v3948_v39 = vpop.f32.mrf.mxu0  ;;  %4452 = vmatmul.mubr.bf16.gmra.mxu1 %v4146_v24 }
 0x46b   : > { %v4046_v61 = vpack.c.bf16 %v3948_v39, %v3944_v9  ;;  %v4116_v21 = vadd.bf16 %v9738_v41, %v4045_v33 }
 0x46c   : > { %v3952_v57 = vpop.f32.mrf.mxu0 }
 0x46d   : > { %v4117_v7 = vadd.bf16 %v9741_v49, %v4046_v61  ;;  %v4148_v28 = vmax.bf16 %v8187_v2, %v4116_v21 }
 0x46e   : > { %v3954_v29 = vpop.f32.mrf.mxu0 }
 0x46f   : > { %v4149_v14 = vmax.bf16 %v8187_v2, %v4117_v7 }
 0x470   : > { %v3956_v12 = vpop.f32.mrf.mxu0 }
 0x471   : > { %v4047_v35 = vpack.c.bf16 %v3956_v12, %v3952_v57  ;;  %4461 = vmatprep.mubr.bf16.mxu1 %v4149_v14 }
 0x472   : > { %v3958_v22 = vpop.f32.mrf.mxu0  ;;  %4462 = vmatmul.mubr.bf16.gmra.mxu1 %v4148_v28 }
 0x473   : > { %v4048_v44 = vpack.c.bf16 %v3958_v22, %v3954_v29  ;;  %v4118_v20 = vadd.bf16 %v9738_v41, %v4047_v35 }
 0x474   : > { %v3962_v25 = vpop.f32.mrf.mxu0 }
 0x475   : > { %v4119_v3 = vadd.bf16 %v9741_v49, %v4048_v44  ;;  %v4150_v51 = vmax.bf16 %v8187_v2, %v4118_v20 }
 0x476   : > { %v3964_v6 = vpop.f32.mrf.mxu0 }
 0x477   : > { %v4151_v38 = vmax.bf16 %v8187_v2, %v4119_v3 }
 0x478   : > { %v3966_v43 = vpop.f32.mrf.mxu0 }
 0x479   : > { %v4049_v19 = vpack.c.bf16 %v3966_v43, %v3962_v25  ;;  %4471 = vmatprep.mubr.bf16.mxu1 %v4151_v38 }
 0x47a   : > { %v3968_v53 = vpop.f32.mrf.mxu0  ;;  %4472 = vmatmul.mubr.bf16.gmra.mxu1 %v4150_v51 }
 0x47b   : > { %v4050_v56 = vpack.c.bf16 %v3968_v53, %v3964_v6  ;;  %v4120_v31 = vadd.bf16 %v9738_v41, %v4049_v19 }
 0x47c   : > { %v3972_v5 = vpop.f32.mrf.mxu0 }
 0x47d   : > { %v4121_v55 = vadd.bf16 %v9741_v49, %v4050_v56  ;;  %v4152_v16 = vmax.bf16 %v8187_v2, %v4120_v31 }
 0x47e   : > { %v3974_v0 = vpop.f32.mrf.mxu0 }
 0x47f   : > { %v4153_v46 = vmax.bf16 %v8187_v2, %v4121_v55 }
 0x480   : > { %v3976_v48 = vpop.f32.mrf.mxu0 }
 0x481   : > { %v4051_v17 = vpack.c.bf16 %v3976_v48, %v3972_v5  ;;  %4481 = vmatprep.mubr.bf16.mxu1 %v4153_v46 }
 0x482   : > { %v3978_v26 = vpop.f32.mrf.mxu0  ;;  %4482 = vmatmul.mubr.bf16.gmra.mxu1 %v4152_v16 }
 0x483   : > { %v4052_v32 = vpack.c.bf16 %v3978_v26, %v3974_v0  ;;  %v4122_v30 = vadd.bf16 %v9738_v41, %v4051_v17 }
 0x484   : > { %v3982_v23 = vpop.f32.mrf.mxu0 }
 0x485   : > { %v4123_v15 = vadd.bf16 %v9741_v49, %v4052_v32  ;;  %v4154_v8 = vmax.bf16 %v8187_v2, %v4122_v30 }
 0x486   : > { %v3984_v37 = vpop.f32.mrf.mxu0 }
 0x487   : > { %v4155_v27 = vmax.bf16 %v8187_v2, %v4123_v15 }
 0x488   : > { %v3986_v58 = vpop.f32.mrf.mxu0 }
 0x489   : > { %v4053_v36 = vpack.c.bf16 %v3986_v58, %v3982_v23  ;;  %4491 = vmatprep.mubr.bf16.mxu1 %v4155_v27 }
 0x48a   : > { %v3988_v42 = vpop.f32.mrf.mxu0  ;;  %4492 = vmatmul.mubr.bf16.gmra.mxu1 %v4154_v8 }
 0x48b   : > { %v4054_v18 = vpack.c.bf16 %v3988_v42, %v3984_v37  ;;  %v4124_v62 = vadd.bf16 %v9738_v41, %v4053_v36 }
 0x48c   : > { %v3992_v1 = vpop.f32.mrf.mxu0 }
 0x48d   : > { %v4125_v45 = vadd.bf16 %v9741_v49, %v4054_v18  ;;  %v4156_v9 = vmax.bf16 %v8187_v2, %v4124_v62 }
 0x48e   : > { %v3994_v13 = vpop.f32.mrf.mxu0 }
 0x48f   : > { %v4157_v54 = vmax.bf16 %v8187_v2, %v4125_v45 }
 0x490   : > { %v3996_v11 = vpop.f32.mrf.mxu0 }
 0x491   : > { %v4055_v24 = vpack.c.bf16 %v3996_v11, %v3992_v1  ;;  %4501 = vmatprep.mubr.bf16.mxu1 %v4157_v54 }
 0x492   : > { %v3998_v59 = vpop.f32.mrf.mxu0  ;;  %4502 = vmatmul.mubr.bf16.gmra.mxu1 %v4156_v9 }
 0x493   : > { %v4056_v33 = vpack.c.bf16 %v3998_v59, %v3994_v13  ;;  %v4126_v40 = vadd.bf16 %v9738_v41, %v4055_v24 }
 0x494   : > { %v4002_v50 = vpop.f32.mrf.mxu0 }
 0x495   : > { %v4127_v39 = vadd.bf16 %v9741_v49, %v4056_v33  ;;  %v4158_v57 = vmax.bf16 %v8187_v2, %v4126_v40 }
 0x496   : > { %v4004_v61 = vpop.f32.mrf.mxu0 }
 0x497   : > { %v4159_v21 = vmax.bf16 %v8187_v2, %v4127_v39 }
 0x498   : > { %v4006_v7 = vpop.f32.mrf.mxu0 }
 0x499   : > { %v4057_v29 = vpack.c.bf16 %v4006_v7, %v4002_v50  ;;  %4511 = vmatprep.mubr.bf16.mxu1 %v4159_v21 }
 0x49a   : > { %v4008_v14 = vpop.f32.mrf.mxu0  ;;  %4512 = vmatmul.mubr.bf16.gmra.mxu1 %v4158_v57 }
 0x49b   : > { %v4058_v28 = vpack.c.bf16 %v4008_v14, %v4004_v61  ;;  %v4128_v12 = vadd.bf16 %v9738_v41, %v4057_v29 }
 0x49c   : > { %v4012_v35 = vpop.f32.mrf.mxu0 }
 0x49d   : > { %v4129_v22 = vadd.bf16 %v9741_v49, %v4058_v28  ;;  %v4160_v25 = vmax.bf16 %v8187_v2, %v4128_v12 }
 0x49e   : > { %v4014_v44 = vpop.f32.mrf.mxu0 }
 0x49f   : > { %v4161_v20 = vmax.bf16 %v8187_v2, %v4129_v22 }
 0x4a0   : > { %v4016_v3 = vpop.f32.mrf.mxu0 }
 0x4a1   : > { %v4059_v6 = vpack.c.bf16 %v4016_v3, %v4012_v35  ;;  %4521 = vmatprep.mubr.bf16.mxu1 %v4161_v20 }
 0x4a2   : > { %v4018_v38 = vpop.f32.mrf.mxu0  ;;  %4522 = vmatmul.mubr.bf16.gmra.mxu1 %v4160_v25 }
 0x4a3   : > { %v4060_v51 = vpack.c.bf16 %v4018_v38, %v4014_v44  ;;  %v4130_v43 = vadd.bf16 %v9738_v41, %v4059_v6 }
 0x4a4   : > { %v4022_v19 = vpop.f32.mrf.mxu0 }
 0x4a5   : > { %v4131_v52 = vadd.bf16 %v9741_v49, %v4060_v51  ;;  %v4162_v56 = vmax.bf16 %v8187_v2, %v4130_v43 }
 0x4a6   : > { %v4024_v4 = vpop.f32.mrf.mxu0 }
 0x4a7   : > { %v4163_v53 = vmax.bf16 %v8187_v2, %v4131_v52 }
 0x4a8   : > { %v4026_v31 = vpop.f32.mrf.mxu0 }
 0x4a9   : > { %v4061_v5 = vpack.c.bf16 %v4026_v31, %v4022_v19  ;;  %4531 = vmatprep.mubr.bf16.mxu1 %v4163_v53 }
 0x4aa   : > { %v4028_v55 = vpop.f32.mrf.mxu0  ;;  %4532 = vmatmul.mubr.bf16.gmra.mxu1 %v4162_v56 }
 0x4ab   : > { %v4062_v0 = vpack.c.bf16 %v4028_v55, %v4024_v4  ;;  %v4132_v46 = vadd.bf16 %v9738_v41, %v4061_v5 }
 0x4ac   : > { %v7352_v16 = vpop.f32.mrf.mxu0 }
 0x4ad   : > { %v4133_v48 = vadd.bf16 %v9741_v49, %v4062_v0  ;;  %v4164_v30 = vmax.bf16 %v8187_v2, %v4132_v46  ;;  %v4609_v46 = vshrl.u32 %v9715_v60, 16 }
 0x4ae   : > { %v7353_v17 = vpop.f32.mrf.mxu0 }
 0x4af   : > { %v9888_v26 = vadd.f32 %v7353_v17, %v7352_v16  ;;  %v4165_v32 = vmax.bf16 %v8187_v2, %v4133_v48  ;;  %v4617_v48 = vshrl.u32 %v9718_v63, 16 }
 0x4b0   : > { %v7355_v23 = vpop.f32.mrf.mxu0 }
 0x4b1   : > { %4541 = vmatprep.mubr.bf16.mxu1 %v4165_v32 }
 0x4b2   : > { %4542 = vmatmul.mubr.bf16.gmra.mxu1 %v4164_v30  ;;  %v7356_v15 = vpop.f32.mrf.mxu0 }
 0x4b3   : > { %v9892_v47 = vadd.f32 %v7356_v15, %v7355_v23  ;;  %v4610_v23 = vpack.i.b16 %v4609_v46, %v4609_v46 }
 0x4b4   : > { %v7358_v10 = vpop.f32.mrf.mxu0 }
 0x4b6   : > { %v7359_v37 = vpop.f32.mrf.mxu0 }
 0x4b7   : > { %v9894_v27 = vadd.f32 %v7359_v37, %v7358_v10  ;;  %v4618_v10 = vpack.i.b16 %v4617_v48, %v4617_v48 }
 0x4b8   : > { %v7361_v41 = vpop.f32.mrf.mxu0 }
 0x4ba   : > { %v7362_v8 = vpop.f32.mrf.mxu0 }
 0x4bb   : > { %v9896_v49 = vadd.f32 %v7362_v8, %v7361_v41 }
 0x4bc   : > { %v7364_v58 = vpop.f32.mrf.mxu0 }
 0x4be   : > { %v7365_v36 = vpop.f32.mrf.mxu0 }
 0x4bf   : > { %v9898_v42 = vadd.f32 %v7365_v36, %v7364_v58  ;;  %v9933_v58 = vrot.slane %v4610_v23, %v8795_v34 }
 0x4c0   : > { %v7367_v18 = vpop.f32.mrf.mxu0 }
 0x4c2   : > { %v7368_v62 = vpop.f32.mrf.mxu0 }
 0x4c3   : > { %v9900_v1 = vadd.f32 %v7368_v62, %v7367_v18  ;;  %v9938_v62 = vrot.slane %v4618_v10, %v8795_v34 }
 0x4c4   : > { %v7370_v45 = vpop.f32.mrf.mxu0 }
 0x4c6   : > { %v7371_v13 = vpop.f32.mrf.mxu0 }
 0x4c7   : > { %v9902_v54 = vadd.f32 %v7371_v13, %v7370_v45 }
 0x4c8   : > { %v7373_v9 = vpop.f32.mrf.mxu0 }
 0x4ca   : > { %v7374_v11 = vpop.f32.mrf.mxu0 }
 0x4cb   : > { %v9904_v24 = vadd.f32 %v7374_v11, %v7373_v9 }
 0x4cc   : > { %v7376_v59 = vpop.f32.mrf.mxu0 }
 0x4ce   : > { %v7377_v33 = vpop.f32.mrf.mxu0 }
 0x4cf   : > { %v9906_v40 = vadd.f32 %v7377_v33, %v7376_v59 }
 0x4d0   : > { %v7379_v50 = vpop.f32.mrf.mxu0 }
 0x4d2   : > { %v7380_v39 = vpop.f32.mrf.mxu0 }
 0x4d3   : > { %v9908_v61 = vadd.f32 %v7380_v39, %v7379_v50 }
 0x4d4   : > { %v7382_v21 = vpop.f32.mrf.mxu0 }
 0x4d6   : > { %v7383_v57 = vpop.f32.mrf.mxu0 }
 0x4d7   : > { %v9910_v7 = vadd.f32 %v7383_v57, %v7382_v21 }
 0x4d8   : > { %v7385_v29 = vpop.f32.mrf.mxu0 }
 0x4da   : > { %v7386_v14 = vpop.f32.mrf.mxu0 }
 0x4db   : > { %v9912_v28 = vadd.f32 %v7386_v14, %v7385_v29 }
 0x4dc   : > { %v7388_v12 = vpop.f32.mrf.mxu0 }
 0x4de   : > { %v7389_v35 = vpop.f32.mrf.mxu0 }
 0x4df   : > { %v9914_v22 = vadd.f32 %v7389_v35, %v7388_v12 }
 0x4e0   : > { %v7391_v44 = vpop.f32.mrf.mxu0 }
 0x4e2   : > { %v7392_v20 = vpop.f32.mrf.mxu0 }
 0x4e3   : > { %v9916_v25 = vadd.f32 %v7392_v20, %v7391_v44 }
 0x4e4   : > { %v7394_v3 = vpop.f32.mrf.mxu0 }
 0x4e6   : > { %v7395_v6 = vpop.f32.mrf.mxu0 }
 0x4e7   : > { %v9918_v38 = vadd.f32 %v7395_v6, %v7394_v3 }
 0x4e8   : > { %v7397_v51 = vpop.f32.mrf.mxu0 }
 0x4ea   : > { %v7398_v43 = vpop.f32.mrf.mxu0 }
 0x4eb   : > { %v9920_v19 = vadd.f32 %v7398_v43, %v7397_v51 }
 0x4ec   : > { %v7400_v52 = vpop.f32.mrf.mxu0 }
 0x4ee   : > { %v7401_v4 = vpop.f32.mrf.mxu0 }
 0x4ef   : > { %v9922_v53 = vadd.f32 %v7401_v4, %v7400_v52 }
 0x4f0   : > { %v7403_v56 = vpop.f32.mrf.mxu0 }
 0x4f2   : > { %v7404_v31 = vpop.f32.mrf.mxu0 }
 0x4f3   : > { %v9924_v5 = vadd.f32 %v7404_v31, %v7403_v56 }
 0x4f4   : > { %v7406_v55 = vpop.f32.mrf.mxu0 }
 0x4f6   : > { %v7407_v0 = vpop.f32.mrf.mxu0 }
 0x4f7   : > { %v9927_v16 = vadd.f32 %v7407_v0, %v7406_v55 }
 0x4f8   : > { %v7409_v17 = vpop.f32.mrf.mxu0 }
 0x4fa   : > { %v4393_v32 = vpop.f32.mrf.mxu1  ;;  %v7410_v30 = vpop.f32.mrf.mxu0 }
 0x4fb   : > { %v9930_v15 = vadd.f32 %v7410_v30, %v7409_v17 }
 0x4fc   : > { %v4395_v37 = vpop.f32.mrf.mxu1  ;;  %v7412_v41 = vpop.f32.mrf.mxu0 }
 0x4fe   : > { %v4397_v8 = vpop.f32.mrf.mxu1  ;;  %v7413_v36 = vpop.f32.mrf.mxu0 }
 0x4ff   : > { %v4552_v18 = vpack.c.bf16 %v4397_v8, %v4393_v32  ;;  %v9935_v60 = vadd.f32 %v7413_v36, %v7412_v41 }
 0x500   : > { %v4399_v63 = vpop.f32.mrf.mxu1  ;;  %v7415_v45 = vpop.f32.mrf.mxu0 }
 0x501   : > { %v4553_v13 = vpack.c.bf16 %v4399_v63, %v4395_v37  ;;  %v4624_v9 = vadd.bf16 %v9933_v58, %v4552_v18 }
 0x502   : > { %v4403_v11 = vpop.f32.mrf.mxu1  ;;  %v7416_v59 = vpop.f32.mrf.mxu0 }
 0x503   : > { %v4625_v33 = vadd.bf16 %v9938_v62, %v4553_v13  ;;  %v9942_v50 = vadd.f32 %v7416_v59, %v7415_v45  ;;  %v4656_v29 = vmax.bf16 %v8187_v2, %v4624_v9 }
 0x504   : > { %v4405_v39 = vpop.f32.mrf.mxu1  ;;  %v7418_v21 = vpop.f32.mrf.mxu0 }
 0x505   : > { %v4657_v57 = vmax.bf16 %v8187_v2, %v4625_v33 }
 0x506   : > { %v4407_v14 = vpop.f32.mrf.mxu1  ;;  %v7419_v34 = vpop.f32.mrf.mxu0 }
 0x507   : > { %v4554_v12 = vpack.c.bf16 %v4407_v14, %v4403_v11  ;;  %v9946_v35 = vadd.f32 %v7419_v34, %v7418_v21  ;;  %5720 = vmatprep.mubr.bf16.mxu0 %v4657_v57 }
 0x508   : > { %v4409_v44 = vpop.f32.mrf.mxu1  ;;  %v7421_v20 = vpop.f32.mrf.mxu0  ;;  %5721 = vmatmul.mubr.bf16.vlgmr.msra.gmra.mxu0 %v4656_v29 }
 0x509   : > { %v4555_v3 = vpack.c.bf16 %v4409_v44, %v4405_v39  ;;  %v4626_v6 = vadd.bf16 %v9933_v58, %v4554_v12 }
 0x50a   : > { %v4413_v51 = vpop.f32.mrf.mxu1  ;;  %v7422_v43 = vpop.f32.mrf.mxu0 }
 0x50b   : > { %v4627_v52 = vadd.bf16 %v9938_v62, %v4555_v3  ;;  %v9950_v4 = vadd.f32 %v7422_v43, %v7421_v20  ;;  %v4658_v0 = vmax.bf16 %v8187_v2, %v4626_v6 }
 0x50c   : > { %v4415_v56 = vpop.f32.mrf.mxu1  ;;  %v7424_v31 = vpop.f32.mrf.mxu0 }
 0x50d   : > { %v4659_v55 = vmax.bf16 %v8187_v2, %v4627_v52 }
 0x50e   : > { %v4417_v46 = vpop.f32.mrf.mxu1  ;;  %v7425_v48 = vpop.f32.mrf.mxu0 }
 0x50f   : > { %v4556_v17 = vpack.c.bf16 %v4417_v46, %v4413_v51  ;;  %v9954_v32 = vadd.f32 %v7425_v48, %v7424_v31  ;;  %5728 = vmatprep.mubr.bf16.mxu0 %v4659_v55 }
 0x510   : > { %v4419_v30 = vpop.f32.mrf.mxu1  ;;  %v7427_v23 = vpop.f32.mrf.mxu0  ;;  %5729 = vmatmul.mubr.bf16.gmra.mxu0 %v4658_v0 }
 0x511   : > { %v4557_v10 = vpack.c.bf16 %v4419_v30, %v4415_v56  ;;  %v4628_v37 = vadd.bf16 %v9933_v58, %v4556_v17 }
 0x512   : > { %v4423_v41 = vpop.f32.mrf.mxu1  ;;  %v7428_v8 = vpop.f32.mrf.mxu0 }
 0x513   : > { %v4629_v36 = vadd.bf16 %v9938_v62, %v4557_v10  ;;  %v9958_v18 = vadd.f32 %v7428_v8, %v7427_v23  ;;  %v4660_v9 = vmax.bf16 %v8187_v2, %v4628_v37 }
 0x514   : > { %v4425_v63 = vpop.f32.mrf.mxu1  ;;  %v7430_v45 = vpop.f32.mrf.mxu0 }
 0x515   : > { %v4661_v13 = vmax.bf16 %v8187_v2, %v4629_v36 }
 0x516   : > { %v4427_v11 = vpop.f32.mrf.mxu1  ;;  %v7431_v59 = vpop.f32.mrf.mxu0 }
 0x517   : > { %v4558_v33 = vpack.c.bf16 %v4427_v11, %v4423_v41  ;;  %v9962_v39 = vadd.f32 %v7431_v59, %v7430_v45  ;;  %5736 = vmatprep.mubr.bf16.mxu1 %v4661_v13 }
 0x518   : > { %v4429_v21 = vpop.f32.mrf.mxu1  ;;  %v7433_v57 = vpop.f32.mrf.mxu0  ;;  %5737 = vmatmul.mubr.bf16.vlgmr.msra.gmra.mxu1 %v4660_v9 }
 0x519   : > { %v4559_v29 = vpack.c.bf16 %v4429_v21, %v4425_v63  ;;  %v4630_v14 = vadd.bf16 %v9933_v58, %v4558_v33 }
 0x51a   : > { %v4433_v34 = vpop.f32.mrf.mxu1  ;;  %v7434_v12 = vpop.f32.mrf.mxu0 }
 0x51b   : > { %v4631_v44 = vadd.bf16 %v9938_v62, %v4559_v29  ;;  %v9966_v20 = vadd.f32 %v7434_v12, %v7433_v57  ;;  %v4662_v43 = vmax.bf16 %v8187_v2, %v4630_v14 }
 0x51c   : > { %v4435_v3 = vpop.f32.mrf.mxu1  ;;  %v7436_v6 = vpop.f32.mrf.mxu0 }
 0x51d   : > { %v4663_v51 = vmax.bf16 %v8187_v2, %v4631_v44 }
 0x51e   : > { %v4437_v52 = vpop.f32.mrf.mxu1  ;;  %v7437_v56 = vpop.f32.mrf.mxu0 }
 0x51f   : > { %v4560_v31 = vpack.c.bf16 %v4437_v52, %v4433_v34  ;;  %v9970_v55 = vadd.f32 %v7437_v56, %v7436_v6  ;;  %5744 = vmatprep.mubr.bf16.mxu1 %v4663_v51 }
 0x520   : > { %v4439_v0 = vpop.f32.mrf.mxu1  ;;  %v7439_v46 = vpop.f32.mrf.mxu0  ;;  %5745 = vmatmul.mubr.bf16.gmra.mxu1 %v4662_v43 }
 0x521   : > { %v4561_v48 = vpack.c.bf16 %v4439_v0, %v4435_v3  ;;  %v4632_v17 = vadd.bf16 %v9933_v58, %v4560_v31 }
 0x522   : > { %v4443_v30 = vpop.f32.mrf.mxu1  ;;  %v7440_v23 = vpop.f32.mrf.mxu0 }
 0x523   : > { %v4633_v10 = vadd.bf16 %v9938_v62, %v4561_v48  ;;  %v9974_v37 = vadd.f32 %v7440_v23, %v7439_v46  ;;  %v4664_v63 = vmax.bf16 %v8187_v2, %v4632_v17 }
 0x524   : > { %v4445_v41 = vpop.f32.mrf.mxu1  ;;  %v7442_v8 = vpop.f32.mrf.mxu0 }
 0x525   : > { %v4665_v36 = vmax.bf16 %v8187_v2, %v4633_v10 }
 0x526   : > { %v4447_v45 = vpop.f32.mrf.mxu1  ;;  %v7443_v13 = vpop.f32.mrf.mxu0 }
 0x527   : > { %v4562_v9 = vpack.c.bf16 %v4447_v45, %v4443_v30  ;;  %v9978_v11 = vadd.f32 %v7443_v13, %v7442_v8  ;;  %5752 = vmatprep.mubr.bf16.mxu1 %v4665_v36 }
 0x528   : > { %v4449_v59 = vpop.f32.mrf.mxu1  ;;  %5753 = vmatmul.mubr.bf16.gmra.mxu1 %v4664_v63 }
 0x529   : > { %v4563_v33 = vpack.c.bf16 %v4449_v59, %v4445_v41  ;;  %v4634_v21 = vadd.bf16 %v9933_v58, %v4562_v9 }
 0x52a   : > { %v4453_v57 = vpop.f32.mrf.mxu1 }
 0x52b   : > { %v4635_v29 = vadd.bf16 %v9938_v62, %v4563_v33  ;;  %v4666_v12 = vmax.bf16 %v8187_v2, %v4634_v21 }
 0x52c   : > { %v4455_v14 = vpop.f32.mrf.mxu1 }
 0x52d   : > { %v4667_v34 = vmax.bf16 %v8187_v2, %v4635_v29 }
 0x52e   : > { %v4457_v44 = vpop.f32.mrf.mxu1 }
 0x52f   : > { %v4564_v3 = vpack.c.bf16 %v4457_v44, %v4453_v57  ;;  %5760 = vmatprep.mubr.bf16.mxu1 %v4667_v34 }
 0x530   : > { %v4459_v6 = vpop.f32.mrf.mxu1  ;;  %5761 = vmatmul.mubr.bf16.gmra.mxu1 %v4666_v12 }
 0x531   : > { %v4565_v51 = vpack.c.bf16 %v4459_v6, %v4455_v14  ;;  %v4636_v43 = vadd.bf16 %v9933_v58, %v4564_v3 }
 0x532   : > { %v4463_v52 = vpop.f32.mrf.mxu1 }
 0x533   : > { %v4637_v56 = vadd.bf16 %v9938_v62, %v4565_v51  ;;  %v4668_v46 = vmax.bf16 %v8187_v2, %v4636_v43 }
 0x534   : > { %v4465_v31 = vpop.f32.mrf.mxu1 }
 0x535   : > { %v4669_v0 = vmax.bf16 %v8187_v2, %v4637_v56 }
 0x536   : > { %v4467_v48 = vpop.f32.mrf.mxu1 }
 0x537   : > { %v4566_v17 = vpack.c.bf16 %v4467_v48, %v4463_v52  ;;  %5768 = vmatprep.mubr.bf16.mxu1 %v4669_v0 }
 0x538   : > { %v4469_v30 = vpop.f32.mrf.mxu1  ;;  %5769 = vmatmul.mubr.bf16.gmra.mxu1 %v4668_v46 }
 0x539   : > { %v4567_v23 = vpack.c.bf16 %v4469_v30, %v4465_v31  ;;  %v4638_v10 = vadd.bf16 %v9933_v58, %v4566_v17 }
 0x53a   : > { %v4473_v41 = vpop.f32.mrf.mxu1 }
 0x53b   : > { %v4639_v8 = vadd.bf16 %v9938_v62, %v4567_v23  ;;  %v4670_v45 = vmax.bf16 %v8187_v2, %v4638_v10 }
 0x53c   : > { %v4475_v36 = vpop.f32.mrf.mxu1 }
 0x53d   : > { %v4671_v63 = vmax.bf16 %v8187_v2, %v4639_v8 }
 0x53e   : > { %v4477_v13 = vpop.f32.mrf.mxu1 }
 0x53f   : > { %v4568_v9 = vpack.c.bf16 %v4477_v13, %v4473_v41  ;;  %5776 = vmatprep.mubr.bf16.mxu1 %v4671_v63 }
 0x540   : > { %v4479_v59 = vpop.f32.mrf.mxu1  ;;  %5777 = vmatmul.mubr.bf16.gmra.mxu1 %v4670_v45 }
 0x541   : > { %v4569_v33 = vpack.c.bf16 %v4479_v59, %v4475_v36  ;;  %v4640_v21 = vadd.bf16 %v9933_v58, %v4568_v9 }
 0x542   : > { %v4483_v57 = vpop.f32.mrf.mxu1 }
 0x543   : > { %v4641_v29 = vadd.bf16 %v9938_v62, %v4569_v33  ;;  %v4672_v12 = vmax.bf16 %v8187_v2, %v4640_v21 }
 0x544   : > { %v4485_v14 = vpop.f32.mrf.mxu1 }
 0x545   : > { %v4673_v34 = vmax.bf16 %v8187_v2, %v4641_v29 }
 0x546   : > { %v4487_v44 = vpop.f32.mrf.mxu1 }
 0x547   : > { %v4570_v3 = vpack.c.bf16 %v4487_v44, %v4483_v57  ;;  %5784 = vmatprep.mubr.bf16.mxu1 %v4673_v34 }
 0x548   : > { %v4489_v6 = vpop.f32.mrf.mxu1  ;;  %5785 = vmatmul.mubr.bf16.gmra.mxu1 %v4672_v12 }
 0x549   : > { %v4571_v51 = vpack.c.bf16 %v4489_v6, %v4485_v14  ;;  %v4642_v43 = vadd.bf16 %v9933_v58, %v4570_v3 }
 0x54a   : > { %v4493_v52 = vpop.f32.mrf.mxu1 }
 0x54b   : > { %v4643_v56 = vadd.bf16 %v9938_v62, %v4571_v51  ;;  %v4674_v46 = vmax.bf16 %v8187_v2, %v4642_v43 }
 0x54c   : > { %v4495_v31 = vpop.f32.mrf.mxu1 }
 0x54d   : > { %v4675_v0 = vmax.bf16 %v8187_v2, %v4643_v56 }
 0x54e   : > { %v4497_v48 = vpop.f32.mrf.mxu1 }
 0x54f   : > { %v4572_v17 = vpack.c.bf16 %v4497_v48, %v4493_v52  ;;  %5792 = vmatprep.mubr.bf16.mxu1 %v4675_v0 }
 0x550   : > { %v4499_v30 = vpop.f32.mrf.mxu1  ;;  %5793 = vmatmul.mubr.bf16.gmra.mxu1 %v4674_v46 }
 0x551   : > { %v4573_v23 = vpack.c.bf16 %v4499_v30, %v4495_v31  ;;  %v4644_v10 = vadd.bf16 %v9933_v58, %v4572_v17 }
 0x552   : > { %v4503_v41 = vpop.f32.mrf.mxu1 }
 0x553   : > { %v4645_v8 = vadd.bf16 %v9938_v62, %v4573_v23  ;;  %v4676_v45 = vmax.bf16 %v8187_v2, %v4644_v10 }
 0x554   : > { %v4505_v36 = vpop.f32.mrf.mxu1 }
 0x555   : > { %v4677_v63 = vmax.bf16 %v8187_v2, %v4645_v8 }
 0x556   : > { %v4507_v13 = vpop.f32.mrf.mxu1 }
 0x557   : > { %v4574_v9 = vpack.c.bf16 %v4507_v13, %v4503_v41  ;;  %5800 = vmatprep.mubr.bf16.mxu1 %v4677_v63 }
 0x558   : > { %v4509_v59 = vpop.f32.mrf.mxu1  ;;  %5801 = vmatmul.mubr.bf16.gmra.mxu1 %v4676_v45 }
 0x559   : > { %v4575_v33 = vpack.c.bf16 %v4509_v59, %v4505_v36  ;;  %v4646_v21 = vadd.bf16 %v9933_v58, %v4574_v9 }
 0x55a   : > { %v4513_v57 = vpop.f32.mrf.mxu1 }
 0x55b   : > { %v4647_v29 = vadd.bf16 %v9938_v62, %v4575_v33  ;;  %v4678_v12 = vmax.bf16 %v8187_v2, %v4646_v21 }
 0x55c   : > { %v4515_v14 = vpop.f32.mrf.mxu1 }
 0x55d   : > { %v4679_v34 = vmax.bf16 %v8187_v2, %v4647_v29 }
 0x55e   : > { %v4517_v44 = vpop.f32.mrf.mxu1 }
 0x55f   : > { %v4576_v3 = vpack.c.bf16 %v4517_v44, %v4513_v57  ;;  %5808 = vmatprep.mubr.bf16.mxu1 %v4679_v34 }
 0x560   : > { %v4519_v6 = vpop.f32.mrf.mxu1  ;;  %5809 = vmatmul.mubr.bf16.gmra.mxu1 %v4678_v12 }
 0x561   : > { %v4577_v51 = vpack.c.bf16 %v4519_v6, %v4515_v14  ;;  %v4648_v43 = vadd.bf16 %v9933_v58, %v4576_v3 }
 0x562   : > { %v4523_v52 = vpop.f32.mrf.mxu1 }
 0x563   : > { %v4649_v56 = vadd.bf16 %v9938_v62, %v4577_v51  ;;  %v4680_v46 = vmax.bf16 %v8187_v2, %v4648_v43 }
 0x564   : > { %v4525_v31 = vpop.f32.mrf.mxu1 }
 0x565   : > { %v4681_v0 = vmax.bf16 %v8187_v2, %v4649_v56 }
 0x566   : > { %v4527_v48 = vpop.f32.mrf.mxu1 }
 0x567   : > { %v4578_v17 = vpack.c.bf16 %v4527_v48, %v4523_v52  ;;  %5816 = vmatprep.mubr.bf16.mxu1 %v4681_v0  ;;  %v10024_v0 = vpop.f32.mrf.mxu0  ;;  %v10031_v48 = vld [vmem:[%s10699_s9] ss:$0 sm:$0xff] }
 0x568   : > { %v4529_v30 = vpop.f32.mrf.mxu1  ;;  %5817 = vmatmul.mubr.bf16.gmra.mxu1 %v4680_v46 }
 0x569   : > { %v4579_v23 = vpack.c.bf16 %v4529_v30, %v4525_v31  ;;  %v4650_v10 = vadd.bf16 %v9933_v58, %v4578_v17  ;;  %v10026_v46 = vpop.f32.mrf.mxu0 }
 0x56a   : > { %v4533_v41 = vpop.f32.mrf.mxu1 }
 0x56b   : > { %v4651_v8 = vadd.bf16 %v9938_v62, %v4579_v23  ;;  %v4682_v45 = vmax.bf16 %v8187_v2, %v4650_v10 }
 0x56c   : > { %v4535_v36 = vpop.f32.mrf.mxu1 }
 0x56d   : > { %v4683_v63 = vmax.bf16 %v8187_v2, %v4651_v8 }
 0x56e   : > { %v4537_v13 = vpop.f32.mrf.mxu1 }
 0x56f   : > { %v4580_v9 = vpack.c.bf16 %v4537_v13, %v4533_v41  ;;  %5824 = vmatprep.mubr.bf16.mxu1 %v4683_v63  ;;  %v5565_v41 = vadd.f32 %v9892_v47, %v10031_v48 }
 0x570   : > { %v4539_v59 = vpop.f32.mrf.mxu1  ;;  %5825 = vmatmul.mubr.bf16.gmra.mxu1 %v4682_v45 }
 0x571   : > { %v4581_v33 = vpack.c.bf16 %v4539_v59, %v4535_v36  ;;  %v4652_v21 = vadd.bf16 %v9933_v58, %v4580_v9 }
 0x572   : > { %v4543_v57 = vpop.f32.mrf.mxu1 }
 0x573   : > { %v4653_v29 = vadd.bf16 %v9938_v62, %v4581_v33  ;;  %v4684_v12 = vmax.bf16 %v8187_v2, %v4652_v21 }
 0x574   : > { %v4545_v14 = vpop.f32.mrf.mxu1 }
 0x575   : > { %v4685_v34 = vmax.bf16 %v8187_v2, %v4653_v29 }
 0x576   : > { %v4547_v44 = vpop.f32.mrf.mxu1 }
 0x577   : > { %v4582_v3 = vpack.c.bf16 %v4547_v44, %v4543_v57  ;;  %5832 = vmatprep.mubr.bf16.mxu1 %v4685_v34  ;;  %v5573_v57 = vadd.f32 %v9896_v49, %v10031_v48  ;;  %v5578_v44 = vadd.f32 %v9898_v42, %v10031_v48 }
 0x578   : > { %v4549_v6 = vpop.f32.mrf.mxu1  ;;  %5833 = vmatmul.mubr.bf16.gmra.mxu1 %v4684_v12 }
 0x579   : > { %v4583_v51 = vpack.c.bf16 %v4549_v6, %v4545_v14  ;;  %v4654_v43 = vadd.bf16 %v9933_v58, %v4582_v3  ;;  %v5562_v58 = vadd.f32 %v9888_v26, %v10031_v48  ;;  %v5570_v26 = vadd.f32 %v9894_v27, %v10031_v48 }
 0x57b   : > { %v4655_v52 = vadd.bf16 %v9938_v62, %v4583_v51  ;;  %v4686_v31 = vmax.bf16 %v8187_v2, %v4654_v43 }
 0x57d   : > { %v4687_v56 = vmax.bf16 %v8187_v2, %v4655_v52  ;;  %v5581_v52 = vadd.f32 %v9900_v1, %v10031_v48 }
 0x57f   : > { %5840 = vmatprep.mubr.bf16.mxu1 %v4687_v56 }
 0x580   : > { %5841 = vmatmul.mubr.bf16.gmra.mxu1 %v4686_v31 }
 0x5c8   : > { %v7464_v17 = vpop.f32.mrf.mxu0 }
 0x5ca   : > { %v7465_v30 = vpop.f32.mrf.mxu0 }
 0x5cb   : > { %v7466_v62 = vadd.f32 %v7465_v30, %v7464_v17 }
 0x5cc   : > { %v7467_v23 = vpop.f32.mrf.mxu0 }
 0x5cd   : > { %v10035_v2 = vadd.f32 %v7466_v62, %v5562_v58  ;;  %v5586_v58 = vadd.f32 %v9902_v54, %v10031_v48 }
 0x5ce   : > { %v7468_v10 = vpop.f32.mrf.mxu0 }
 0x5cf   : > { %v7469_v8 = vadd.f32 %v7468_v10, %v7467_v23  ;;  %v5882_v36 = vsel %vm5881_vm0, %v10035_v2, -inf }
 0x5d0   : > { %v7470_v63 = vpop.f32.mrf.mxu0  ;;  %5883 = vmax.xlane.f32.xlu1 %v5882_v36 }
 0x5d1   : > { %v10041_v45 = vadd.f32 %v7469_v8, %v5565_v41  ;;  %v5589_v8 = vadd.f32 %v9904_v24, %v10031_v48 }
 0x5d2   : > { %v7471_v13 = vpop.f32.mrf.mxu0 }
 0x5d3   : > { %v7472_v9 = vadd.f32 %v7471_v13, %v7470_v63  ;;  %v5885_v59 = vsel %vm5881_vm0, %v10041_v45, -inf }
 0x5d4   : > { %v7473_v33 = vpop.f32.mrf.mxu0  ;;  %5886 = vmax.xlane.f32.xlu0 %v5885_v59 }
 0x5d5   : > { %v10047_v21 = vadd.f32 %v7472_v9, %v5570_v26  ;;  %v5594_v9 = vadd.f32 %v9906_v40, %v10031_v48 }
 0x5d6   : > { %v7474_v47 = vpop.f32.mrf.mxu0 }
 0x5d7   : > { %v7475_v29 = vadd.f32 %v7474_v47, %v7473_v33  ;;  %v5888_v14 = vsel %vm5881_vm0, %v10047_v21, -inf }
 0x5d8   : > { %v7476_v34 = vpop.f32.mrf.mxu1  ;;  %5889 = vmax.xlane.f32.xlu0 %v5888_v14 }
 0x5d9   : > { %v10053_v12 = vadd.f32 %v7475_v29, %v5573_v57  ;;  %v5597_v29 = vadd.f32 %v9908_v61, %v10031_v48 }
 0x5da   : > { %v7477_v27 = vpop.f32.mrf.mxu1 }
 0x5db   : > { %v7478_v3 = vadd.f32 %v7477_v27, %v7476_v34  ;;  %v5891_v6 = vsel %vm5881_vm0, %v10053_v12, -inf }
 0x5dc   : > { %v7479_v51 = vpop.f32.mrf.mxu1  ;;  %5892 = vmax.xlane.f32.xlu1 %v5891_v6 }
 0x5dd   : > { %v10059_v43 = vadd.f32 %v7478_v3, %v5578_v44  ;;  %v5602_v3 = vadd.f32 %v9910_v7, %v10031_v48 }
 0x5de   : > { %v7480_v49 = vpop.f32.mrf.mxu1 }
 0x5df   : > { %v7481_v56 = vadd.f32 %v7480_v49, %v7479_v51  ;;  %v5894_v31 = vsel %vm5881_vm0, %v10059_v43, -inf }
 0x5e0   : > { %v7482_v17 = vpop.f32.mrf.mxu1  ;;  %5895 = vmax.xlane.f32.xlu0 %v5894_v31 }
 0x5e1   : > { %v10065_v30 = vadd.f32 %v7481_v56, %v5581_v52  ;;  %v5605_v56 = vadd.f32 %v9912_v28, %v10031_v48 }
 0x5e2   : > { %v7483_v42 = vpop.f32.mrf.mxu1 }
 0x5e3   : > { %v7484_v62 = vadd.f32 %v7483_v42, %v7482_v17  ;;  %v5897_v23 = vsel %vm5881_vm0, %v10065_v30, -inf }
 0x5e4   : > { %v7485_v10 = vpop.f32.mrf.mxu1  ;;  %5898 = vmax.xlane.f32.xlu1 %v5897_v23 }
 0x5e5   : > { %v10071_v41 = vadd.f32 %v7484_v62, %v5586_v58  ;;  %v5610_v62 = vadd.f32 %v9914_v22, %v10031_v48 }
 0x5e6   : > { %v7486_v1 = vpop.f32.mrf.mxu1 }
 0x5e7   : > { %v7487_v36 = vadd.f32 %v7486_v1, %v7485_v10  ;;  %v5900_v63 = vsel %vm5881_vm0, %v10071_v41, -inf }
 0x5e8   : > { %v7488_v13 = vpop.f32.mrf.mxu1  ;;  %5901 = vmax.xlane.f32.xlu0 %v5900_v63 }
 0x5e9   : > { %v10077_v26 = vadd.f32 %v7487_v36, %v5589_v8  ;;  %v5613_v36 = vadd.f32 %v9916_v25, %v10031_v48 }
 0x5ea   : > { %v7489_v54 = vpop.f32.mrf.mxu1 }
 0x5eb   : > { %v7490_v59 = vadd.f32 %v7489_v54, %v7488_v13  ;;  %v5903_v33 = vsel %vm5881_vm0, %v10077_v26, -inf }
 0x5ec   : > { %v7491_v47 = vpop.f32.mrf.mxu1  ;;  %5904 = vmax.xlane.f32.xlu1 %v5903_v33 }
 0x5ed   : > { %v10083_v57 = vadd.f32 %v7490_v59, %v5594_v9  ;;  %v5618_v59 = vadd.f32 %v9918_v38, %v10031_v48 }
 0x5ee   : > { %v7492_v24 = vpop.f32.mrf.mxu1 }
 0x5ef   : > { %v7493_v14 = vadd.f32 %v7492_v24, %v7491_v47  ;;  %v5906_v34 = vsel %vm5881_vm0, %v10083_v57, -inf }
 0x5f0   : > { %v7494_v27 = vpop.f32.mrf.mxu1  ;;  %5907 = vmax.xlane.f32.xlu0 %v5906_v34 }
 0x5f1   : > { %v10089_v44 = vadd.f32 %v7493_v14, %v5597_v29  ;;  %v5621_v14 = vadd.f32 %v9920_v19, %v10031_v48 }
 0x5f2   : > { %v7495_v40 = vpop.f32.mrf.mxu1 }
 0x5f3   : > { %v7496_v6 = vadd.f32 %v7495_v40, %v7494_v27  ;;  %v5909_v51 = vsel %vm5881_vm0, %v10089_v44, -inf }
 0x5f4   : > { %v7497_v49 = vpop.f32.mrf.mxu1  ;;  %5910 = vmax.xlane.f32.xlu1 %v5909_v51 }
 0x5f5   : > { %v10095_v52 = vadd.f32 %v7496_v6, %v5602_v3  ;;  %v5626_v6 = vadd.f32 %v9922_v53, %v10031_v48 }
 0x5f6   : > { %v7498_v61 = vpop.f32.mrf.mxu1 }
 0x5f7   : > { %v7499_v31 = vadd.f32 %v7498_v61, %v7497_v49  ;;  %v5912_v17 = vsel %vm5881_vm0, %v10095_v52, -inf }
 0x5f8   : > { %v7500_v42 = vpop.f32.mrf.mxu1  ;;  %5913 = vmax.xlane.f32.xlu0 %v5912_v17 }
 0x5f9   : > { %v10101_v58 = vadd.f32 %v7499_v31, %v5605_v56  ;;  %v5629_v31 = vadd.f32 %v9924_v5, %v10031_v48 }
 0x5fa   : > { %v7501_v7 = vpop.f32.mrf.mxu1 }
 0x5fb   : > { %v7502_v23 = vadd.f32 %v7501_v7, %v7500_v42  ;;  %v5915_v10 = vsel %vm5881_vm0, %v10101_v58, -inf }
 0x5fc   : > { %v7503_v1 = vpop.f32.mrf.mxu1  ;;  %5916 = vmax.xlane.f32.xlu1 %v5915_v10 }
 0x5fd   : > { %v10107_v8 = vadd.f32 %v7502_v23, %v5610_v62  ;;  %v5634_v23 = vadd.f32 %v9927_v16, %v10031_v48 }
 0x5fe   : > { %v7504_v28 = vpop.f32.mrf.mxu1 }
 0x5ff   : > { %v7505_v63 = vadd.f32 %v7504_v28, %v7503_v1  ;;  %v5918_v13 = vsel %vm5881_vm0, %v10107_v8, -inf }
 0x600   : > { %v7506_v54 = vpop.f32.mrf.mxu1  ;;  %5919 = vmax.xlane.f32.xlu0 %v5918_v13 }
 0x601   : > { %v10113_v9 = vadd.f32 %v7505_v63, %v5613_v36  ;;  %v5637_v63 = vadd.f32 %v9930_v15, %v10031_v48 }
 0x602   : > { %v7507_v22 = vpop.f32.mrf.mxu1 }
 0x603   : > { %v7508_v33 = vadd.f32 %v7507_v22, %v7506_v54  ;;  %v5921_v47 = vsel %vm5881_vm0, %v10113_v9, -inf }
 0x604   : > { %v7509_v24 = vpop.f32.mrf.mxu1  ;;  %5922 = vmax.xlane.f32.xlu1 %v5921_v47 }
 0x605   : > { %v10119_v29 = vadd.f32 %v7508_v33, %v5618_v59  ;;  %v5642_v33 = vadd.f32 %v9935_v60, %v10031_v48 }
 0x606   : > { %v7510_v25 = vpop.f32.mrf.mxu1 }
 0x607   : > { %v7511_v34 = vadd.f32 %v7510_v25, %v7509_v24  ;;  %v5924_v27 = vsel %vm5881_vm0, %v10119_v29, -inf }
 0x608   : > { %v7512_v40 = vpop.f32.mrf.mxu1  ;;  %5925 = vmax.xlane.f32.xlu0 %v5924_v27 }
 0x609   : > { %v10125_v3 = vadd.f32 %v7511_v34, %v5621_v14  ;;  %v5645_v34 = vadd.f32 %v9942_v50, %v10031_v48 }
 0x60a   : > { %v7513_v38 = vpop.f32.mrf.mxu1 }
 0x60b   : > { %v7514_v51 = vadd.f32 %v7513_v38, %v7512_v40  ;;  %v5927_v49 = vsel %vm5881_vm0, %v10125_v3, -inf }
 0x60c   : > { %v7515_v61 = vpop.f32.mrf.mxu1  ;;  %5928 = vmax.xlane.f32.xlu1 %v5927_v49 }
 0x60d   : > { %v10131_v56 = vadd.f32 %v7514_v51, %v5626_v6  ;;  %v5650_v51 = vadd.f32 %v9946_v35, %v10031_v48 }
 0x60e   : > { %v7516_v19 = vpop.f32.mrf.mxu1 }
 0x60f   : > { %v7517_v17 = vadd.f32 %v7516_v19, %v7515_v61  ;;  %v5930_v42 = vsel %vm5881_vm0, %v10131_v56, -inf }
 0x610   : > { %v7518_v7 = vpop.f32.mrf.mxu1  ;;  %5931 = vmax.xlane.f32.xlu0 %v5930_v42 }
 0x611   : > { %v10137_v62 = vadd.f32 %v7517_v17, %v5629_v31  ;;  %v5653_v17 = vadd.f32 %v9950_v4, %v10031_v48 }
 0x612   : > { %v7519_v53 = vpop.f32.mrf.mxu1 }
 0x613   : > { %v7520_v10 = vadd.f32 %v7519_v53, %v7518_v7  ;;  %v5933_v1 = vsel %vm5881_vm0, %v10137_v62, -inf }
 0x614   : > { %v7521_v28 = vpop.f32.mrf.mxu1  ;;  %5934 = vmax.xlane.f32.xlu1 %v5933_v1 }
 0x615   : > { %v10143_v36 = vadd.f32 %v7520_v10, %v5634_v23  ;;  %v5658_v10 = vadd.f32 %v9954_v32, %v10031_v48 }
 0x616   : > { %v7522_v5 = vpop.f32.mrf.mxu1 }
 0x617   : > { %v7523_v13 = vadd.f32 %v7522_v5, %v7521_v28  ;;  %v5936_v54 = vsel %vm5881_vm0, %v10143_v36, -inf }
 0x618   : > { %v7524_v22 = vpop.f32.mrf.mxu1  ;;  %5937 = vmax.xlane.f32.xlu0 %v5936_v54 }
 0x619   : > { %v10149_v59 = vadd.f32 %v7523_v13, %v5637_v63  ;;  %v5661_v13 = vadd.f32 %v9958_v18, %v10031_v48 }
 0x61a   : > { %v7525_v16 = vpop.f32.mrf.mxu1 }
 0x61b   : > { %10727 = vst [vmem:[#allocation4_spill] sm:$0xff] %v10149_v59  ;;  %v7526_v47 = vadd.f32 %v7525_v16, %v7524_v22  ;;  %v5939_v24 = vsel %vm5881_vm0, %v10149_v59, -inf }
 0x61c   : > { %v7527_v25 = vpop.f32.mrf.mxu1  ;;  %5940 = vmax.xlane.f32.xlu1 %v5939_v24 }
 0x61d   : > { %v10155_v14 = vadd.f32 %v7526_v47, %v5642_v33  ;;  %v5666_v47 = vadd.f32 %v9962_v39, %v10031_v48 }
 0x61e   : > { %v7528_v15 = vpop.f32.mrf.mxu1 }
 0x61f   : > { %10728 = vst [vmem:[#allocation5_spill] sm:$0xff] %v10155_v14  ;;  %v7529_v27 = vadd.f32 %v7528_v15, %v7527_v25  ;;  %v5942_v40 = vsel %vm5881_vm0, %v10155_v14, -inf }
 0x620   : > { %v7530_v38 = vpop.f32.mrf.mxu1  ;;  %5943 = vmax.xlane.f32.xlu0 %v5942_v40 }
 0x621   : > { %v10161_v6 = vadd.f32 %v7529_v27, %v5645_v34  ;;  %v5669_v27 = vadd.f32 %v9966_v20, %v10031_v48 }
 0x622   : > { %v7531_v60 = vpop.f32.mrf.mxu1 }
 0x623   : > { %10729 = vst [vmem:[#allocation6_spill] sm:$0xff] %v10161_v6  ;;  %v7532_v49 = vadd.f32 %v7531_v60, %v7530_v38  ;;  %v5945_v61 = vsel %vm5881_vm0, %v10161_v6, -inf }
 0x624   : > { %v7533_v19 = vpop.f32.mrf.mxu1  ;;  %5946 = vmax.xlane.f32.xlu1 %v5945_v61 }
 0x625   : > { %v10167_v31 = vadd.f32 %v7532_v49, %v5650_v51  ;;  %v5674_v49 = vadd.f32 %v9970_v55, %v10031_v48 }
 0x626   : > { %v7534_v50 = vpop.f32.mrf.mxu1 }
 0x627   : > { %10730 = vst [vmem:[#allocation7_spill] sm:$0xff] %v10167_v31  ;;  %v7535_v42 = vadd.f32 %v7534_v50, %v7533_v19  ;;  %v5948_v7 = vsel %vm5881_vm0, %v10167_v31, -inf }
 0x628   : > { %v7536_v53 = vpop.f32.mrf.mxu1  ;;  %5949 = vmax.xlane.f32.xlu0 %v5948_v7 }
 0x629   : > { %v10173_v23 = vadd.f32 %v7535_v42, %v5653_v17  ;;  %v5677_v42 = vadd.f32 %v9974_v37, %v10031_v48 }
 0x62a   : > { %v7537_v35 = vpop.f32.mrf.mxu1 }
 0x62b   : > { %10731 = vst [vmem:[#allocation8_spill] sm:$0xff] %v10173_v23  ;;  %v7538_v1 = vadd.f32 %v7537_v35, %v7536_v53  ;;  %v5951_v28 = vsel %vm5881_vm0, %v10173_v23, -inf }
 0x62c   : > { %v7539_v5 = vpop.f32.mrf.mxu1  ;;  %5952 = vmax.xlane.f32.xlu1 %v5951_v28  ;;  %v7447_v28 = vadd.f32 %v10026_v46, %v10024_v0 }
 0x62d   : > { %v10179_v63 = vadd.f32 %v7538_v1, %v5658_v10  ;;  %v5682_v1 = vadd.f32 %v9978_v11, %v10031_v48 }
 0x62e   : > { %v7540_v4 = vpop.f32.mrf.mxu1 }
 0x62f   : > { %10732 = vst [vmem:[#allocation9_spill] sm:$0xff] %v10179_v63  ;;  %v7541_v54 = vadd.f32 %v7540_v4, %v7539_v5  ;;  %v5954_v22 = vsel %vm5881_vm0, %v10179_v63, -inf }
 0x630   : > { %v7542_v16 = vpop.f32.mrf.mxu1  ;;  %5955 = vmax.xlane.f32.xlu0 %v5954_v22  ;;  %v5685_v22 = vadd.f32 %v7447_v28, %v10031_v48 }
 0x631   : > { %v10185_v33 = vadd.f32 %v7541_v54, %v5661_v13 }
 0x632   : > { %v7543_v32 = vpop.f32.mrf.mxu1 }
 0x633   : > { %10733 = vst [vmem:[#allocation10_spill] sm:$0xff] %v10185_v33  ;;  %v7544_v24 = vadd.f32 %v7543_v32, %v7542_v16  ;;  %v5957_v25 = vsel %vm5881_vm0, %v10185_v33, -inf }
 0x634   : > { %v7545_v15 = vpop.f32.mrf.mxu1  ;;  %5958 = vmax.xlane.f32.xlu1 %v5957_v25 }
 0x635   : > { %v10191_v34 = vadd.f32 %v7544_v24, %v5666_v47 }
 0x636   : > { %v7546_v18 = vpop.f32.mrf.mxu1 }
 0x637   : > { %10734 = vst [vmem:[#allocation11_spill] sm:$0xff] %v10191_v34  ;;  %v7547_v40 = vadd.f32 %v7546_v18, %v7545_v15  ;;  %v5960_v38 = vsel %vm5881_vm0, %v10191_v34, -inf }
 0x638   : > { %v7548_v60 = vpop.f32.mrf.mxu1  ;;  %5961 = vmax.xlane.f32.xlu0 %v5960_v38 }
 0x639   : > { %v10197_v51 = vadd.f32 %v7547_v40, %v5669_v27 }
 0x63a   : > { %v7549_v39 = vpop.f32.mrf.mxu1 }
 0x63b   : > { %10735 = vst [vmem:[#allocation12_spill] sm:$0xff] %v10197_v51  ;;  %v7550_v61 = vadd.f32 %v7549_v39, %v7548_v60  ;;  %v5963_v19 = vsel %vm5881_vm0, %v10197_v51, -inf }
 0x63c   : > { %v7551_v50 = vpop.f32.mrf.mxu1  ;;  %5964 = vmax.xlane.f32.xlu1 %v5963_v19 }
 0x63d   : > { %v10203_v17 = vadd.f32 %v7550_v61, %v5674_v49 }
 0x63e   : > { %v7552_v20 = vpop.f32.mrf.mxu1 }
 0x63f   : > { %10736 = vst [vmem:[#allocation13_spill] sm:$0xff] %v10203_v17  ;;  %v7553_v7 = vadd.f32 %v7552_v20, %v7551_v50  ;;  %v5966_v53 = vsel %vm5881_vm0, %v10203_v17, -inf }
 0x640   : > { %v7554_v35 = vpop.f32.mrf.mxu1  ;;  %5967 = vmax.xlane.f32.xlu0 %v5966_v53 }
 0x641   : > { %v10209_v10 = vadd.f32 %v7553_v7, %v5677_v42 }
 0x642   : > { %v7555_v55 = vpop.f32.mrf.mxu1 }
 0x643   : > { %10737 = vst [vmem:[#allocation14_spill] sm:$0xff] %v10209_v10  ;;  %v7556_v5 = vadd.f32 %v7555_v55, %v7554_v35  ;;  %v5969_v4 = vsel %vm5881_vm0, %v10209_v10, -inf }
 0x644   : > { %v7557_v37 = vpop.f32.mrf.mxu1  ;;  %5970 = vmax.xlane.f32.xlu1 %v5969_v4 }
 0x645   : > { %v10217_v13 = vadd.f32 %v7556_v5, %v5682_v1 }
 0x646   : > { %v7558_v54 = vpop.f32.mrf.mxu1 }
 0x647   : > { %10738 = vst [vmem:[#allocation15_spill] sm:$0xff] %v10217_v13  ;;  %v7559_v16 = vadd.f32 %v7558_v54, %v7557_v37  ;;  %v5972_v32 = vsel %vm5881_vm0, %v10217_v13, -inf }
 0x648   : > { %5973 = vmax.xlane.f32.xlu0 %v5972_v32 }
 0x649   : > { %v10222_v11 = vadd.f32 %v7559_v16, %v5685_v22 }
 0x64b   : > { %10739 = vst [vmem:[#allocation16_spill] sm:$0xff] %v10222_v11  ;;  %v5975_v0 = vsel %vm5881_vm0, %v10222_v11, -inf }
 0x64c   : > { %5976 = vmax.xlane.f32.xlu1 %v5975_v0 }
 0x659   : > { %v5884_v46 = vpop.xlane.xlu1 %5883 }
 0x65a   : > { %v5978_v47 = vsub.f32 %v10035_v2, %v5884_v46 }
 0x65c   : > { %v6010_v24 = vmul.f32 1.442695, %v5978_v47 }
 0x65d   : > { %v5887_v25 = vpop.xlane.xlu0 %5886 }
 0x65e   : > { %7964 = vpow2.f32 %v6010_v24  ;;  %v5979_v15 = vsub.f32 %v10041_v45, %v5887_v25 }
 0x660   : > { %v6012_v48 = vmul.f32 1.442695, %v5979_v15 }
 0x661   : > { %v5890_v18 = vpop.xlane.xlu0 %5889 }
 0x662   : > { %7966 = vpow2.f32 %v6012_v48  ;;  %v5980_v27 = vsub.f32 %v10047_v21, %v5890_v18 }
 0x664   : > { %v6014_v40 = vmul.f32 1.442695, %v5980_v27 }
 0x665   : > { %v5893_v38 = vpop.xlane.xlu1 %5892 }
 0x666   : > { %7968 = vpow2.f32 %v6014_v40  ;;  %v5981_v60 = vsub.f32 %v10053_v12, %v5893_v38 }
 0x668   : > { %v6016_v39 = vmul.f32 1.442695, %v5981_v60 }
 0x669   : > { %v5896_v49 = vpop.xlane.xlu0 %5895 }
 0x66a   : > { %7970 = vpow2.f32 %v6016_v39  ;;  %v5982_v61 = vsub.f32 %v10059_v43, %v5896_v49 }
 0x66b   : > { %v10231_v19 = vpop.eup %7964 }
 0x66c   : > { %v6018_v50 = vmul.f32 1.442695, %v5982_v61  ;;  %6106 = vrot.lane.b32.xlu0 %v10231_v19, %s8189_s20 }
 0x66d   : > { %v5899_v20 = vpop.xlane.xlu1 %5898 }
 0x66e   : > { %7972 = vpow2.f32 %v6018_v50  ;;  %v5983_v42 = vsub.f32 %v10065_v30, %v5899_v20 }
 0x66f   : > { %v10236_v7 = vpop.eup %7966 }
 0x670   : > { %v6020_v53 = vmul.f32 1.442695, %v5983_v42  ;;  %6108 = vrot.lane.b32.xlu1 %v10236_v7, %s8189_s20 }
 0x671   : > { %v5902_v35 = vpop.xlane.xlu0 %5901 }
 0x672   : > { %7974 = vpow2.f32 %v6020_v53  ;;  %v5984_v55 = vsub.f32 %v10071_v41, %v5902_v35 }
 0x673   : > { %v10241_v1 = vpop.eup %7968 }
 0x674   : > { %v6022_v28 = vmul.f32 1.442695, %v5984_v55  ;;  %6110 = vrot.lane.b32.xlu1 %v10241_v1, %s8189_s20 }
 0x675   : > { %v5905_v5 = vpop.xlane.xlu1 %5904 }
 0x676   : > { %7976 = vpow2.f32 %v6022_v28  ;;  %v5985_v4 = vsub.f32 %v10077_v26, %v5905_v5 }
 0x677   : > { %v10246_v37 = vpop.eup %7970 }
 0x678   : > { %v6024_v54 = vmul.f32 1.442695, %v5985_v4  ;;  %6112 = vrot.lane.b32.xlu0 %v10246_v37, %s8189_s20 }
 0x679   : > { %v5908_v22 = vpop.xlane.xlu0 %5907 }
 0x67a   : > { %7978 = vpow2.f32 %v6024_v54  ;;  %v5986_v16 = vsub.f32 %v10083_v57, %v5908_v22 }
 0x67b   : > { %v10251_v32 = vpop.eup %7972 }
 0x67c   : > { %v6026_v0 = vmul.f32 1.442695, %v5986_v16  ;;  %6114 = vrot.lane.b32.xlu1 %v10251_v32, %s8189_s20 }
 0x67d   : > { %v5911_v46 = vpop.xlane.xlu1 %5910 }
 0x67e   : > { %7980 = vpow2.f32 %v6026_v0  ;;  %v5987_v47 = vsub.f32 %v10089_v44, %v5911_v46 }
 0x67f   : > { %v10256_v24 = vpop.eup %7974 }
 0x680   : > { %v6028_v25 = vmul.f32 1.442695, %v5987_v47  ;;  %6116 = vrot.lane.b32.xlu0 %v10256_v24, %s8189_s20 }
 0x681   : > { %v5914_v15 = vpop.xlane.xlu0 %5913 }
 0x682   : > { %7982 = vpow2.f32 %v6028_v25  ;;  %v5988_v48 = vsub.f32 %v10095_v52, %v5914_v15 }
 0x683   : > { %v10261_v18 = vpop.eup %7976 }
 0x684   : > { %v6030_v27 = vmul.f32 1.442695, %v5988_v48  ;;  %6118 = vrot.lane.b32.xlu1 %v10261_v18, %s8189_s20 }
 0x685   : > { %v5917_v40 = vpop.xlane.xlu1 %5916 }
 0x686   : > { %7984 = vpow2.f32 %v6030_v27  ;;  %v5989_v38 = vsub.f32 %v10101_v58, %v5917_v40 }
 0x687   : > { %v10266_v60 = vpop.eup %7978 }
 0x688   : > { %v6032_v39 = vmul.f32 1.442695, %v5989_v38  ;;  %6120 = vrot.lane.b32.xlu0 %v10266_v60, %s8189_s20 }
 0x689   : > { %v5920_v49 = vpop.xlane.xlu0 %5919 }
 0x68a   : > { %7986 = vpow2.f32 %v6032_v39  ;;  %v5990_v61 = vsub.f32 %v10107_v8, %v5920_v49 }
 0x68b   : > { %v10271_v50 = vpop.eup %7980 }
 0x68c   : > { %v6034_v20 = vmul.f32 1.442695, %v5990_v61  ;;  %6122 = vrot.lane.b32.xlu1 %v10271_v50, %s8189_s20 }
 0x68d   : > { %v5923_v42 = vpop.xlane.xlu1 %5922 }
 0x68e   : > { %7988 = vpow2.f32 %v6034_v20  ;;  %v5991_v53 = vsub.f32 %v10113_v9, %v5923_v42 }
 0x68f   : > { %v10276_v35 = vpop.eup %7982 }
 0x690   : > { %v6036_v55 = vmul.f32 1.442695, %v5991_v53  ;;  %6124 = vrot.lane.b32.xlu0 %v10276_v35, %s8189_s20 }
 0x691   : > { %v5926_v28 = vpop.xlane.xlu0 %5925 }
 0x692   : > { %7990 = vpow2.f32 %v6036_v55  ;;  %v5992_v5 = vsub.f32 %v10119_v29, %v5926_v28 }
 0x693   : > { %v10281_v4 = vpop.eup %7984 }
 0x694   : > { %v6038_v54 = vmul.f32 1.442695, %v5992_v5  ;;  %6126 = vrot.lane.b32.xlu1 %v10281_v4, %s8189_s20 }
 0x695   : > { %v5929_v22 = vpop.xlane.xlu1 %5928 }
 0x696   : > { %7992 = vpow2.f32 %v6038_v54  ;;  %v5993_v16 = vsub.f32 %v10125_v3, %v5929_v22 }
 0x697   : > { %v10286_v0 = vpop.eup %7986 }
 0x698   : > { %v6040_v46 = vmul.f32 1.442695, %v5993_v16  ;;  %6128 = vrot.lane.b32.xlu0 %v10286_v0, %s8189_s20 }
 0x699   : > { %v5932_v47 = vpop.xlane.xlu0 %5931 }
 0x69a   : > { %7994 = vpow2.f32 %v6040_v46  ;;  %v5994_v25 = vsub.f32 %v10131_v56, %v5932_v47 }
 0x69b   : > { %v10291_v15 = vpop.eup %7988 }
 0x69c   : > { %v6042_v48 = vmul.f32 1.442695, %v5994_v25  ;;  %6130 = vrot.lane.b32.xlu1 %v10291_v15, %s8189_s20 }
 0x69d   : > { %v5935_v27 = vpop.xlane.xlu1 %5934 }
 0x69e   : > { %7996 = vpow2.f32 %v6042_v48  ;;  %v5995_v40 = vsub.f32 %v10137_v62, %v5935_v27 }
 0x69f   : > { %v10296_v38 = vpop.eup %7990 }
 0x6a0   : > { %v6044_v39 = vmul.f32 1.442695, %v5995_v40  ;;  %6132 = vrot.lane.b32.xlu0 %v10296_v38, %s8189_s20 }
 0x6a1   : > { %v5938_v49 = vpop.xlane.xlu0 %5937 }
 0x6a2   : > { %7998 = vpow2.f32 %v6044_v39  ;;  %v5996_v61 = vsub.f32 %v10143_v36, %v5938_v49 }
 0x6a3   : > { %v10301_v20 = vpop.eup %7992 }
 0x6a4   : > { %v6046_v42 = vmul.f32 1.442695, %v5996_v61  ;;  %6134 = vrot.lane.b32.xlu1 %v10301_v20, %s8189_s20 }
 0x6a5   : > { %v5941_v53 = vpop.xlane.xlu1 %5940 }
 0x6a6   : > { %8000 = vpow2.f32 %v6046_v42  ;;  %v5997_v55 = vsub.f32 %v10149_v59, %v5941_v53 }
 0x6a7   : > { %v10306_v28 = vpop.eup %7994 }
 0x6a8   : > { %v6048_v5 = vmul.f32 1.442695, %v5997_v55  ;;  %6136 = vrot.lane.b32.xlu0 %v10306_v28, %s8189_s20 }
 0x6a9   : > { %v5944_v54 = vpop.xlane.xlu0 %5943 }
 0x6aa   : > { %8002 = vpow2.f32 %v6048_v5  ;;  %v5998_v22 = vsub.f32 %v10155_v14, %v5944_v54 }
 0x6ab   : > { %v10311_v16 = vpop.eup %7996 }
 0x6ac   : > { %v6050_v46 = vmul.f32 1.442695, %v5998_v22  ;;  %6138 = vrot.lane.b32.xlu1 %v10311_v16, %s8189_s20 }
 0x6ad   : > { %v5947_v47 = vpop.xlane.xlu1 %5946 }
 0x6ae   : > { %8004 = vpow2.f32 %v6050_v46  ;;  %v5999_v25 = vsub.f32 %v10161_v6, %v5947_v47 }
 0x6af   : > { %v10316_v48 = vpop.eup %7998 }
 0x6b0   : > { %v6052_v27 = vmul.f32 1.442695, %v5999_v25  ;;  %6140 = vrot.lane.b32.xlu0 %v10316_v48, %s8189_s20 }
 0x6b1   : > { %v5950_v40 = vpop.xlane.xlu0 %5949 }
 0x6b2   : > { %8006 = vpow2.f32 %v6052_v27  ;;  %v6000_v39 = vsub.f32 %v10167_v31, %v5950_v40 }
 0x6b3   : > { %v10321_v49 = vpop.eup %8000 }
 0x6b4   : > { %v6054_v61 = vmul.f32 1.442695, %v6000_v39  ;;  %6142 = vrot.lane.b32.xlu1 %v10321_v49, %s8189_s20 }
 0x6b5   : > { %v5953_v42 = vpop.xlane.xlu1 %5952 }
 0x6b6   : > { %8008 = vpow2.f32 %v6054_v61  ;;  %v6001_v53 = vsub.f32 %v10173_v23, %v5953_v42 }
 0x6b7   : > { %v10326_v55 = vpop.eup %8002 }
 0x6b8   : > { %v6056_v5 = vmul.f32 1.442695, %v6001_v53  ;;  %6144 = vrot.lane.b32.xlu0 %v10326_v55, %s8189_s20 }
 0x6b9   : > { %v5956_v54 = vpop.xlane.xlu0 %5955 }
 0x6ba   : > { %8010 = vpow2.f32 %v6056_v5  ;;  %v6002_v22 = vsub.f32 %v10179_v63, %v5956_v54 }
 0x6bb   : > { %v10331_v46 = vpop.eup %8004 }
 0x6bc   : > { %v6058_v47 = vmul.f32 1.442695, %v6002_v22  ;;  %6146 = vrot.lane.b32.xlu1 %v10331_v46, %s8189_s20 }
 0x6bd   : > { %v5959_v25 = vpop.xlane.xlu1 %5958 }
 0x6be   : > { %8012 = vpow2.f32 %v6058_v47  ;;  %v6003_v27 = vsub.f32 %v10185_v33, %v5959_v25 }
 0x6bf   : > { %v10336_v40 = vpop.eup %8006 }
 0x6c0   : > { %v6060_v39 = vmul.f32 1.442695, %v6003_v27  ;;  %6148 = vrot.lane.b32.xlu0 %v10336_v40, %s8189_s20 }
 0x6c1   : > { %v5962_v61 = vpop.xlane.xlu0 %5961 }
 0x6c2   : > { %8014 = vpow2.f32 %v6060_v39  ;;  %v6004_v42 = vsub.f32 %v10191_v34, %v5962_v61 }
 0x6c3   : > { %v10341_v53 = vpop.eup %8008 }
 0x6c4   : > { %v6062_v5 = vmul.f32 1.442695, %v6004_v42  ;;  %6150 = vrot.lane.b32.xlu1 %v10341_v53, %s8189_s20 }
 0x6c5   : > { %v5965_v54 = vpop.xlane.xlu1 %5964 }
 0x6c6   : > { %8016 = vpow2.f32 %v6062_v5  ;;  %v6005_v22 = vsub.f32 %v10197_v51, %v5965_v54 }
 0x6c7   : > { %v10346_v47 = vpop.eup %8010 }
 0x6c8   : > { %v6064_v25 = vmul.f32 1.442695, %v6005_v22  ;;  %6152 = vrot.lane.b32.xlu0 %v10346_v47, %s8189_s20 }
 0x6c9   : > { %v5968_v27 = vpop.xlane.xlu0 %5967 }
 0x6ca   : > { %8018 = vpow2.f32 %v6064_v25  ;;  %v6006_v39 = vsub.f32 %v10203_v17, %v5968_v27 }
 0x6cb   : > { %v10351_v61 = vpop.eup %8012 }
 0x6cc   : > { %v6066_v42 = vmul.f32 1.442695, %v6006_v39  ;;  %6154 = vrot.lane.b32.xlu1 %v10351_v61, %s8189_s20 }
 0x6cd   : > { %v5971_v34 = vpop.xlane.xlu1 %5970 }
 0x6ce   : > { %8020 = vpow2.f32 %v6066_v42  ;;  %v6007_v5 = vsub.f32 %v10209_v10, %v5971_v34 }
 0x6cf   : > { %v10356_v54 = vpop.eup %8014 }
 0x6d0   : > { %v6068_v22 = vmul.f32 1.442695, %v6007_v5  ;;  %6156 = vrot.lane.b32.xlu0 %v10356_v54, %s8189_s20 }
 0x6d1   : > { %v5974_v5 = vpop.xlane.xlu0 %5973 }
 0x6d2   : > { %8022 = vpow2.f32 %v6068_v22  ;;  %v6008_v22 = vsub.f32 %v10217_v13, %v5974_v5 }
 0x6d3   : > { %v10360_v25 = vpop.eup %8016 }
 0x6d4   : > { %6158 = vrot.lane.b32.xlu1 %v10360_v25, %s8189_s20  ;;  %v6070_v33 = vmul.f32 1.442695, %v6008_v22 }
 0x6d5   : > { %v5977_v42 = vpop.xlane.xlu1 %5976 }
 0x6d6   : > { %v6009_v63 = vsub.f32 %v10222_v11, %v5977_v42  ;;  %8024 = vpow2.f32 %v6070_v33 }
 0x6d7   : > { %v10364_v27 = vpop.eup %8018 }
 0x6d8   : > { %6160 = vrot.lane.b32.xlu0 %v10364_v27, %s8189_s20  ;;  %v6072_v31 = vmul.f32 1.442695, %v6009_v63 }
 0x6da   : > { %8026 = vpow2.f32 %v6072_v31 }
 0x6db   : > { %v10368_v39 = vpop.eup %8020 }
 0x6dc   : > { %6162 = vrot.lane.b32.xlu1 %v10368_v39, %s8189_s20 }
 0x6de   : > { %v6107_v17 = vpop.permute.xlu0 %6106 }
 0x6df   : > { %v10372_v34 = vpop.eup %8022  ;;  %v6203_v23 = vsel %vm6202_vm1, %v6107_v17, 0.0 }
 0x6e0   : > { %6164 = vrot.lane.b32.xlu0 %v10372_v34, %s8189_s20 }
 0x6e2   : > { %v6109_v10 = vpop.permute.xlu1 %6108 }
 0x6e3   : > { %v6206_v51 = vsel %vm6202_vm1, %v6109_v10, 0.0  ;;  %v10380_v6 = vpop.eup %8024 }
 0x6e6   : > { %v6111_v10 = vpop.permute.xlu1 %6110 }
 0x6e7   : > { %v10384_v5 = vpop.eup %8026  ;;  %v6209_v42 = vsel %vm6202_vm1, %v6111_v10, 0.0 }
 0x6ea   : > { %v6113_v22 = vpop.permute.xlu0 %6112 }
 0x6f2   : > { %v6117_v63 = vpop.permute.xlu0 %6116 }
 0x6f3   : > { %v6218_v33 = vsel %vm6202_vm1, %v6117_v63, 0.0 }
 0x6fa   : > { %v6121_v13 = vpop.permute.xlu0 %6120 }
 0x6fb   : > { %v6224_v14 = vsel %vm6202_vm1, %v6121_v13, 0.0 }
 0x6ff   : > { %6207 = vadd.xlane.f32.xlu0 %v6206_v51  ;;  %v6212_v51 = vsel %vm6202_vm1, %v6113_v22, 0.0 }
 0x700   : > { %6204 = vadd.xlane.f32.xlu1 %v6203_v23  ;;  %v6115_v23 = vpop.permute.xlu1 %6114 }
 0x701   : > { %v6215_v31 = vsel %vm6202_vm1, %v6115_v23, 0.0 }
 0x702   : > { %v6125_v10 = vpop.permute.xlu0 %6124 }
 0x704   : > { %v6119_v17 = vpop.permute.xlu1 %6118 }
 0x705   : > { %v6221_v11 = vsel %vm6202_vm1, %v6119_v17, 0.0 }
 0x708   : > { %v6123_v59 = vpop.permute.xlu1 %6122 }
 0x709   : > { %v6227_v22 = vsel %vm6202_vm1, %v6123_v59, 0.0 }
 0x70a   : > { %v6129_v23 = vpop.permute.xlu0 %6128 }
 0x711   : > { %6166 = vrot.lane.b32.xlu1 %v10380_v6, %s8189_s20 }
 0x712   : > { %v6133_v17 = vpop.permute.xlu0 %6132 }
 0x715   : > { %6168 = vrot.lane.b32.xlu0 %v10384_v5, %s8189_s20 }
 0x71a   : > { %v6137_v59 = vpop.permute.xlu0 %6136 }
 0x734   : > { %6210 = vadd.xlane.f32.xlu0 %v6209_v42  ;;  %v6230_v42 = vsel %vm6202_vm1, %v6125_v10, 0.0 }
 0x735   : > { %6213 = vadd.xlane.f32.xlu1 %v6212_v51  ;;  %v6127_v51 = vpop.permute.xlu1 %6126 }
 0x736   : > { %v6233_v63 = vsel %vm6202_vm1, %v6127_v51, 0.0  ;;  %v6141_v51 = vpop.permute.xlu0 %6140 }
 0x738   : > { %6216 = vadd.xlane.f32.xlu0 %v6215_v31  ;;  %v6236_v31 = vsel %vm6202_vm1, %v6129_v23, 0.0 }
 0x739   : > { %6219 = vadd.xlane.f32.xlu1 %v6218_v33  ;;  %v6131_v33 = vpop.permute.xlu1 %6130 }
 0x73a   : > { %v6239_v13 = vsel %vm6202_vm1, %v6131_v33, 0.0  ;;  %v6145_v33 = vpop.permute.xlu0 %6144 }
 0x73c   : > { %6222 = vadd.xlane.f32.xlu0 %v6221_v11 }
 0x73d   : > { %6225 = vadd.xlane.f32.xlu1 %v6224_v14  ;;  %v6242_v14 = vsel %vm6202_vm1, %v6133_v17, 0.0  ;;  %v6135_v11 = vpop.permute.xlu1 %6134 }
 0x73e   : > { %v6245_v10 = vsel %vm6202_vm1, %v6135_v11, 0.0  ;;  %v6149_v11 = vpop.permute.xlu0 %6148 }
 0x740   : > { %6228 = vadd.xlane.f32.xlu0 %v6227_v22  ;;  %v6248_v22 = vsel %vm6202_vm1, %v6137_v59, 0.0 }
 0x741   : > { %6231 = vadd.xlane.f32.xlu1 %v6230_v42  ;;  %v6139_v42 = vpop.permute.xlu1 %6138 }
 0x742   : > { %v6251_v23 = vsel %vm6202_vm1, %v6139_v42, 0.0  ;;  %v6153_v42 = vpop.permute.xlu0 %6152 }
 0x744   : > { %6234 = vadd.xlane.f32.xlu0 %v6233_v63  ;;  %v6254_v63 = vsel %vm6202_vm1, %v6141_v51, 0.0 }
 0x745   : > { %6237 = vadd.xlane.f32.xlu1 %v6236_v31  ;;  %v6143_v31 = vpop.permute.xlu1 %6142 }
 0x746   : > { %v6257_v17 = vsel %vm6202_vm1, %v6143_v31, 0.0  ;;  %v6157_v31 = vpop.permute.xlu0 %6156 }
 0x748   : > { %6240 = vadd.xlane.f32.xlu0 %v6239_v13  ;;  %v6260_v13 = vsel %vm6202_vm1, %v6145_v33, 0.0 }
 0x749   : > { %6243 = vadd.xlane.f32.xlu1 %v6242_v14  ;;  %v6147_v14 = vpop.permute.xlu1 %6146 }
 0x74a   : > { %v6263_v59 = vsel %vm6202_vm1, %v6147_v14, 0.0  ;;  %v6161_v14 = vpop.permute.xlu0 %6160 }
 0x74c   : > { %6246 = vadd.xlane.f32.xlu0 %v6245_v10  ;;  %v6266_v10 = vsel %vm6202_vm1, %v6149_v11, 0.0 }
 0x74d   : > { %6249 = vadd.xlane.f32.xlu1 %v6248_v22  ;;  %v6151_v22 = vpop.permute.xlu1 %6150 }
 0x74e   : > { %v6269_v51 = vsel %vm6202_vm1, %v6151_v22, 0.0 }
 0x750   : > { %6252 = vadd.xlane.f32.xlu0 %v6251_v23  ;;  %v6272_v23 = vsel %vm6202_vm1, %v6153_v42, 0.0 }
 0x751   : > { %6255 = vadd.xlane.f32.xlu1 %v6254_v63  ;;  %v6155_v63 = vpop.permute.xlu1 %6154 }
 0x752   : > { %v6275_v33 = vsel %vm6202_vm1, %v6155_v63, 0.0  ;;  %v6165_v22 = vpop.permute.xlu0 %6164 }
 0x754   : > { %6258 = vadd.xlane.f32.xlu0 %v6257_v17  ;;  %v6278_v17 = vsel %vm6202_vm1, %v6157_v31, 0.0 }
 0x755   : > { %6261 = vadd.xlane.f32.xlu1 %v6260_v13  ;;  %v6159_v13 = vpop.permute.xlu1 %6158 }
 0x756   : > { %v6281_v11 = vsel %vm6202_vm1, %v6159_v13, 0.0 }
 0x758   : > { %6264 = vadd.xlane.f32.xlu0 %v6263_v59  ;;  %v6284_v59 = vsel %vm6202_vm1, %v6161_v14, 0.0 }
 0x759   : > { %6267 = vadd.xlane.f32.xlu1 %v6266_v10  ;;  %v6163_v10 = vpop.permute.xlu1 %6162 }
 0x75a   : > { %v6287_v42 = vsel %vm6202_vm1, %v6163_v10, 0.0 }
 0x75c   : > { %6270 = vadd.xlane.f32.xlu0 %v6269_v51  ;;  %v6290_v51 = vsel %vm6202_vm1, %v6165_v22, 0.0 }
 0x75d   : > { %6273 = vadd.xlane.f32.xlu1 %v6272_v23 }
 0x760   : > { %6276 = vadd.xlane.f32.xlu0 %v6275_v33 }
 0x761   : > { %6279 = vadd.xlane.f32.xlu1 %v6278_v17 }
 0x764   : > { %6282 = vadd.xlane.f32.xlu0 %v6281_v11 }
 0x765   : > { %6285 = vadd.xlane.f32.xlu1 %v6284_v59 }
 0x768   : > { %6288 = vadd.xlane.f32.xlu0 %v6287_v42 }
 0x769   : > { %6291 = vadd.xlane.f32.xlu1 %v6290_v51 }
 0x788   : > { %v6208_v23 = vpop.xlane.xlu0 %6207 }
 0x789   : > { %v6205_v63 = vpop.xlane.xlu1 %6204  ;;  %8028 = vrcp.f32 %v6208_v23 }
 0x78a   : > { %8030 = vrcp.f32 %v6205_v63 }
 0x78c   : > { %v6169_v31 = vpop.permute.xlu0 %6168 }
 0x78d   : > { %v6296_v33 = vsel %vm6202_vm1, %v6169_v31, 0.0  ;;  %v6167_v17 = vpop.permute.xlu1 %6166 }
 0x78e   : > { %v6293_v13 = vsel %vm6202_vm1, %v6167_v17, 0.0  ;;  %6297 = vadd.xlane.f32.xlu1 %v6296_v33 }
 0x78f   : > { %6294 = vadd.xlane.f32.xlu0 %v6293_v13 }
 0x796   : > { %v8029_v14 = vpop.eup %8028 }
 0x797   : > { %v6332_v11 = vmul.f32 %v8029_v14, %v10236_v7  ;;  %v8031_v59 = vpop.eup %8030 }
 0x798   : > { %v6331_v10 = vmul.f32 %v8031_v59, %v10231_v19 }
 0x79f   : > { %6397 = vrot.lane.b32.xlu1 %v6332_v11, %s8190_s22 }
 0x7a5   : > { %6395 = vrot.lane.b32.xlu0 %v6331_v10, %s8190_s22 }
 0x7bd   : > { %v6211_v22 = vpop.xlane.xlu0 %6210 }
 0x7be   : > { %8032 = vrcp.f32 %v6211_v22  ;;  %v6214_v42 = vpop.xlane.xlu1 %6213 }
 0x7bf   : > { %8034 = vrcp.f32 %v6214_v42 }
 0x7c1   : > { %v6217_v51 = vpop.xlane.xlu0 %6216 }
 0x7c2   : > { %8036 = vrcp.f32 %v6217_v51  ;;  %v6220_v23 = vpop.xlane.xlu1 %6219 }
 0x7c3   : > { %8038 = vrcp.f32 %v6220_v23 }
 0x7c5   : > { %v6223_v63 = vpop.xlane.xlu0 %6222 }
 0x7c6   : > { %8040 = vrcp.f32 %v6223_v63  ;;  %v6226_v31 = vpop.xlane.xlu1 %6225 }
 0x7c7   : > { %8042 = vrcp.f32 %v6226_v31 }
 0x7c9   : > { %v6229_v7 = vpop.xlane.xlu0 %6228 }
 0x7ca   : > { %8044 = vrcp.f32 %v6229_v7  ;;  %v6232_v33 = vpop.xlane.xlu1 %6231 }
 0x7cb   : > { %v8033_v17 = vpop.eup %8032  ;;  %8046 = vrcp.f32 %v6232_v33 }
 0x7cc   : > { %v8035_v19 = vpop.eup %8034  ;;  %v6333_v13 = vmul.f32 %v8033_v17, %v10241_v1 }
 0x7cd   : > { %v6235_v14 = vpop.xlane.xlu0 %6234  ;;  %v6334_v11 = vmul.f32 %v8035_v19, %v10246_v37 }
 0x7ce   : > { %8048 = vrcp.f32 %v6235_v14  ;;  %v6238_v59 = vpop.xlane.xlu1 %6237  ;;  %6399 = vrot.lane.b32.xlu1 %v6333_v13, %s8190_s22 }
 0x7cf   : > { %v8037_v10 = vpop.eup %8036  ;;  %8050 = vrcp.f32 %v6238_v59  ;;  %6401 = vrot.lane.b32.xlu0 %v6334_v11, %s8190_s22 }
 0x7d0   : > { %v8039_v22 = vpop.eup %8038  ;;  %v6335_v42 = vmul.f32 %v8037_v10, %v10251_v32 }
 0x7d1   : > { %v6241_v51 = vpop.xlane.xlu0 %6240  ;;  %v6336_v23 = vmul.f32 %v8039_v22, %v10256_v24 }
 0x7d2   : > { %8052 = vrcp.f32 %v6241_v51  ;;  %v6244_v63 = vpop.xlane.xlu1 %6243  ;;  %6403 = vrot.lane.b32.xlu1 %v6335_v42, %s8190_s22 }
 0x7d3   : > { %v8041_v1 = vpop.eup %8040  ;;  %8054 = vrcp.f32 %v6244_v63  ;;  %6405 = vrot.lane.b32.xlu0 %v6336_v23, %s8190_s22 }
 0x7d4   : > { %v8043_v37 = vpop.eup %8042  ;;  %v6337_v31 = vmul.f32 %v8041_v1, %v10261_v18 }
 0x7d5   : > { %v6247_v7 = vpop.xlane.xlu0 %6246  ;;  %v6338_v33 = vmul.f32 %v8043_v37, %v10266_v60 }
 0x7d6   : > { %8056 = vrcp.f32 %v6247_v7  ;;  %v6250_v17 = vpop.xlane.xlu1 %6249  ;;  %6407 = vrot.lane.b32.xlu1 %v6337_v31, %s8190_s22 }
 0x7d7   : > { %v8045_v32 = vpop.eup %8044  ;;  %8058 = vrcp.f32 %v6250_v17  ;;  %6409 = vrot.lane.b32.xlu0 %v6338_v33, %s8190_s22 }
 0x7d8   : > { %v8047_v24 = vpop.eup %8046  ;;  %v6339_v19 = vmul.f32 %v8045_v32, %v10271_v50 }
 0x7d9   : > { %v6253_v13 = vpop.xlane.xlu0 %6252  ;;  %v6340_v14 = vmul.f32 %v8047_v24, %v10276_v35 }
 0x7da   : > { %8060 = vrcp.f32 %v6253_v13  ;;  %v6256_v11 = vpop.xlane.xlu1 %6255  ;;  %6411 = vrot.lane.b32.xlu1 %v6339_v19, %s8190_s22 }
 0x7db   : > { %v8049_v18 = vpop.eup %8048  ;;  %8062 = vrcp.f32 %v6256_v11  ;;  %6413 = vrot.lane.b32.xlu0 %v6340_v14, %s8190_s22 }
 0x7dc   : > { %v8051_v60 = vpop.eup %8050  ;;  %v6341_v59 = vmul.f32 %v8049_v18, %v10281_v4 }
 0x7dd   : > { %v6259_v10 = vpop.xlane.xlu0 %6258  ;;  %v6342_v22 = vmul.f32 %v8051_v60, %v10286_v0 }
 0x7de   : > { %8064 = vrcp.f32 %v6259_v10  ;;  %v6262_v42 = vpop.xlane.xlu1 %6261  ;;  %6415 = vrot.lane.b32.xlu1 %v6341_v59, %s8190_s22 }
 0x7df   : > { %v8053_v50 = vpop.eup %8052  ;;  %8066 = vrcp.f32 %v6262_v42  ;;  %6417 = vrot.lane.b32.xlu0 %v6342_v22, %s8190_s22 }
 0x7e0   : > { %v8055_v35 = vpop.eup %8054  ;;  %v6343_v51 = vmul.f32 %v8053_v50, %v10291_v15 }
 0x7e1   : > { %v6265_v23 = vpop.xlane.xlu0 %6264  ;;  %v6344_v63 = vmul.f32 %v8055_v35, %v10296_v38 }
 0x7e2   : > { %8068 = vrcp.f32 %v6265_v23  ;;  %v6268_v1 = vpop.xlane.xlu1 %6267  ;;  %6419 = vrot.lane.b32.xlu1 %v6343_v51, %s8190_s22 }
 0x7e3   : > { %v8057_v4 = vpop.eup %8056  ;;  %8070 = vrcp.f32 %v6268_v1  ;;  %6421 = vrot.lane.b32.xlu0 %v6344_v63, %s8190_s22 }
 0x7e4   : > { %v8059_v0 = vpop.eup %8058  ;;  %v6345_v37 = vmul.f32 %v8057_v4, %v10301_v20 }
 0x7e5   : > { %v6271_v31 = vpop.xlane.xlu0 %6270  ;;  %v6346_v7 = vmul.f32 %v8059_v0, %v10306_v28 }
 0x7e6   : > { %8072 = vrcp.f32 %v6271_v31  ;;  %v6274_v33 = vpop.xlane.xlu1 %6273  ;;  %6423 = vrot.lane.b32.xlu1 %v6345_v37, %s8190_s22 }
 0x7e7   : > { %v8061_v15 = vpop.eup %8060  ;;  %8074 = vrcp.f32 %v6274_v33  ;;  %6425 = vrot.lane.b32.xlu0 %v6346_v7, %s8190_s22 }
 0x7e8   : > { %v8063_v38 = vpop.eup %8062  ;;  %v6347_v17 = vmul.f32 %v8061_v15, %v10311_v16 }
 0x7e9   : > { %v6277_v32 = vpop.xlane.xlu0 %6276  ;;  %v6348_v24 = vmul.f32 %v8063_v38, %v10316_v48 }
 0x7ea   : > { %8076 = vrcp.f32 %v6277_v32  ;;  %v6280_v19 = vpop.xlane.xlu1 %6279  ;;  %6427 = vrot.lane.b32.xlu1 %v6347_v17, %s8190_s22 }
 0x7eb   : > { %v8065_v20 = vpop.eup %8064  ;;  %8078 = vrcp.f32 %v6280_v19  ;;  %6429 = vrot.lane.b32.xlu0 %v6348_v24, %s8190_s22 }
 0x7ec   : > { %v8067_v28 = vpop.eup %8066  ;;  %v6349_v13 = vmul.f32 %v8065_v20, %v10321_v49 }
 0x7ed   : > { %v6283_v14 = vpop.xlane.xlu0 %6282  ;;  %v6350_v11 = vmul.f32 %v8067_v28, %v10326_v55 }
 0x7ee   : > { %8080 = vrcp.f32 %v6283_v14  ;;  %v6286_v18 = vpop.xlane.xlu1 %6285  ;;  %6431 = vrot.lane.b32.xlu1 %v6349_v13, %s8190_s22 }
 0x7ef   : > { %v8069_v16 = vpop.eup %8068  ;;  %8082 = vrcp.f32 %v6286_v18  ;;  %6433 = vrot.lane.b32.xlu0 %v6350_v11, %s8190_s22 }
 0x7f0   : > { %v8071_v48 = vpop.eup %8070  ;;  %v6351_v60 = vmul.f32 %v8069_v16, %v10331_v46 }
 0x7f1   : > { %v6289_v59 = vpop.xlane.xlu0 %6288  ;;  %v6352_v10 = vmul.f32 %v8071_v48, %v10336_v40 }
 0x7f2   : > { %8084 = vrcp.f32 %v6289_v59  ;;  %v6292_v22 = vpop.xlane.xlu1 %6291  ;;  %6435 = vrot.lane.b32.xlu1 %v6351_v60, %s8190_s22 }
 0x7f3   : > { %v8073_v49 = vpop.eup %8072  ;;  %8086 = vrcp.f32 %v6292_v22  ;;  %6437 = vrot.lane.b32.xlu0 %v6352_v10, %s8190_s22 }
 0x7f4   : > { %v8075_v55 = vpop.eup %8074  ;;  %v6353_v42 = vmul.f32 %v8073_v49, %v10341_v53  ;;  %8088 = vtanh.f32 %v10041_v45 }
 0x7f5   : > { %v6354_v50 = vmul.f32 %v8075_v55, %v10346_v47  ;;  %8090 = vtanh.f32 %v10035_v2 }
 0x7f6   : > { %6439 = vrot.lane.b32.xlu1 %v6353_v42, %s8190_s22 }
 0x7f7   : > { %v8077_v35 = vpop.eup %8076  ;;  %6441 = vrot.lane.b32.xlu0 %v6354_v50, %s8190_s22 }
 0x7f8   : > { %v8079_v46 = vpop.eup %8078  ;;  %v6355_v40 = vmul.f32 %v8077_v35, %v10351_v61 }
 0x7f9   : > { %v6356_v51 = vmul.f32 %v8079_v46, %v10356_v54 }
 0x7fa   : > { %6443 = vrot.lane.b32.xlu1 %v6355_v40, %s8190_s22 }
 0x7fb   : > { %v8081_v23 = vpop.eup %8080  ;;  %6445 = vrot.lane.b32.xlu0 %v6356_v51, %s8190_s22 }
 0x7fc   : > { %v8083_v63 = vpop.eup %8082  ;;  %v6357_v53 = vmul.f32 %v8081_v23, %v10360_v25 }
 0x7fd   : > { %v6358_v47 = vmul.f32 %v8083_v63, %v10364_v27 }
 0x7fe   : > { %6447 = vrot.lane.b32.xlu1 %v6357_v53, %s8190_s22 }
 0x7ff   : > { %v8085_v1 = vpop.eup %8084  ;;  %6449 = vrot.lane.b32.xlu0 %v6358_v47, %s8190_s22 }
 0x800   : > { %v8087_v4 = vpop.eup %8086  ;;  %v6359_v61 = vmul.f32 %v8085_v1, %v10368_v39 }
 0x801   : > { %v6360_v54 = vmul.f32 %v8087_v4, %v10372_v34  ;;  %v8089_v27 = vpop.eup %8088  ;;  %v10740_v4 = vld [vmem:[#allocation4_spill] sm:$0xff] }
 0x802   : > { %6451 = vrot.lane.b32.xlu1 %v6359_v61, %s8190_s22  ;;  %v8091_v37 = vpop.eup %8090  ;;  %v6493_v39 = vsel %vm6491_vm2, %v8089_v27, %v10041_v45 }
 0x803   : > { %6453 = vrot.lane.b32.xlu0 %v6360_v54, %s8190_s22  ;;  %v6492_v7 = vsel %vm6491_vm2, %v8091_v37, %v10035_v2 }
 0x817   : > { %v6298_v25 = vpop.xlane.xlu1 %6297 }
 0x818   : > { %8092 = vrcp.f32 %v6298_v25  ;;  %v6295_v0 = vpop.xlane.xlu0 %6294 }
 0x819   : > { %8094 = vrcp.f32 %v6295_v0 }
 0x81a   : > { %8096 = vtanh.f32 %v10047_v21 }
 0x81b   : > { %v6398_v34 = vpop.permute.xlu1 %6397  ;;  %8098 = vtanh.f32 %v10053_v12 }
 0x81c   : > { %v6526_v31 = vsel %vm6524_vm3, %v6493_v39, %v6398_v34  ;;  %v6396_v33 = vpop.permute.xlu0 %6395  ;;  %8100 = vtanh.f32 %v10059_v43  ;;  %v10742_v34 = vld [vmem:[#allocation6_spill] sm:$0xff] }
 0x81d   : > { %6559 = vst.msk [vmem:[%s10485_s21 + $0x8] sm:$0xff] %vm6557_vm4, %v6526_v31  ;;  %v6525_v15 = vsel %vm6524_vm3, %v6492_v7, %v6396_v33  ;;  %8102 = vtanh.f32 %v10065_v30 }
 0x81e   : > { %6558 = vst.msk [vmem:[%s10485_s21] sm:$0xff] %vm6557_vm4, %v6525_v15  ;;  %8104 = vtanh.f32 %v10071_v41 }
 0x81f   : > { %8106 = vtanh.f32 %v10077_v26 }
 0x820   : > { %8108 = vtanh.f32 %v10083_v57 }
 0x821   : > { %8110 = vtanh.f32 %v10089_v44 }
 0x822   : > { %8112 = vtanh.f32 %v10095_v52 }
 0x823   : > { %8114 = vtanh.f32 %v10101_v58 }
 0x824   : > { %8116 = vtanh.f32 %v10107_v8 }
 0x825   : > { %v8093_v38 = vpop.eup %8092  ;;  %8118 = vtanh.f32 %v10113_v9 }
 0x826   : > { %v8095_v17 = vpop.eup %8094  ;;  %v6362_v32 = vmul.f32 %v8093_v38, %v10384_v5  ;;  %8120 = vtanh.f32 %v10119_v29 }
 0x827   : > { %v6361_v24 = vmul.f32 %v8095_v17, %v10380_v6  ;;  %v8097_v2 = vpop.eup %8096  ;;  %8122 = vtanh.f32 %v10125_v3 }
 0x828   : > { %6457 = vrot.lane.b32.xlu0 %v6362_v32, %s8190_s22  ;;  %v8099_v45 = vpop.eup %8098  ;;  %v6494_v6 = vsel %vm6491_vm2, %v8097_v2, %v10047_v21  ;;  %8124 = vtanh.f32 %v10131_v56 }
 0x829   : > { %6455 = vrot.lane.b32.xlu1 %v6361_v24, %s8190_s22  ;;  %v8101_v19 = vpop.eup %8100  ;;  %v6495_v28 = vsel %vm6491_vm2, %v8099_v45, %v10053_v12  ;;  %8126 = vtanh.f32 %v10137_v62  ;;  %v10744_v24 = vld [vmem:[#allocation8_spill] sm:$0xff] }
 0x82a   : > { %v8103_v14 = vpop.eup %8102  ;;  %v6496_v21 = vsel %vm6491_vm2, %v8101_v19, %v10059_v43  ;;  %8128 = vtanh.f32 %v10143_v36 }
 0x82b   : > { %v8105_v16 = vpop.eup %8104  ;;  %v6497_v48 = vsel %vm6491_vm2, %v8103_v14, %v10065_v30  ;;  %8130 = vtanh.f32 %v10740_v4 }
 0x82c   : > { %v8107_v59 = vpop.eup %8106  ;;  %v6498_v43 = vsel %vm6491_vm2, %v8105_v16, %v10071_v41 }
 0x82d   : > { %v8109_v49 = vpop.eup %8108  ;;  %v6499_v55 = vsel %vm6491_vm2, %v8107_v59, %v10077_v26 }
 0x82e   : > { %v8111_v50 = vpop.eup %8110  ;;  %v6500_v41 = vsel %vm6491_vm2, %v8109_v49, %v10083_v57 }
 0x82f   : > { %v8113_v40 = vpop.eup %8112  ;;  %v6501_v51 = vsel %vm6491_vm2, %v8111_v50, %v10089_v44 }
 0x830   : > { %v8115_v63 = vpop.eup %8114  ;;  %v6502_v57 = vsel %vm6491_vm2, %v8113_v40, %v10095_v52  ;;  %v10741_v52 = vld [vmem:[#allocation5_spill] sm:$0xff] }
 0x831   : > { %v8117_v1 = vpop.eup %8116  ;;  %v6503_v61 = vsel %vm6491_vm2, %v8115_v63, %v10101_v58  ;;  %8132 = vtanh.f32 %v10741_v52 }
 0x832   : > { %v8119_v25 = vpop.eup %8118  ;;  %v6504_v0 = vsel %vm6491_vm2, %v8117_v1, %v10107_v8  ;;  %8134 = vtanh.f32 %v10742_v34  ;;  %v10743_v8 = vld [vmem:[#allocation7_spill] sm:$0xff] }
 0x833   : > { %v8121_v39 = vpop.eup %8120  ;;  %v6505_v31 = vsel %vm6491_vm2, %v8119_v25, %v10113_v9  ;;  %8136 = vtanh.f32 %v10743_v8 }
 0x834   : > { %v8123_v33 = vpop.eup %8122  ;;  %v6506_v38 = vsel %vm6491_vm2, %v8121_v39, %v10119_v29  ;;  %8138 = vtanh.f32 %v10744_v24  ;;  %v10745_v29 = vld [vmem:[#allocation9_spill] sm:$0xff] }
 0x835   : > { %v8125_v32 = vpop.eup %8124  ;;  %v6507_v2 = vsel %vm6491_vm2, %v8123_v33, %v10125_v3  ;;  %8140 = vtanh.f32 %v10745_v29 }
 0x836   : > { %v6508_v19 = vsel %vm6491_vm2, %v8125_v32, %v10131_v56  ;;  %v10747_v56 = vld [vmem:[#allocation11_spill] sm:$0xff] }
 0x840   : > { %v6400_v5 = vpop.permute.xlu1 %6399 }
 0x841   : > { %v6527_v20 = vsel %vm6524_vm3, %v6494_v6, %v6400_v5  ;;  %v6402_v13 = vpop.permute.xlu0 %6401  ;;  %v8127_v6 = vpop.eup %8126 }
 0x842   : > { %6560 = vst.msk [vmem:[%s10485_s21 + $0x10] sm:$0xff] %vm6557_vm4, %v6527_v20  ;;  %v6528_v11 = vsel %vm6524_vm3, %v6495_v28, %v6402_v13  ;;  %v8129_v28 = vpop.eup %8128  ;;  %v10746_v13 = vld [vmem:[#allocation10_spill] sm:$0xff]  ;;  %v6509_v14 = vsel %vm6491_vm2, %v8127_v6, %v10137_v62 }
 0x843   : > { %6561 = vst.msk [vmem:[%s10485_s21 + $0x18] sm:$0xff] %vm6557_vm4, %v6528_v11  ;;  %8142 = vtanh.f32 %v10746_v13  ;;  %v6510_v16 = vsel %vm6491_vm2, %v8129_v28, %v10143_v36  ;;  %v10749_v36 = vld [vmem:[#allocation13_spill] sm:$0xff] }
 0x844   : > { %v6404_v18 = vpop.permute.xlu1 %6403  ;;  %8144 = vtanh.f32 %v10747_v56 }
 0x845   : > { %v6529_v12 = vsel %vm6524_vm3, %v6496_v21, %v6404_v18  ;;  %v6406_v60 = vpop.permute.xlu0 %6405  ;;  %v8131_v21 = vpop.eup %8130 }
 0x846   : > { %6562 = vst.msk [vmem:[%s10485_s21 + $0x20] sm:$0xff] %vm6557_vm4, %v6529_v12  ;;  %v6530_v10 = vsel %vm6524_vm3, %v6497_v48, %v6406_v60  ;;  %v8133_v48 = vpop.eup %8132  ;;  %v10748_v60 = vld [vmem:[#allocation12_spill] sm:$0xff]  ;;  %v6511_v59 = vsel %vm6491_vm2, %v8131_v21, %v10740_v4 }
 0x847   : > { %6563 = vst.msk [vmem:[%s10485_s21 + $0x28] sm:$0xff] %vm6557_vm4, %v6530_v10  ;;  %8146 = vtanh.f32 %v10748_v60  ;;  %v6512_v49 = vsel %vm6491_vm2, %v8133_v48, %v10741_v52 }
 0x848   : > { %v6408_v22 = vpop.permute.xlu1 %6407  ;;  %8148 = vtanh.f32 %v10749_v36 }
 0x849   : > { %v6531_v30 = vsel %vm6524_vm3, %v6498_v43, %v6408_v22  ;;  %v6410_v42 = vpop.permute.xlu0 %6409  ;;  %v8135_v43 = vpop.eup %8134 }
 0x84a   : > { %6564 = vst.msk [vmem:[%s10485_s21 + $0x30] sm:$0xff] %vm6557_vm4, %v6531_v30  ;;  %v6532_v35 = vsel %vm6524_vm3, %v6499_v55, %v6410_v42  ;;  %v8137_v55 = vpop.eup %8136  ;;  %v10750_v42 = vld [vmem:[#allocation14_spill] sm:$0xff] }
 0x84b   : > { %6565 = vst.msk [vmem:[%s10485_s21 + $0x38] sm:$0xff] %vm6557_vm4, %v6532_v35  ;;  %8150 = vtanh.f32 %v10750_v42  ;;  %v6513_v35 = vsel %vm6491_vm2, %v8135_v43, %v10742_v34 }
 0x84c   : > { %v6412_v46 = vpop.permute.xlu1 %6411 }
 0x84d   : > { %v6533_v26 = vsel %vm6524_vm3, %v6500_v41, %v6412_v46  ;;  %v6414_v23 = vpop.permute.xlu0 %6413  ;;  %v8139_v46 = vpop.eup %8138 }
 0x84e   : > { %6566 = vst.msk [vmem:[%s10485_s21 + $0x40] sm:$0xff] %vm6557_vm4, %v6533_v26  ;;  %v6534_v53 = vsel %vm6524_vm3, %v6501_v51, %v6414_v23  ;;  %v6514_v26 = vsel %vm6491_vm2, %v8137_v55, %v10743_v8  ;;  %v8141_v23 = vpop.eup %8140 }
 0x84f   : > { %6567 = vst.msk [vmem:[%s10485_s21 + $0x48] sm:$0xff] %vm6557_vm4, %v6534_v53  ;;  %v6515_v53 = vsel %vm6491_vm2, %v8139_v46, %v10744_v24  ;;  %v6516_v4 = vsel %vm6491_vm2, %v8141_v23, %v10745_v29 }
 0x850   : > { %v6416_v47 = vpop.permute.xlu1 %6415 }
 0x851   : > { %v6535_v44 = vsel %vm6524_vm3, %v6502_v57, %v6416_v47  ;;  %v6418_v54 = vpop.permute.xlu0 %6417  ;;  %v8143_v47 = vpop.eup %8142 }
 0x852   : > { %6568 = vst.msk [vmem:[%s10485_s21 + $0x50] sm:$0xff] %vm6557_vm4, %v6535_v44  ;;  %v6536_v27 = vsel %vm6524_vm3, %v6503_v61, %v6418_v54  ;;  %v8145_v61 = vpop.eup %8144  ;;  %v6517_v25 = vsel %vm6491_vm2, %v8143_v47, %v10746_v13 }
 0x853   : > { %6569 = vst.msk [vmem:[%s10485_s21 + $0x58] sm:$0xff] %vm6557_vm4, %v6536_v27 }
 0x854   : > { %v6420_v37 = vpop.permute.xlu1 %6419  ;;  %v8147_v52 = vpop.eup %8146 }
 0x855   : > { %v6537_v58 = vsel %vm6524_vm3, %v6504_v0, %v6420_v37  ;;  %v6422_v7 = vpop.permute.xlu0 %6421  ;;  %v6518_v37 = vsel %vm6491_vm2, %v8145_v61, %v10747_v56  ;;  %v8149_v34 = vpop.eup %8148 }
 0x856   : > { %6570 = vst.msk [vmem:[%s10485_s21 + $0x60] sm:$0xff] %vm6557_vm4, %v6537_v58  ;;  %v6538_v15 = vsel %vm6524_vm3, %v6505_v31, %v6422_v7  ;;  %v6519_v31 = vsel %vm6491_vm2, %v8147_v52, %v10748_v60  ;;  %v6520_v8 = vsel %vm6491_vm2, %v8149_v34, %v10749_v36 }
 0x857   : > { %6571 = vst.msk [vmem:[%s10485_s21 + $0x68] sm:$0xff] %vm6557_vm4, %v6538_v15 }
 0x858   : > { %v6424_v17 = vpop.permute.xlu1 %6423  ;;  %v8151_v33 = vpop.eup %8150 }
 0x859   : > { %v6539_v9 = vsel %vm6524_vm3, %v6506_v38, %v6424_v17  ;;  %v6426_v45 = vpop.permute.xlu0 %6425  ;;  %v6521_v32 = vsel %vm6491_vm2, %v8151_v33, %v10750_v42 }
 0x85a   : > { %6572 = vst.msk [vmem:[%s10485_s21 + $0x70] sm:$0xff] %vm6557_vm4, %v6539_v9  ;;  %v6540_v5 = vsel %vm6524_vm3, %v6507_v2, %v6426_v45  ;;  %v10751_v2 = vld [vmem:[#allocation16_spill] sm:$0xff]  ;;  %v10752_v45 = vld [vmem:[#allocation15_spill] sm:$0xff] }
 0x85b   : > { %6573 = vst.msk [vmem:[%s10485_s21 + $0x78] sm:$0xff] %vm6557_vm4, %v6540_v5  ;;  %8152 = vtanh.f32 %v10751_v2 }
 0x85c   : > { %v6428_v20 = vpop.permute.xlu1 %6427  ;;  %8154 = vtanh.f32 %v10752_v45 }
 0x85d   : > { %v6541_v3 = vsel %vm6524_vm3, %v6508_v19, %v6428_v20  ;;  %v6430_v11 = vpop.permute.xlu0 %6429 }
 0x85e   : > { %6574 = vst.msk [vmem:[%s10485_s21 + $0x80] sm:$0xff] %vm6557_vm4, %v6541_v3  ;;  %v6542_v18 = vsel %vm6524_vm3, %v6509_v14, %v6430_v11 }
 0x85f   : > { %6575 = vst.msk [vmem:[%s10485_s21 + $0x88] sm:$0xff] %vm6557_vm4, %v6542_v18 }
 0x860   : > { %v6432_v12 = vpop.permute.xlu1 %6431 }
 0x861   : > { %v6543_v62 = vsel %vm6524_vm3, %v6510_v16, %v6432_v12  ;;  %v6434_v10 = vpop.permute.xlu0 %6433 }
 0x862   : > { %6576 = vst.msk [vmem:[%s10485_s21 + $0x90] sm:$0xff] %vm6557_vm4, %v6543_v62  ;;  %v6544_v22 = vsel %vm6524_vm3, %v6511_v59, %v6434_v10 }
 0x863   : > { %6577 = vst.msk [vmem:[%s10485_s21 + $0x98] sm:$0xff] %vm6557_vm4, %v6544_v22 }
 0x864   : > { %v6436_v30 = vpop.permute.xlu1 %6435 }
 0x865   : > { %v6545_v50 = vsel %vm6524_vm3, %v6512_v49, %v6436_v30  ;;  %v6438_v41 = vpop.permute.xlu0 %6437 }
 0x866   : > { %6578 = vst.msk [vmem:[%s10485_s21 + $0xa0] sm:$0xff] %vm6557_vm4, %v6545_v50  ;;  %v6546_v40 = vsel %vm6524_vm3, %v6513_v35, %v6438_v41 }
 0x867   : > { %6579 = vst.msk [vmem:[%s10485_s21 + $0xa8] sm:$0xff] %vm6557_vm4, %v6546_v40 }
 0x868   : > { %v6440_v51 = vpop.permute.xlu1 %6439  ;;  %v8153_v6 = vpop.eup %8152 }
 0x869   : > { %v6547_v63 = vsel %vm6524_vm3, %v6514_v26, %v6440_v51  ;;  %v6442_v57 = vpop.permute.xlu0 %6441  ;;  %v8155_v5 = vpop.eup %8154  ;;  %v6523_v29 = vsel %vm6491_vm2, %v8153_v6, %v10751_v2 }
 0x86a   : > { %6580 = vst.msk [vmem:[%s10485_s21 + $0xb0] sm:$0xff] %vm6557_vm4, %v6547_v63  ;;  %v6548_v1 = vsel %vm6524_vm3, %v6515_v53, %v6442_v57  ;;  %v6522_v13 = vsel %vm6491_vm2, %v8155_v5, %v10752_v45 }
 0x86b   : > { %6581 = vst.msk [vmem:[%s10485_s21 + $0xb8] sm:$0xff] %vm6557_vm4, %v6548_v1 }
 0x86c   : > { %v6444_v44 = vpop.permute.xlu1 %6443 }
 0x86d   : > { %v6549_v54 = vsel %vm6524_vm3, %v6516_v4, %v6444_v44  ;;  %v6446_v27 = vpop.permute.xlu0 %6445 }
 0x86e   : > { %6582 = vst.msk [vmem:[%s10485_s21 + $0xc0] sm:$0xff] %vm6557_vm4, %v6549_v54  ;;  %v6550_v0 = vsel %vm6524_vm3, %v6517_v25, %v6446_v27 }
 0x86f   : > { %6583 = vst.msk [vmem:[%s10485_s21 + $0xc8] sm:$0xff] %vm6557_vm4, %v6550_v0 }
 0x870   : > { %v6448_v39 = vpop.permute.xlu1 %6447 }
 0x871   : > { %v6551_v58 = vsel %vm6524_vm3, %v6518_v37, %v6448_v39  ;;  %v6450_v7 = vpop.permute.xlu0 %6449 }
 0x872   : > { %6584 = vst.msk [vmem:[%s10485_s21 + $0xd0] sm:$0xff] %vm6557_vm4, %v6551_v58  ;;  %v6552_v15 = vsel %vm6524_vm3, %v6519_v31, %v6450_v7 }
 0x873   : > { %6585 = vst.msk [vmem:[%s10485_s21 + $0xd8] sm:$0xff] %vm6557_vm4, %v6552_v15 }
 0x874   : > { %v6452_v38 = vpop.permute.xlu1 %6451 }
 0x875   : > { %v6553_v17 = vsel %vm6524_vm3, %v6520_v8, %v6452_v38  ;;  %v6454_v24 = vpop.permute.xlu0 %6453 }
 0x876   : > { %6586 = vst.msk [vmem:[%s10485_s21 + $0xe0] sm:$0xff] %vm6557_vm4, %v6553_v17  ;;  %v6554_v9 = vsel %vm6524_vm3, %v6521_v32, %v6454_v24 }
 0x877   : > { %6587 = vst.msk [vmem:[%s10485_s21 + $0xe8] sm:$0xff] %vm6557_vm4, %v6554_v9 }
 0x89a   : > { %v6458_v19 = vpop.permute.xlu0 %6457 }
 0x89b   : > { %v6556_v20 = vsel %vm6524_vm3, %v6523_v29, %v6458_v19  ;;  %v6456_v28 = vpop.permute.xlu1 %6455 }
 0x89c   : > { %6589 = vst.msk [vmem:[%s10485_s21 + $0xf8] sm:$0xff] %vm6557_vm4, %v6556_v20  ;;  %v6555_v3 = vsel %vm6524_vm3, %v6522_v13, %v6456_v28 }
 0x89d   : > { %6588 = vst.msk [vmem:[%s10485_s21 + $0xf0] sm:$0xff] %vm6557_vm4, %v6555_v3 }
 0x89e PF: > { %s20_s15 = sadd.s32 1, %s8183_s15   ;;  %s10753_s13 = smov %s8179_s14 }
 0x89f   : > { %p17_p5 = scmp.ge.s32.totalorder %s20_s15, 4   ;;  %s10754_s14 = smov %s10756_s16 }
 0x8a1   :  { %19 = sbr.rel (!%p17_p5) target bundleno = 2 (0x2), region = 98 }

</bundles_post_ra>
